<compile_context>
chip_gen: v5e
topology: v5e:2x2
jax: 0.10.0
libtpu: 0.0.40
codegen_flags: <defaults>
</compile_context>

<pallas_src>
import functools

import jax
import jax.numpy as jnp
from jax.experimental import pallas as pl
from jax.experimental.pallas import tpu as pltpu

_EPS = 1e-5
_BIG = 1e30          # pad value magnitude; ReLU(scale*(-BIG)+shift) == 0 exactly
_LANE = 128
_MAX_TK = 2048       # single-K-step cap (VMEM-safe on v7x's 64 MiB as well)


# ----------------------------------------------------------------------------
# Tiling helpers
# ----------------------------------------------------------------------------
def _round_up(x, m):
    return (x + m - 1) // m * m


def _pad_k(K):
    return _round_up(K, _LANE)


def _pad_n(N):
    return _round_up(N, _LANE)


def _pick_tm(M):
    # Single M tile (multiple of 16 for bf16 sublane packing) for small M;
    # per-tile work << per-grid-step overhead here, so splitting tiny M only
    # adds launch cost.  128 for larger M.
    if M <= 256:
        return _round_up(M, 16)
    return 128


def _pick_tk(Kp):
    if Kp <= _MAX_TK:
        return Kp                    # single K step: no scratch, no pl.when
    for cand in (2048, 1024, 512, 256):
        if Kp % cand == 0:
            return cand
    return 128


def _pick_tn(N, Np):
    # v6e/v7x MXU is 2x256^2: feed the full width once N is big enough.
    if N >= 256 and Np % 256 == 0:
        return 256
    return 128


# ----------------------------------------------------------------------------
# Fused Pallas GEMM kernel
#   out = epilogue( prologue(A) @ B )
#   prologue (optional): bf16 FMA (BN scale/shift) + ReLU on the A tile
#   epilogue            : f32 scale/shift (+ReLU) on the accumulator, cast+store
# ----------------------------------------------------------------------------
def _gemm_kernel(*refs, has_pre, post_relu, multi):
    if has_pre:
        a_ref, b_ref, si_ref, ti_ref, so_ref, to_ref = refs[:6]
        idx = 6
    else:
        a_ref, b_ref, so_ref, to_ref = refs[:4]
        idx = 4
    o_ref = refs[idx]
    acc_ref = refs[idx + 1] if multi else None

    a = a_ref[...]
    if has_pre:
        # bf16 FMA + ReLU (fused preceding BatchNorm + ReLU).
        a = jnp.maximum(a * si_ref[...] + ti_ref[...], 0)

    part = jnp.dot(a, b_ref[...], preferred_element_type=jnp.float32)

    def _epilogue(acc):
        y = acc * so_ref[...] + to_ref[...]
        if post_relu:
            y = jnp.maximum(y, 0.0)
        o_ref[...] = y.astype(o_ref.dtype)

    if multi:
        # Fallback for K > _MAX_TK (not hit in this model).
        @pl.when(pl.program_id(2) == 0)
        def _():
            acc_ref[...] = jnp.zeros_like(acc_ref)

        acc_ref[...] += part

        @pl.when(pl.program_id(2) == pl.num_programs(2) - 1)
        def _():
            _epilogue(acc_ref[...])
    else:
        _epilogue(part)


def fused_matmul(a, pk, out_dtype):
    """a: (M, K) activation matrix (any float dtype; cast to bf16).
    pk: packed conv dict with pre-padded bf16 B, bf16 si/ti, f32 so/to."""
    M, K = a.shape
    N = pk['N']
    assert K == pk['K'], (K, pk['K'])

    Kp, Np = pk['Kp'], pk['Np']
    tm = _pick_tm(M)
    Mp = _round_up(M, tm)
    tk = _pick_tk(Kp)
    tn = _pick_tn(N, Np)
    multi = (tk != Kp)
    has_pre = pk['pre']

    a_p = a.astype(jnp.bfloat16)
    if Mp != M or Kp != K:
        a_p = jnp.pad(a_p, ((0, Mp - M), (0, Kp - K)))

    in_specs = [pl.BlockSpec((tm, tk), lambda i, j, k: (i, k)),
                pl.BlockSpec((tk, tn), lambda i, j, k: (k, j))]
    operands = [a_p, pk['b']]
    if has_pre:
        in_specs += [pl.BlockSpec((1, tk), lambda i, j, k: (0, k)),
                     pl.BlockSpec((1, tk), lambda i, j, k: (0, k))]
        operands += [pk['si'], pk['ti']]
    in_specs += [pl.BlockSpec((1, tn), lambda i, j, k: (0, j)),
                 pl.BlockSpec((1, tn), lambda i, j, k: (0, j))]
    operands += [pk['so'], pk['to']]

    scratch = [pltpu.VMEM((tm, tn), jnp.float32)] if multi else []

    kernel = functools.partial(_gemm_kernel, has_pre=has_pre,
                               post_relu=pk['post_relu'], multi=multi)
    out = pl.pallas_call(
        kernel,
        out_shape=jax.ShapeDtypeStruct((Mp, Np), out_dtype),
        grid_spec=pltpu.PrefetchScalarGridSpec(
            num_scalar_prefetch=0,
            grid=(Mp // tm, Np // tn, Kp // tk),
            in_specs=in_specs,
            out_specs=pl.BlockSpec((tm, tn), lambda i, j, k: (i, j)),
            scratch_shapes=scratch),
        compiler_params=pltpu.CompilerParams(
            dimension_semantics=("parallel", "parallel", "arbitrary")),
    )(*operands)
    return out[:M, :N]


# ----------------------------------------------------------------------------
# Parameter packing: conv weight + BN vectors -> padded GEMM-layout operands
# ----------------------------------------------------------------------------
def _bn_affine(bn, eps=_EPS):
    scale = bn['gamma'] * jax.lax.rsqrt(bn['var'] + eps)
    shift = bn['beta'] - bn['mean'] * scale
    return scale, shift


def pack_conv(w_oihw, *, bias=None, pre_bn=None, post_bn=None, post_relu=False,
              stride=1, padding=0, dilation=1):
    """Pre-pack a Conv2d into its fused-GEMM operands (done once at init)."""
    Cout, Cin, KH, KW = w_oihw.shape
    K, N = KH * KW * Cin, Cout
    Kp, Np = _pad_k(K), _pad_n(N)

    wmat = jnp.transpose(w_oihw, (2, 3, 1, 0)).reshape(K, N)   # (ki,kj,c) x Cout
    b = jnp.pad(wmat, ((0, Kp - K), (0, Np - N))).astype(jnp.bfloat16)

    pk = dict(b=b, K=K, N=N, Kp=Kp, Np=Np, Cin=Cin, Cout=Cout, KH=KH, KW=KW,
              stride=stride, padding=padding, dilation=dilation,
              post_relu=post_relu, pre=pre_bn is not None)

    if pre_bn is not None:
        s, t = _bn_affine(pre_bn)
        si = jnp.tile(s, KH * KW)
        ti = jnp.tile(t, KH * KW)
        pk['si'] = jnp.pad(si, (0, Kp - K)).reshape(1, Kp).astype(jnp.bfloat16)
        pk['ti'] = jnp.pad(ti, (0, Kp - K)).reshape(1, Kp).astype(jnp.bfloat16)
        # Raw-input pad value that the fused BN+ReLU maps to exactly 0.
        pk['pad_val'] = jnp.where(s >= 0, -_BIG, _BIG).astype(jnp.float32)
    else:
        pk['pad_val'] = jnp.zeros((Cin,), jnp.float32)

    bias_v = (jnp.zeros((N,), jnp.float32) if bias is None
              else bias.astype(jnp.float32))
    if post_bn is not None:
        so, post_shift = _bn_affine(post_bn)
        to = bias_v * so + post_shift
    else:
        so = jnp.ones((N,), jnp.float32)
        to = bias_v
    pk['so'] = jnp.pad(so, (0, Np - N)).reshape(1, Np).astype(jnp.float32)
    pk['to'] = jnp.pad(to, (0, Np - N)).reshape(1, Np).astype(jnp.float32)
    return pk


def pack_conv_transpose(w_iohw, *, stride, padding, output_padding,
                        bias=None, pre_bn=None):
    """ConvTranspose2d packed as an equivalent stride-1 conv on a
    dilated+padded canvas (weight flipped spatially, channels swapped)."""
    w = jnp.flip(w_iohw, axis=(2, 3))
    w = jnp.transpose(w, (1, 0, 2, 3))                # (Cout, Cin, KH, KW)
    pk = pack_conv(w, bias=bias, pre_bn=pre_bn, stride=1, padding=0, dilation=1)
    pk['transpose'] = dict(stride=stride, padding=padding,
                           output_padding=output_padding)
    return pk


# ----------------------------------------------------------------------------
# Conv application (im2col glue feeding the fused Pallas GEMM)
# ----------------------------------------------------------------------------
def apply_conv(x_nhwc, pk, out_dtype=jnp.bfloat16):
    N, H, W, Cin = x_nhwc.shape
    assert Cin == pk['Cin']
    KH, KW = pk['KH'], pk['KW']
    s, p, d = pk['stride'], pk['padding'], pk['dilation']

    if p > 0:
        Hp, Wp = H + 2 * p, W + 2 * p
        canvas = jnp.broadcast_to(pk['pad_val'].astype(x_nhwc.dtype),
                                  (N, Hp, Wp, Cin))
        xp = canvas.at[:, p:p + H, p:p + W, :].set(x_nhwc)
    else:
        xp, Hp, Wp = x_nhwc, H, W

    Hout = (Hp - d * (KH - 1) - 1) // s + 1
    Wout = (Wp - d * (KW - 1) - 1) // s + 1

    if KH == 1 and KW == 1 and s == 1 and d == 1:
        a = xp.reshape(N * Hout * Wout, Cin)          # 1x1 conv: pure reshape
    else:
        cols = []
        for ki in range(KH):
            for kj in range(KW):
                cols.append(
                    xp[:,
                       ki * d: ki * d + (Hout - 1) * s + 1: s,
                       kj * d: kj * d + (Wout - 1) * s + 1: s,
                       :])
        a = jnp.stack(cols, axis=3).reshape(N * Hout * Wout, KH * KW * Cin)

    y = fused_matmul(a, pk, out_dtype)
    return y.reshape(N, Hout, Wout, pk['Cout'])


def apply_conv_transpose(x_nhwc, pk, out_dtype=jnp.bfloat16):
    t = pk['transpose']
    s, p, op = t['stride'], t['padding'], t['output_padding']
    N, H, W, Cin = x_nhwc.shape
    KH, KW = pk['KH'], pk['KW']

    Hd, Wd = (H - 1) * s + 1, (W - 1) * s + 1
    pad_t, pad_l = KH - 1 - p, KW - 1 - p
    pad_b, pad_r = pad_t + op, pad_l + op
    Hp, Wp = Hd + pad_t + pad_b, Wd + pad_l + pad_r

    canvas = jnp.broadcast_to(pk['pad_val'].astype(x_nhwc.dtype),
                              (N, Hp, Wp, Cin))
    xp = canvas.at[:, pad_t:pad_t + Hd:s, pad_l:pad_l + Wd:s, :].set(x_nhwc)
    # The packed weight is already flipped/transposed; correlate with stride 1.
    return apply_conv(xp, pk, out_dtype)


# ----------------------------------------------------------------------------
# Parameter initialization (deterministic, synthetic) + packing
# ----------------------------------------------------------------------------
class KeyGen:
    def __init__(self, seed):
        self._key = jax.random.PRNGKey(seed)

    def __call__(self):
        self._key, k = jax.random.split(self._key)
        return k


def _normal(kg, shape, scale=0.1):
    return scale * jax.random.normal(kg(), shape, jnp.float32)


def init_conv_w(kg, cout, cin, kh, kw):
    return _normal(kg, (cout, cin, kh, kw))


def init_convT_w(kg, cin, cout, kh, kw):
    return _normal(kg, (cin, cout, kh, kw))


def init_bn(kg, c):
    return dict(gamma=1.0 + _normal(kg, (c,)),
                beta=_normal(kg, (c,)),
                mean=_normal(kg, (c,)),
                var=1.0 + jnp.abs(_normal(kg, (c,))))


SK_KERNELS = (1, 3, 5, 7)
SK_L = 32


def init_sk(kg, channel, reduction=1):
    """Canonical SKAttention; the 4 branch convs are merged into ONE packed
    GEMM: each branch's kxk weights are embedded (centered) into a shared 7x7
    footprint with zeros elsewhere, output channels are branch-major."""
    d = max(SK_L, channel // reduction)
    nk, kmax = len(SK_KERNELS), max(SK_KERNELS)

    w_merged = jnp.zeros((nk * channel, channel, kmax, kmax), jnp.float32)
    biases, gammas, betas, means, vars_ = [], [], [], [], []
    for idx, k in enumerate(SK_KERNELS):
        w = init_conv_w(kg, channel, channel, k, k)
        off = (kmax - k) // 2
        w_merged = w_merged.at[idx * channel:(idx + 1) * channel, :,
                               off:off + k, off:off + k].set(w)
        biases.append(_normal(kg, (channel,)))
        bn = init_bn(kg, channel)
        gammas.append(bn['gamma']); betas.append(bn['beta'])
        means.append(bn['mean']); vars_.append(bn['var'])

    conv = pack_conv(w_merged,
                     bias=jnp.concatenate(biases),
                     post_bn=dict(gamma=jnp.concatenate(gammas),
                                  beta=jnp.concatenate(betas),
                                  mean=jnp.concatenate(means),
                                  var=jnp.concatenate(vars_)),
                     post_relu=True, stride=1, padding=kmax // 2, dilation=1)

    fc_w = _normal(kg, (d, channel))
    fc_b = _normal(kg, (d,))
    fcs_w = jnp.concatenate([_normal(kg, (channel, d)).T for _ in SK_KERNELS],
                            axis=1)                       # (d, nk*channel)
    fcs_b = jnp.concatenate([_normal(kg, (channel,)) for _ in SK_KERNELS])
    return dict(conv=conv, fc_w=fc_w, fc_b=fc_b, fcs_w=fcs_w, fcs_b=fcs_b)


def init_dense_layer(kg, in_features, growth_rate):
    norm1 = init_bn(kg, in_features)
    conv1 = pack_conv(init_conv_w(kg, growth_rate, in_features, 3, 3),
                      pre_bn=norm1, stride=1, padding=1)
    return dict(conv1=conv1, sk=init_sk(kg, growth_rate, reduction=1))


def init_transition_down(kg, in_f, out_f):
    conv1 = pack_conv(init_conv_w(kg, out_f, in_f, 1, 1),
                      pre_bn=init_bn(kg, in_f))
    conv2 = pack_conv(init_conv_w(kg, out_f, out_f, 3, 3),
                      pre_bn=init_bn(kg, out_f), stride=2, padding=1)
    return dict(conv1=conv1, conv2=conv2)


def init_transition_up(kg, in_f, out_f):
    conv1 = pack_conv(init_conv_w(kg, out_f, in_f, 1, 1),
                      pre_bn=init_bn(kg, in_f))
    convT2 = pack_conv_transpose(init_convT_w(kg, out_f, out_f, 3, 3),
                                 stride=2, padding=1, output_padding=1,
                                 pre_bn=init_bn(kg, out_f))
    return dict(conv1=conv1, convT2=convT2)


def init_last_decoding(kg, in_f, out_channels):
    conv1 = pack_conv(init_conv_w(kg, in_f // 2, in_f, 1, 1),
                      pre_bn=init_bn(kg, in_f))
    convT2 = pack_conv_transpose(init_convT_w(kg, in_f // 2, out_channels, 4, 4),
                                 stride=2, padding=1, output_padding=1,
                                 pre_bn=init_bn(kg, in_f // 2))
    return dict(conv1=conv1, convT2=convT2)


def init_dense_ed(kg, in_channels, out_channels, blocks, growth_rate=16,
                  init_features=48, bn_size=8, bottleneck=False):
    if len(blocks) > 1 and len(blocks) % 2 == 0:
        raise ValueError('length of blocks must be an odd number')
    assert not bottleneck  # TODO(synk): bottleneck dense-layer branch unused in this config.
    enc_blocks = blocks[:len(blocks) // 2]
    dec_blocks = blocks[len(blocks) // 2:]

    params = {'in_conv': pack_conv(init_conv_w(kg, init_features, in_channels, 5, 5),
                                   stride=2, padding=2, dilation=2),
              'enc': [], 'dec': []}
    nf = init_features
    for nl in enc_blocks:
        block = [init_dense_layer(kg, nf + i * growth_rate, growth_rate)
                 for i in range(nl)]
        nf += nl * growth_rate
        trans = init_transition_down(kg, nf, nf // 2)
        nf //= 2
        params['enc'].append({'block': block, 'trans': trans})
    for i, nl in enumerate(dec_blocks):
        block = [init_dense_layer(kg, nf + j * growth_rate, growth_rate)
                 for j in range(nl)]
        nf += nl * growth_rate
        trans = None
        if i < len(dec_blocks) - 1:
            trans = init_transition_up(kg, nf, nf // 2)
            nf //= 2
        params['dec'].append({'block': block, 'trans': trans})
    params['last'] = init_last_decoding(kg, nf, out_channels)
    params['adj'] = pack_conv(init_conv_w(kg, out_channels, out_channels, 3, 3),
                              stride=1, padding=1)
    return params


# ----------------------------------------------------------------------------
# Forward pass (mirrors DenseED.forward, eval mode)
# ----------------------------------------------------------------------------
def sk_attention_fwd(x, p):
    nb, h, w, c = x.shape
    nk = len(SK_KERNELS)
    # All 4 branch convs (+bias+BN+ReLU) in one fused Pallas GEMM.
    y = apply_conv(x, p['conv'])                       # (nb, h, w, nk*c) bf16
    y = y.reshape(nb, h, w, nk, c)

    u = y.sum(axis=3).astype(jnp.float32)              # U = sum of branches
    s = u.mean(axis=(1, 2))                            # (nb, c)
    z = jnp.dot(s, p['fc_w'].T) + p['fc_b'][None, :]   # (nb, d)
    logits = (jnp.dot(z, p['fcs_w']) + p['fcs_b'][None, :]).reshape(nb, nk, c)
    att = jax.nn.softmax(logits, axis=1)               # softmax over kernels

    out = (y.astype(jnp.float32) * att[:, None, None, :, :]).sum(axis=3)
    return out.astype(jnp.bfloat16)


def dense_layer_fwd(x, p):
    # BN -> ReLU -> 3x3 conv (BN+ReLU fused into the GEMM prologue), then SK.
    y = apply_conv(x, p['conv1'])
    y = sk_attention_fwd(y, p['sk'])
    return jnp.concatenate([x, y], axis=-1)            # torch.cat([x, y], dim=1)


def dense_block_fwd(x, layers):
    for lp in layers:
        x = dense_layer_fwd(x, lp)
    return x


def transition_down_fwd(x, p):
    y = apply_conv(x, p['conv1'])                      # BN+ReLU -> 1x1
    return apply_conv(y, p['conv2'])                   # BN+ReLU -> 3x3 s2


def transition_up_fwd(x, p):
    y = apply_conv(x, p['conv1'])                      # BN+ReLU -> 1x1
    return apply_conv_transpose(y, p['convT2'])        # BN+ReLU -> convT 3x3 s2


def last_decoding_fwd(x, p):
    y = apply_conv(x, p['conv1'])                      # BN+ReLU -> 1x1
    return apply_conv_transpose(y, p['convT2'])        # BN+ReLU -> convT 4x4 s2


def dense_ed_forward(params, x_nchw):
    x = jnp.transpose(x_nchw, (0, 2, 3, 1)).astype(jnp.bfloat16)  # NCHW->NHWC
    x = apply_conv(x, params['in_conv'])
    for blk in params['enc']:
        x = dense_block_fwd(x, blk['block'])
        x = transition_down_fwd(x, blk['trans'])
    for blk in params['dec']:
        x = dense_block_fwd(x, blk['block'])
        if blk['trans'] is not None:
            x = transition_up_fwd(x, blk['trans'])
    x = last_decoding_fwd(x, params['last'])
    x = apply_conv(x, params['adj'], out_dtype=jnp.float32)        # final f32
    return jnp.transpose(x, (0, 3, 1, 2))                          # NHWC->NCHW


# ----------------------------------------------------------------------------
# Main
# ----------------------------------------------------------------------------
if __name__ == "__main__":
    # Small config: DenseED(in_channels=2, out_channels=3, blocks=(1,1,1),
    #                       growth_rate=8, init_features=16, bn_size=8,
    #                       drop_rate=0, bottleneck=False, out_activation=None)
    kg = KeyGen(seed=1)
    params = init_dense_ed(kg, in_channels=2, out_channels=3, blocks=(1, 1, 1),
                           growth_rate=8, init_features=16, bn_size=8,
                           bottleneck=False)

    x = jax.random.normal(jax.random.PRNGKey(0), (2, 2, 16, 16), jnp.float32)

    # Params are closed over (not jit args) so the packed-conv Python-int
    # metadata (KH/KW/stride/...) stays static at trace time.
    fwd = jax.jit(lambda inp: dense_ed_forward(params, inp))
    y = jax.block_until_ready(fwd(x))

    # Shape trace (matches PyTorch conv arithmetic): 16x16 -> 6x6 -> 3x3 -> 6x6 -> 13x13
    assert y.shape == (2, 3, 13, 13), y.shape
    assert bool(jnp.all(jnp.isfinite(y)))
    print("KERNEL_OK")
</pallas_src>

<mosaic_0001>
module attributes {stable_mosaic.version = 11 : i64} {
  func.func @_gemm_kernel(%arg0: i32, %arg1: i32, %arg2: i32, %arg3: memref<80x128xbf16, #tpu.memory_space<vmem>>, %arg4: memref<128x128xbf16, #tpu.memory_space<vmem>>, %arg5: memref<1x128xf32, #tpu.memory_space<vmem>>, %arg6: memref<1x128xf32, #tpu.memory_space<vmem>>, %arg7: memref<80x128xbf16, #tpu.memory_space<vmem>>) attributes {dimension_semantics = [#tpu.dimension_semantics<parallel>, #tpu.dimension_semantics<parallel>, #tpu.dimension_semantics<arbitrary>], iteration_bounds = array<i64: 1, 1, 1>, scalar_prefetch = 0 : i64, scratch_operands = 0 : i64, tpu.core_type = #tpu.core_type<tc>, window_params = [{transform_indices = @transform_0, window_bounds = array<i64: 80, 128>}, {transform_indices = @transform_1, window_bounds = array<i64: 128, 128>}, {transform_indices = @transform_2, window_bounds = array<i64: 1, 128>}, {transform_indices = @transform_3, window_bounds = array<i64: 1, 128>}, {transform_indices = @transform_4, window_bounds = array<i64: 80, 128>}]} {
    %c0 = arith.constant 0 : index
    %c0_0 = arith.constant 0 : index
    %0 = vector.load %arg3[%c0, %c0_0] : memref<80x128xbf16, #tpu.memory_space<vmem>>, vector<80x128xbf16>
    %c0_1 = arith.constant 0 : index
    %c0_2 = arith.constant 0 : index
    %1 = vector.load %arg4[%c0_1, %c0_2] : memref<128x128xbf16, #tpu.memory_space<vmem>>, vector<128x128xbf16>
    %cst = arith.constant dense<0.000000e+00> : vector<80x128xf32>
    %2 = tpu.matmul %0, %1, %cst {dimension_numbers = #tpu.dot_dimension_numbers<[1], [0], [0], [1], [0, 0, 1, 1], [], []>} : vector<80x128xbf16>, vector<128x128xbf16>, vector<80x128xf32> -> vector<80x128xf32>
    %c0_3 = arith.constant 0 : index
    %c0_4 = arith.constant 0 : index
    %3 = vector.load %arg5[%c0_3, %c0_4] : memref<1x128xf32, #tpu.memory_space<vmem>>, vector<1x128xf32>
    %4 = vector.broadcast %3 : vector<1x128xf32> to vector<80x128xf32>
    %5 = arith.mulf %2, %4 : vector<80x128xf32>
    %c0_5 = arith.constant 0 : index
    %c0_6 = arith.constant 0 : index
    %6 = vector.load %arg6[%c0_5, %c0_6] : memref<1x128xf32, #tpu.memory_space<vmem>>, vector<1x128xf32>
    %7 = vector.broadcast %6 : vector<1x128xf32> to vector<80x128xf32>
    %8 = arith.addf %5, %7 : vector<80x128xf32>
    %9 = arith.truncf %8 : vector<80x128xf32> to vector<80x128xbf16>
    %c0_7 = arith.constant 0 : index
    %c0_8 = arith.constant 0 : index
    %10 = vector.load %arg7[%c0_7, %c0_8] : memref<80x128xbf16, #tpu.memory_space<vmem>>, vector<80x128xbf16>
    tpu.vector_store %arg7[%c0_7, %c0_8], %9 {strides = array<i32>} : memref<80x128xbf16, #tpu.memory_space<vmem>>, vector<80x128xbf16>,
    return
  }
  func.func @transform_0(%arg0: i32, %arg1: i32, %arg2: i32) -> (i32, i32) {
    %c0_i32 = arith.constant 0 : i32
    return %arg0, %arg2 : i32, i32
  }
  func.func @transform_1(%arg0: i32, %arg1: i32, %arg2: i32) -> (i32, i32) {
    %c0_i32 = arith.constant 0 : i32
    return %arg2, %arg1 : i32, i32
  }
  func.func @transform_2(%arg0: i32, %arg1: i32, %arg2: i32) -> (i32, i32) {
    %c0_i32 = arith.constant 0 : i32
    %c0_i32_0 = arith.constant 0 : i32
    return %c0_i32, %arg1 : i32, i32
  }
  func.func @transform_3(%arg0: i32, %arg1: i32, %arg2: i32) -> (i32, i32) {
    %c0_i32 = arith.constant 0 : i32
    %c0_i32_0 = arith.constant 0 : i32
    return %c0_i32, %arg1 : i32, i32
  }
  func.func @transform_4(%arg0: i32, %arg1: i32, %arg2: i32) -> (i32, i32) {
    %c0_i32 = arith.constant 0 : i32
    return %arg0, %arg1 : i32, i32
  }
}

module attributes {stable_mosaic.version = 11 : i64} {
  func.func @_gemm_kernel(%arg0: i32, %arg1: i32, %arg2: i32, %arg3: memref<80x256xbf16, #tpu.memory_space<vmem>>, %arg4: memref<256x128xbf16, #tpu.memory_space<vmem>>, %arg5: memref<1x256xbf16, #tpu.memory_space<vmem>>, %arg6: memref<1x256xbf16, #tpu.memory_space<vmem>>, %arg7: memref<1x128xf32, #tpu.memory_space<vmem>>, %arg8: memref<1x128xf32, #tpu.memory_space<vmem>>, %arg9: memref<80x128xbf16, #tpu.memory_space<vmem>>) attributes {dimension_semantics = [#tpu.dimension_semantics<parallel>, #tpu.dimension_semantics<parallel>, #tpu.dimension_semantics<arbitrary>], iteration_bounds = array<i64: 1, 1, 1>, scalar_prefetch = 0 : i64, scratch_operands = 0 : i64, tpu.core_type = #tpu.core_type<tc>, window_params = [{transform_indices = @transform_0, window_bounds = array<i64: 80, 256>}, {transform_indices = @transform_1, window_bounds = array<i64: 256, 128>}, {transform_indices = @transform_2, window_bounds = array<i64: 1, 256>}, {transform_indices = @transform_3, window_bounds = array<i64: 1, 256>}, {transform_indices = @transform_4, window_bounds = array<i64: 1, 128>}, {transform_indices = @transform_5, window_bounds = array<i64: 1, 128>}, {transform_indices = @transform_6, window_bounds = array<i64: 80, 128>}]} {
    %c0 = arith.constant 0 : index
    %c0_0 = arith.constant 0 : index
    %0 = vector.load %arg3[%c0, %c0_0] : memref<80x256xbf16, #tpu.memory_space<vmem>>, vector<80x256xbf16>
    %c0_1 = arith.constant 0 : index
    %c0_2 = arith.constant 0 : index
    %1 = vector.load %arg5[%c0_1, %c0_2] : memref<1x256xbf16, #tpu.memory_space<vmem>>, vector<1x256xbf16>
    %2 = vector.broadcast %1 : vector<1x256xbf16> to vector<80x256xbf16>
    %3 = arith.mulf %0, %2 : vector<80x256xbf16>
    %c0_3 = arith.constant 0 : index
    %c0_4 = arith.constant 0 : index
    %4 = vector.load %arg6[%c0_3, %c0_4] : memref<1x256xbf16, #tpu.memory_space<vmem>>, vector<1x256xbf16>
    %5 = vector.broadcast %4 : vector<1x256xbf16> to vector<80x256xbf16>
    %6 = arith.addf %3, %5 : vector<80x256xbf16>
    %cst = arith.constant 0.000000e+00 : bf16
    %7 = vector.broadcast %cst : bf16 to vector<80x256xbf16>
    %8 = arith.maximumf %6, %7 : vector<80x256xbf16>
    %c0_5 = arith.constant 0 : index
    %c0_6 = arith.constant 0 : index
    %9 = vector.load %arg4[%c0_5, %c0_6] : memref<256x128xbf16, #tpu.memory_space<vmem>>, vector<256x128xbf16>
    %cst_7 = arith.constant dense<0.000000e+00> : vector<80x128xf32>
    %10 = tpu.matmul %8, %9, %cst_7 {dimension_numbers = #tpu.dot_dimension_numbers<[1], [0], [0], [1], [0, 0, 1, 1], [], []>} : vector<80x256xbf16>, vector<256x128xbf16>, vector<80x128xf32> -> vector<80x128xf32>
    %c0_8 = arith.constant 0 : index
    %c0_9 = arith.constant 0 : index
    %11 = vector.load %arg7[%c0_8, %c0_9] : memref<1x128xf32, #tpu.memory_space<vmem>>, vector<1x128xf32>
    %12 = vector.broadcast %11 : vector<1x128xf32> to vector<80x128xf32>
    %13 = arith.mulf %10, %12 : vector<80x128xf32>
    %c0_10 = arith.constant 0 : index
    %c0_11 = arith.constant 0 : index
    %14 = vector.load %arg8[%c0_10, %c0_11] : memref<1x128xf32, #tpu.memory_space<vmem>>, vector<1x128xf32>
    %15 = vector.broadcast %14 : vector<1x128xf32> to vector<80x128xf32>
    %16 = arith.addf %13, %15 : vector<80x128xf32>
    %17 = arith.truncf %16 : vector<80x128xf32> to vector<80x128xbf16>
    %c0_12 = arith.constant 0 : index
    %c0_13 = arith.constant 0 : index
    %18 = vector.load %arg9[%c0_12, %c0_13] : memref<80x128xbf16, #tpu.memory_space<vmem>>, vector<80x128xbf16>
    tpu.vector_store %arg9[%c0_12, %c0_13], %17 {strides = array<i32>} : memref<80x128xbf16, #tpu.memory_space<vmem>>, vector<80x128xbf16>,
    return
  }
  func.func @transform_0(%arg0: i32, %arg1: i32, %arg2: i32) -> (i32, i32) {
    %c0_i32 = arith.constant 0 : i32
    return %arg0, %arg2 : i32, i32
  }
  func.func @transform_1(%arg0: i32, %arg1: i32, %arg2: i32) -> (i32, i32) {
    %c0_i32 = arith.constant 0 : i32
    return %arg2, %arg1 : i32, i32
  }
  func.func @transform_2(%arg0: i32, %arg1: i32, %arg2: i32) -> (i32, i32) {
    %c0_i32 = arith.constant 0 : i32
    %c0_i32_0 = arith.constant 0 : i32
    return %c0_i32, %arg2 : i32, i32
  }
  func.func @transform_3(%arg0: i32, %arg1: i32, %arg2: i32) -> (i32, i32) {
    %c0_i32 = arith.constant 0 : i32
    %c0_i32_0 = arith.constant 0 : i32
    return %c0_i32, %arg2 : i32, i32
  }
  func.func @transform_4(%arg0: i32, %arg1: i32, %arg2: i32) -> (i32, i32) {
    %c0_i32 = arith.constant 0 : i32
    %c0_i32_0 = arith.constant 0 : i32
    return %c0_i32, %arg1 : i32, i32
  }
  func.func @transform_5(%arg0: i32, %arg1: i32, %arg2: i32) -> (i32, i32) {
    %c0_i32 = arith.constant 0 : i32
    %c0_i32_0 = arith.constant 0 : i32
    return %c0_i32, %arg1 : i32, i32
  }
  func.func @transform_6(%arg0: i32, %arg1: i32, %arg2: i32) -> (i32, i32) {
    %c0_i32 = arith.constant 0 : i32
    return %arg0, %arg1 : i32, i32
  }
}

module attributes {stable_mosaic.version = 11 : i64} {
  func.func @_gemm_kernel(%arg0: i32, %arg1: i32, %arg2: i32, %arg3: memref<80x512xbf16, #tpu.memory_space<vmem>>, %arg4: memref<512x128xbf16, #tpu.memory_space<vmem>>, %arg5: memref<1x128xf32, #tpu.memory_space<vmem>>, %arg6: memref<1x128xf32, #tpu.memory_space<vmem>>, %arg7: memref<80x128xbf16, #tpu.memory_space<vmem>>) attributes {dimension_semantics = [#tpu.dimension_semantics<parallel>, #tpu.dimension_semantics<parallel>, #tpu.dimension_semantics<arbitrary>], iteration_bounds = array<i64: 1, 1, 1>, scalar_prefetch = 0 : i64, scratch_operands = 0 : i64, tpu.core_type = #tpu.core_type<tc>, window_params = [{transform_indices = @transform_0, window_bounds = array<i64: 80, 512>}, {transform_indices = @transform_1, window_bounds = array<i64: 512, 128>}, {transform_indices = @transform_2, window_bounds = array<i64: 1, 128>}, {transform_indices = @transform_3, window_bounds = array<i64: 1, 128>}, {transform_indices = @transform_4, window_bounds = array<i64: 80, 128>}]} {
    %c0 = arith.constant 0 : index
    %c0_0 = arith.constant 0 : index
    %0 = vector.load %arg3[%c0, %c0_0] : memref<80x512xbf16, #tpu.memory_space<vmem>>, vector<80x512xbf16>
    %c0_1 = arith.constant 0 : index
    %c0_2 = arith.constant 0 : index
    %1 = vector.load %arg4[%c0_1, %c0_2] : memref<512x128xbf16, #tpu.memory_space<vmem>>, vector<512x128xbf16>
    %cst = arith.constant dense<0.000000e+00> : vector<80x128xf32>
    %2 = tpu.matmul %0, %1, %cst {dimension_numbers = #tpu.dot_dimension_numbers<[1], [0], [0], [1], [0, 0, 1, 1], [], []>} : vector<80x512xbf16>, vector<512x128xbf16>, vector<80x128xf32> -> vector<80x128xf32>
    %c0_3 = arith.constant 0 : index
    %c0_4 = arith.constant 0 : index
    %3 = vector.load %arg5[%c0_3, %c0_4] : memref<1x128xf32, #tpu.memory_space<vmem>>, vector<1x128xf32>
    %4 = vector.broadcast %3 : vector<1x128xf32> to vector<80x128xf32>
    %5 = arith.mulf %2, %4 : vector<80x128xf32>
    %c0_5 = arith.constant 0 : index
    %c0_6 = arith.constant 0 : index
    %6 = vector.load %arg6[%c0_5, %c0_6] : memref<1x128xf32, #tpu.memory_space<vmem>>, vector<1x128xf32>
    %7 = vector.broadcast %6 : vector<1x128xf32> to vector<80x128xf32>
    %8 = arith.addf %5, %7 : vector<80x128xf32>
    %cst_7 = arith.constant 0.000000e+00 : f32
    %9 = vector.broadcast %cst_7 : f32 to vector<80x128xf32>
    %10 = arith.maximumf %8, %9 : vector<80x128xf32>
    %11 = arith.truncf %10 : vector<80x128xf32> to vector<80x128xbf16>
    %c0_8 = arith.constant 0 : index
    %c0_9 = arith.constant 0 : index
    %12 = vector.load %arg7[%c0_8, %c0_9] : memref<80x128xbf16, #tpu.memory_space<vmem>>, vector<80x128xbf16>
    tpu.vector_store %arg7[%c0_8, %c0_9], %11 {strides = array<i32>} : memref<80x128xbf16, #tpu.memory_space<vmem>>, vector<80x128xbf16>,
    return
  }
  func.func @transform_0(%arg0: i32, %arg1: i32, %arg2: i32) -> (i32, i32) {
    %c0_i32 = arith.constant 0 : i32
    return %arg0, %arg2 : i32, i32
  }
  func.func @transform_1(%arg0: i32, %arg1: i32, %arg2: i32) -> (i32, i32) {
    %c0_i32 = arith.constant 0 : i32
    return %arg2, %arg1 : i32, i32
  }
  func.func @transform_2(%arg0: i32, %arg1: i32, %arg2: i32) -> (i32, i32) {
    %c0_i32 = arith.constant 0 : i32
    %c0_i32_0 = arith.constant 0 : i32
    return %c0_i32, %arg1 : i32, i32
  }
  func.func @transform_3(%arg0: i32, %arg1: i32, %arg2: i32) -> (i32, i32) {
    %c0_i32 = arith.constant 0 : i32
    %c0_i32_0 = arith.constant 0 : i32
    return %c0_i32, %arg1 : i32, i32
  }
  func.func @transform_4(%arg0: i32, %arg1: i32, %arg2: i32) -> (i32, i32) {
    %c0_i32 = arith.constant 0 : i32
    return %arg0, %arg1 : i32, i32
  }
}

module attributes {stable_mosaic.version = 11 : i64} {
  func.func @_gemm_kernel(%arg0: i32, %arg1: i32, %arg2: i32, %arg3: memref<80x128xbf16, #tpu.memory_space<vmem>>, %arg4: memref<128x128xbf16, #tpu.memory_space<vmem>>, %arg5: memref<1x128xbf16, #tpu.memory_space<vmem>>, %arg6: memref<1x128xbf16, #tpu.memory_space<vmem>>, %arg7: memref<1x128xf32, #tpu.memory_space<vmem>>, %arg8: memref<1x128xf32, #tpu.memory_space<vmem>>, %arg9: memref<80x128xbf16, #tpu.memory_space<vmem>>) attributes {dimension_semantics = [#tpu.dimension_semantics<parallel>, #tpu.dimension_semantics<parallel>, #tpu.dimension_semantics<arbitrary>], iteration_bounds = array<i64: 1, 1, 1>, scalar_prefetch = 0 : i64, scratch_operands = 0 : i64, tpu.core_type = #tpu.core_type<tc>, window_params = [{transform_indices = @transform_0, window_bounds = array<i64: 80, 128>}, {transform_indices = @transform_1, window_bounds = array<i64: 128, 128>}, {transform_indices = @transform_2, window_bounds = array<i64: 1, 128>}, {transform_indices = @transform_3, window_bounds = array<i64: 1, 128>}, {transform_indices = @transform_4, window_bounds = array<i64: 1, 128>}, {transform_indices = @transform_5, window_bounds = array<i64: 1, 128>}, {transform_indices = @transform_6, window_bounds = array<i64: 80, 128>}]} {
    %c0 = arith.constant 0 : index
    %c0_0 = arith.constant 0 : index
    %0 = vector.load %arg3[%c0, %c0_0] : memref<80x128xbf16, #tpu.memory_space<vmem>>, vector<80x128xbf16>
    %c0_1 = arith.constant 0 : index
    %c0_2 = arith.constant 0 : index
    %1 = vector.load %arg5[%c0_1, %c0_2] : memref<1x128xbf16, #tpu.memory_space<vmem>>, vector<1x128xbf16>
    %2 = vector.broadcast %1 : vector<1x128xbf16> to vector<80x128xbf16>
    %3 = arith.mulf %0, %2 : vector<80x128xbf16>
    %c0_3 = arith.constant 0 : index
    %c0_4 = arith.constant 0 : index
    %4 = vector.load %arg6[%c0_3, %c0_4] : memref<1x128xbf16, #tpu.memory_space<vmem>>, vector<1x128xbf16>
    %5 = vector.broadcast %4 : vector<1x128xbf16> to vector<80x128xbf16>
    %6 = arith.addf %3, %5 : vector<80x128xbf16>
    %cst = arith.constant 0.000000e+00 : bf16
    %7 = vector.broadcast %cst : bf16 to vector<80x128xbf16>
    %8 = arith.maximumf %6, %7 : vector<80x128xbf16>
    %c0_5 = arith.constant 0 : index
    %c0_6 = arith.constant 0 : index
    %9 = vector.load %arg4[%c0_5, %c0_6] : memref<128x128xbf16, #tpu.memory_space<vmem>>, vector<128x128xbf16>
    %cst_7 = arith.constant dense<0.000000e+00> : vector<80x128xf32>
    %10 = tpu.matmul %8, %9, %cst_7 {dimension_numbers = #tpu.dot_dimension_numbers<[1], [0], [0], [1], [0, 0, 1, 1], [], []>} : vector<80x128xbf16>, vector<128x128xbf16>, vector<80x128xf32> -> vector<80x128xf32>
    %c0_8 = arith.constant 0 : index
    %c0_9 = arith.constant 0 : index
    %11 = vector.load %arg7[%c0_8, %c0_9] : memref<1x128xf32, #tpu.memory_space<vmem>>, vector<1x128xf32>
    %12 = vector.broadcast %11 : vector<1x128xf32> to vector<80x128xf32>
    %13 = arith.mulf %10, %12 : vector<80x128xf32>
    %c0_10 = arith.constant 0 : index
    %c0_11 = arith.constant 0 : index
    %14 = vector.load %arg8[%c0_10, %c0_11] : memref<1x128xf32, #tpu.memory_space<vmem>>, vector<1x128xf32>
    %15 = vector.broadcast %14 : vector<1x128xf32> to vector<80x128xf32>
    %16 = arith.addf %13, %15 : vector<80x128xf32>
    %17 = arith.truncf %16 : vector<80x128xf32> to vector<80x128xbf16>
    %c0_12 = arith.constant 0 : index
    %c0_13 = arith.constant 0 : index
    %18 = vector.load %arg9[%c0_12, %c0_13] : memref<80x128xbf16, #tpu.memory_space<vmem>>, vector<80x128xbf16>
    tpu.vector_store %arg9[%c0_12, %c0_13], %17 {strides = array<i32>} : memref<80x128xbf16, #tpu.memory_space<vmem>>, vector<80x128xbf16>,
    return
  }
  func.func @transform_0(%arg0: i32, %arg1: i32, %arg2: i32) -> (i32, i32) {
    %c0_i32 = arith.constant 0 : i32
    return %arg0, %arg2 : i32, i32
  }
  func.func @transform_1(%arg0: i32, %arg1: i32, %arg2: i32) -> (i32, i32) {
    %c0_i32 = arith.constant 0 : i32
    return %arg2, %arg1 : i32, i32
  }
  func.func @transform_2(%arg0: i32, %arg1: i32, %arg2: i32) -> (i32, i32) {
    %c0_i32 = arith.constant 0 : i32
    %c0_i32_0 = arith.constant 0 : i32
    return %c0_i32, %arg2 : i32, i32
  }
  func.func @transform_3(%arg0: i32, %arg1: i32, %arg2: i32) -> (i32, i32) {
    %c0_i32 = arith.constant 0 : i32
    %c0_i32_0 = arith.constant 0 : i32
    return %c0_i32, %arg2 : i32, i32
  }
  func.func @transform_4(%arg0: i32, %arg1: i32, %arg2: i32) -> (i32, i32) {
    %c0_i32 = arith.constant 0 : i32
    %c0_i32_0 = arith.constant 0 : i32
    return %c0_i32, %arg1 : i32, i32
  }
  func.func @transform_5(%arg0: i32, %arg1: i32, %arg2: i32) -> (i32, i32) {
    %c0_i32 = arith.constant 0 : i32
    %c0_i32_0 = arith.constant 0 : i32
    return %c0_i32, %arg1 : i32, i32
  }
  func.func @transform_6(%arg0: i32, %arg1: i32, %arg2: i32) -> (i32, i32) {
    %c0_i32 = arith.constant 0 : i32
    return %arg0, %arg1 : i32, i32
  }
}

module attributes {stable_mosaic.version = 11 : i64} {
  func.func @_gemm_kernel(%arg0: i32, %arg1: i32, %arg2: i32, %arg3: memref<32x128xbf16, #tpu.memory_space<vmem>>, %arg4: memref<128x128xbf16, #tpu.memory_space<vmem>>, %arg5: memref<1x128xbf16, #tpu.memory_space<vmem>>, %arg6: memref<1x128xbf16, #tpu.memory_space<vmem>>, %arg7: memref<1x128xf32, #tpu.memory_space<vmem>>, %arg8: memref<1x128xf32, #tpu.memory_space<vmem>>, %arg9: memref<32x128xbf16, #tpu.memory_space<vmem>>) attributes {dimension_semantics = [#tpu.dimension_semantics<parallel>, #tpu.dimension_semantics<parallel>, #tpu.dimension_semantics<arbitrary>], iteration_bounds = array<i64: 1, 1, 1>, scalar_prefetch = 0 : i64, scratch_operands = 0 : i64, tpu.core_type = #tpu.core_type<tc>, window_params = [{transform_indices = @transform_0, window_bounds = array<i64: 32, 128>}, {transform_indices = @transform_1, window_bounds = array<i64: 128, 128>}, {transform_indices = @transform_2, window_bounds = array<i64: 1, 128>}, {transform_indices = @transform_3, window_bounds = array<i64: 1, 128>}, {transform_indices = @transform_4, window_bounds = array<i64: 1, 128>}, {transform_indices = @transform_5, window_bounds = array<i64: 1, 128>}, {transform_indices = @transform_6, window_bounds = array<i64: 32, 128>}]} {
    %c0 = arith.constant 0 : index
    %c0_0 = arith.constant 0 : index
    %0 = vector.load %arg3[%c0, %c0_0] : memref<32x128xbf16, #tpu.memory_space<vmem>>, vector<32x128xbf16>
    %c0_1 = arith.constant 0 : index
    %c0_2 = arith.constant 0 : index
    %1 = vector.load %arg5[%c0_1, %c0_2] : memref<1x128xbf16, #tpu.memory_space<vmem>>, vector<1x128xbf16>
    %2 = vector.broadcast %1 : vector<1x128xbf16> to vector<32x128xbf16>
    %3 = arith.mulf %0, %2 : vector<32x128xbf16>
    %c0_3 = arith.constant 0 : index
    %c0_4 = arith.constant 0 : index
    %4 = vector.load %arg6[%c0_3, %c0_4] : memref<1x128xbf16, #tpu.memory_space<vmem>>, vector<1x128xbf16>
    %5 = vector.broadcast %4 : vector<1x128xbf16> to vector<32x128xbf16>
    %6 = arith.addf %3, %5 : vector<32x128xbf16>
    %cst = arith.constant 0.000000e+00 : bf16
    %7 = vector.broadcast %cst : bf16 to vector<32x128xbf16>
    %8 = arith.maximumf %6, %7 : vector<32x128xbf16>
    %c0_5 = arith.constant 0 : index
    %c0_6 = arith.constant 0 : index
    %9 = vector.load %arg4[%c0_5, %c0_6] : memref<128x128xbf16, #tpu.memory_space<vmem>>, vector<128x128xbf16>
    %cst_7 = arith.constant dense<0.000000e+00> : vector<32x128xf32>
    %10 = tpu.matmul %8, %9, %cst_7 {dimension_numbers = #tpu.dot_dimension_numbers<[1], [0], [0], [1], [0, 0, 1, 1], [], []>} : vector<32x128xbf16>, vector<128x128xbf16>, vector<32x128xf32> -> vector<32x128xf32>
    %c0_8 = arith.constant 0 : index
    %c0_9 = arith.constant 0 : index
    %11 = vector.load %arg7[%c0_8, %c0_9] : memref<1x128xf32, #tpu.memory_space<vmem>>, vector<1x128xf32>
    %12 = vector.broadcast %11 : vector<1x128xf32> to vector<32x128xf32>
    %13 = arith.mulf %10, %12 : vector<32x128xf32>
    %c0_10 = arith.constant 0 : index
    %c0_11 = arith.constant 0 : index
    %14 = vector.load %arg8[%c0_10, %c0_11] : memref<1x128xf32, #tpu.memory_space<vmem>>, vector<1x128xf32>
    %15 = vector.broadcast %14 : vector<1x128xf32> to vector<32x128xf32>
    %16 = arith.addf %13, %15 : vector<32x128xf32>
    %17 = arith.truncf %16 : vector<32x128xf32> to vector<32x128xbf16>
    %c0_12 = arith.constant 0 : index
    %c0_13 = arith.constant 0 : index
    %18 = vector.load %arg9[%c0_12, %c0_13] : memref<32x128xbf16, #tpu.memory_space<vmem>>, vector<32x128xbf16>
    tpu.vector_store %arg9[%c0_12, %c0_13], %17 {strides = array<i32>} : memref<32x128xbf16, #tpu.memory_space<vmem>>, vector<32x128xbf16>,
    return
  }
  func.func @transform_0(%arg0: i32, %arg1: i32, %arg2: i32) -> (i32, i32) {
    %c0_i32 = arith.constant 0 : i32
    return %arg0, %arg2 : i32, i32
  }
  func.func @transform_1(%arg0: i32, %arg1: i32, %arg2: i32) -> (i32, i32) {
    %c0_i32 = arith.constant 0 : i32
    return %arg2, %arg1 : i32, i32
  }
  func.func @transform_2(%arg0: i32, %arg1: i32, %arg2: i32) -> (i32, i32) {
    %c0_i32 = arith.constant 0 : i32
    %c0_i32_0 = arith.constant 0 : i32
    return %c0_i32, %arg2 : i32, i32
  }
  func.func @transform_3(%arg0: i32, %arg1: i32, %arg2: i32) -> (i32, i32) {
    %c0_i32 = arith.constant 0 : i32
    %c0_i32_0 = arith.constant 0 : i32
    return %c0_i32, %arg2 : i32, i32
  }
  func.func @transform_4(%arg0: i32, %arg1: i32, %arg2: i32) -> (i32, i32) {
    %c0_i32 = arith.constant 0 : i32
    %c0_i32_0 = arith.constant 0 : i32
    return %c0_i32, %arg1 : i32, i32
  }
  func.func @transform_5(%arg0: i32, %arg1: i32, %arg2: i32) -> (i32, i32) {
    %c0_i32 = arith.constant 0 : i32
    %c0_i32_0 = arith.constant 0 : i32
    return %c0_i32, %arg1 : i32, i32
  }
  func.func @transform_6(%arg0: i32, %arg1: i32, %arg2: i32) -> (i32, i32) {
    %c0_i32 = arith.constant 0 : i32
    return %arg0, %arg1 : i32, i32
  }
}

module attributes {stable_mosaic.version = 11 : i64} {
  func.func @_gemm_kernel(%arg0: i32, %arg1: i32, %arg2: i32, %arg3: memref<32x512xbf16, #tpu.memory_space<vmem>>, %arg4: memref<512x128xbf16, #tpu.memory_space<vmem>>, %arg5: memref<1x128xf32, #tpu.memory_space<vmem>>, %arg6: memref<1x128xf32, #tpu.memory_space<vmem>>, %arg7: memref<32x128xbf16, #tpu.memory_space<vmem>>) attributes {dimension_semantics = [#tpu.dimension_semantics<parallel>, #tpu.dimension_semantics<parallel>, #tpu.dimension_semantics<arbitrary>], iteration_bounds = array<i64: 1, 1, 1>, scalar_prefetch = 0 : i64, scratch_operands = 0 : i64, tpu.core_type = #tpu.core_type<tc>, window_params = [{transform_indices = @transform_0, window_bounds = array<i64: 32, 512>}, {transform_indices = @transform_1, window_bounds = array<i64: 512, 128>}, {transform_indices = @transform_2, window_bounds = array<i64: 1, 128>}, {transform_indices = @transform_3, window_bounds = array<i64: 1, 128>}, {transform_indices = @transform_4, window_bounds = array<i64: 32, 128>}]} {
    %c0 = arith.constant 0 : index
    %c0_0 = arith.constant 0 : index
    %0 = vector.load %arg3[%c0, %c0_0] : memref<32x512xbf16, #tpu.memory_space<vmem>>, vector<32x512xbf16>
    %c0_1 = arith.constant 0 : index
    %c0_2 = arith.constant 0 : index
    %1 = vector.load %arg4[%c0_1, %c0_2] : memref<512x128xbf16, #tpu.memory_space<vmem>>, vector<512x128xbf16>
    %cst = arith.constant dense<0.000000e+00> : vector<32x128xf32>
    %2 = tpu.matmul %0, %1, %cst {dimension_numbers = #tpu.dot_dimension_numbers<[1], [0], [0], [1], [0, 0, 1, 1], [], []>} : vector<32x512xbf16>, vector<512x128xbf16>, vector<32x128xf32> -> vector<32x128xf32>
    %c0_3 = arith.constant 0 : index
    %c0_4 = arith.constant 0 : index
    %3 = vector.load %arg5[%c0_3, %c0_4] : memref<1x128xf32, #tpu.memory_space<vmem>>, vector<1x128xf32>
    %4 = vector.broadcast %3 : vector<1x128xf32> to vector<32x128xf32>
    %5 = arith.mulf %2, %4 : vector<32x128xf32>
    %c0_5 = arith.constant 0 : index
    %c0_6 = arith.constant 0 : index
    %6 = vector.load %arg6[%c0_5, %c0_6] : memref<1x128xf32, #tpu.memory_space<vmem>>, vector<1x128xf32>
    %7 = vector.broadcast %6 : vector<1x128xf32> to vector<32x128xf32>
    %8 = arith.addf %5, %7 : vector<32x128xf32>
    %cst_7 = arith.constant 0.000000e+00 : f32
    %9 = vector.broadcast %cst_7 : f32 to vector<32x128xf32>
    %10 = arith.maximumf %8, %9 : vector<32x128xf32>
    %11 = arith.truncf %10 : vector<32x128xf32> to vector<32x128xbf16>
    %c0_8 = arith.constant 0 : index
    %c0_9 = arith.constant 0 : index
    %12 = vector.load %arg7[%c0_8, %c0_9] : memref<32x128xbf16, #tpu.memory_space<vmem>>, vector<32x128xbf16>
    tpu.vector_store %arg7[%c0_8, %c0_9], %11 {strides = array<i32>} : memref<32x128xbf16, #tpu.memory_space<vmem>>, vector<32x128xbf16>,
    return
  }
  func.func @transform_0(%arg0: i32, %arg1: i32, %arg2: i32) -> (i32, i32) {
    %c0_i32 = arith.constant 0 : i32
    return %arg0, %arg2 : i32, i32
  }
  func.func @transform_1(%arg0: i32, %arg1: i32, %arg2: i32) -> (i32, i32) {
    %c0_i32 = arith.constant 0 : i32
    return %arg2, %arg1 : i32, i32
  }
  func.func @transform_2(%arg0: i32, %arg1: i32, %arg2: i32) -> (i32, i32) {
    %c0_i32 = arith.constant 0 : i32
    %c0_i32_0 = arith.constant 0 : i32
    return %c0_i32, %arg1 : i32, i32
  }
  func.func @transform_3(%arg0: i32, %arg1: i32, %arg2: i32) -> (i32, i32) {
    %c0_i32 = arith.constant 0 : i32
    %c0_i32_0 = arith.constant 0 : i32
    return %c0_i32, %arg1 : i32, i32
  }
  func.func @transform_4(%arg0: i32, %arg1: i32, %arg2: i32) -> (i32, i32) {
    %c0_i32 = arith.constant 0 : i32
    return %arg0, %arg1 : i32, i32
  }
}

module attributes {stable_mosaic.version = 11 : i64} {
  func.func @_gemm_kernel(%arg0: i32, %arg1: i32, %arg2: i32, %arg3: memref<128x256xbf16, #tpu.memory_space<vmem>>, %arg4: memref<256x128xbf16, #tpu.memory_space<vmem>>, %arg5: memref<1x256xbf16, #tpu.memory_space<vmem>>, %arg6: memref<1x256xbf16, #tpu.memory_space<vmem>>, %arg7: memref<1x128xf32, #tpu.memory_space<vmem>>, %arg8: memref<1x128xf32, #tpu.memory_space<vmem>>, %arg9: memref<128x128xbf16, #tpu.memory_space<vmem>>) attributes {dimension_semantics = [#tpu.dimension_semantics<parallel>, #tpu.dimension_semantics<parallel>, #tpu.dimension_semantics<arbitrary>], iteration_bounds = array<i64: 3, 1, 1>, scalar_prefetch = 0 : i64, scratch_operands = 0 : i64, tpu.core_type = #tpu.core_type<tc>, window_params = [{transform_indices = @transform_0, window_bounds = array<i64: 128, 256>}, {transform_indices = @transform_1, window_bounds = array<i64: 256, 128>}, {transform_indices = @transform_2, window_bounds = array<i64: 1, 256>}, {transform_indices = @transform_3, window_bounds = array<i64: 1, 256>}, {transform_indices = @transform_4, window_bounds = array<i64: 1, 128>}, {transform_indices = @transform_5, window_bounds = array<i64: 1, 128>}, {transform_indices = @transform_6, window_bounds = array<i64: 128, 128>}]} {
    %c0 = arith.constant 0 : index
    %c0_0 = arith.constant 0 : index
    %0 = vector.load %arg3[%c0, %c0_0] : memref<128x256xbf16, #tpu.memory_space<vmem>>, vector<128x256xbf16>
    %c0_1 = arith.constant 0 : index
    %c0_2 = arith.constant 0 : index
    %1 = vector.load %arg5[%c0_1, %c0_2] : memref<1x256xbf16, #tpu.memory_space<vmem>>, vector<1x256xbf16>
    %2 = vector.broadcast %1 : vector<1x256xbf16> to vector<128x256xbf16>
    %3 = arith.mulf %0, %2 : vector<128x256xbf16>
    %c0_3 = arith.constant 0 : index
    %c0_4 = arith.constant 0 : index
    %4 = vector.load %arg6[%c0_3, %c0_4] : memref<1x256xbf16, #tpu.memory_space<vmem>>, vector<1x256xbf16>
    %5 = vector.broadcast %4 : vector<1x256xbf16> to vector<128x256xbf16>
    %6 = arith.addf %3, %5 : vector<128x256xbf16>
    %cst = arith.constant 0.000000e+00 : bf16
    %7 = vector.broadcast %cst : bf16 to vector<128x256xbf16>
    %8 = arith.maximumf %6, %7 : vector<128x256xbf16>
    %c0_5 = arith.constant 0 : index
    %c0_6 = arith.constant 0 : index
    %9 = vector.load %arg4[%c0_5, %c0_6] : memref<256x128xbf16, #tpu.memory_space<vmem>>, vector<256x128xbf16>
    %cst_7 = arith.constant dense<0.000000e+00> : vector<128x128xf32>
    %10 = tpu.matmul %8, %9, %cst_7 {dimension_numbers = #tpu.dot_dimension_numbers<[1], [0], [0], [1], [0, 0, 1, 1], [], []>} : vector<128x256xbf16>, vector<256x128xbf16>, vector<128x128xf32> -> vector<128x128xf32>
    %c0_8 = arith.constant 0 : index
    %c0_9 = arith.constant 0 : index
    %11 = vector.load %arg7[%c0_8, %c0_9] : memref<1x128xf32, #tpu.memory_space<vmem>>, vector<1x128xf32>
    %12 = vector.broadcast %11 : vector<1x128xf32> to vector<128x128xf32>
    %13 = arith.mulf %10, %12 : vector<128x128xf32>
    %c0_10 = arith.constant 0 : index
    %c0_11 = arith.constant 0 : index
    %14 = vector.load %arg8[%c0_10, %c0_11] : memref<1x128xf32, #tpu.memory_space<vmem>>, vector<1x128xf32>
    %15 = vector.broadcast %14 : vector<1x128xf32> to vector<128x128xf32>
    %16 = arith.addf %13, %15 : vector<128x128xf32>
    %17 = arith.truncf %16 : vector<128x128xf32> to vector<128x128xbf16>
    %c0_12 = arith.constant 0 : index
    %c0_13 = arith.constant 0 : index
    %18 = vector.load %arg9[%c0_12, %c0_13] : memref<128x128xbf16, #tpu.memory_space<vmem>>, vector<128x128xbf16>
    tpu.vector_store %arg9[%c0_12, %c0_13], %17 {strides = array<i32>} : memref<128x128xbf16, #tpu.memory_space<vmem>>, vector<128x128xbf16>,
    return
  }
  func.func @transform_0(%arg0: i32, %arg1: i32, %arg2: i32) -> (i32, i32) {
    %c0_i32 = arith.constant 0 : i32
    return %arg0, %arg2 : i32, i32
  }
  func.func @transform_1(%arg0: i32, %arg1: i32, %arg2: i32) -> (i32, i32) {
    %c0_i32 = arith.constant 0 : i32
    return %arg2, %arg1 : i32, i32
  }
  func.func @transform_2(%arg0: i32, %arg1: i32, %arg2: i32) -> (i32, i32) {
    %c0_i32 = arith.constant 0 : i32
    %c0_i32_0 = arith.constant 0 : i32
    return %c0_i32, %arg2 : i32, i32
  }
  func.func @transform_3(%arg0: i32, %arg1: i32, %arg2: i32) -> (i32, i32) {
    %c0_i32 = arith.constant 0 : i32
    %c0_i32_0 = arith.constant 0 : i32
    return %c0_i32, %arg2 : i32, i32
  }
  func.func @transform_4(%arg0: i32, %arg1: i32, %arg2: i32) -> (i32, i32) {
    %c0_i32 = arith.constant 0 : i32
    %c0_i32_0 = arith.constant 0 : i32
    return %c0_i32, %arg1 : i32, i32
  }
  func.func @transform_5(%arg0: i32, %arg1: i32, %arg2: i32) -> (i32, i32) {
    %c0_i32 = arith.constant 0 : i32
    %c0_i32_0 = arith.constant 0 : i32
    return %c0_i32, %arg1 : i32, i32
  }
  func.func @transform_6(%arg0: i32, %arg1: i32, %arg2: i32) -> (i32, i32) {
    %c0_i32 = arith.constant 0 : i32
    return %arg0, %arg1 : i32, i32
  }
}

module attributes {stable_mosaic.version = 11 : i64} {
  func.func @_gemm_kernel(%arg0: i32, %arg1: i32, %arg2: i32, %arg3: memref<128x128xbf16, #tpu.memory_space<vmem>>, %arg4: memref<128x128xbf16, #tpu.memory_space<vmem>>, %arg5: memref<1x128xf32, #tpu.memory_space<vmem>>, %arg6: memref<1x128xf32, #tpu.memory_space<vmem>>, %arg7: memref<128x128xf32, #tpu.memory_space<vmem>>) attributes {dimension_semantics = [#tpu.dimension_semantics<parallel>, #tpu.dimension_semantics<parallel>, #tpu.dimension_semantics<arbitrary>], iteration_bounds = array<i64: 3, 1, 1>, scalar_prefetch = 0 : i64, scratch_operands = 0 : i64, tpu.core_type = #tpu.core_type<tc>, window_params = [{transform_indices = @transform_0, window_bounds = array<i64: 128, 128>}, {transform_indices = @transform_1, window_bounds = array<i64: 128, 128>}, {transform_indices = @transform_2, window_bounds = array<i64: 1, 128>}, {transform_indices = @transform_3, window_bounds = array<i64: 1, 128>}, {transform_indices = @transform_4, window_bounds = array<i64: 128, 128>}]} {
    %c0 = arith.constant 0 : index
    %c0_0 = arith.constant 0 : index
    %0 = vector.load %arg3[%c0, %c0_0] : memref<128x128xbf16, #tpu.memory_space<vmem>>, vector<128x128xbf16>
    %c0_1 = arith.constant 0 : index
    %c0_2 = arith.constant 0 : index
    %1 = vector.load %arg4[%c0_1, %c0_2] : memref<128x128xbf16, #tpu.memory_space<vmem>>, vector<128x128xbf16>
    %cst = arith.constant dense<0.000000e+00> : vector<128x128xf32>
    %2 = tpu.matmul %0, %1, %cst {dimension_numbers = #tpu.dot_dimension_numbers<[1], [0], [0], [1], [0, 0, 1, 1], [], []>} : vector<128x128xbf16>, vector<128x128xbf16>, vector<128x128xf32> -> vector<128x128xf32>
    %c0_3 = arith.constant 0 : index
    %c0_4 = arith.constant 0 : index
    %3 = vector.load %arg5[%c0_3, %c0_4] : memref<1x128xf32, #tpu.memory_space<vmem>>, vector<1x128xf32>
    %4 = vector.broadcast %3 : vector<1x128xf32> to vector<128x128xf32>
    %5 = arith.mulf %2, %4 : vector<128x128xf32>
    %c0_5 = arith.constant 0 : index
    %c0_6 = arith.constant 0 : index
    %6 = vector.load %arg6[%c0_5, %c0_6] : memref<1x128xf32, #tpu.memory_space<vmem>>, vector<1x128xf32>
    %7 = vector.broadcast %6 : vector<1x128xf32> to vector<128x128xf32>
    %8 = arith.addf %5, %7 : vector<128x128xf32>
    %c0_7 = arith.constant 0 : index
    %c0_8 = arith.constant 0 : index
    %9 = vector.load %arg7[%c0_7, %c0_8] : memref<128x128xf32, #tpu.memory_space<vmem>>, vector<128x128xf32>
    tpu.vector_store %arg7[%c0_7, %c0_8], %8 {strides = array<i32>} : memref<128x128xf32, #tpu.memory_space<vmem>>, vector<128x128xf32>,
    return
  }
  func.func @transform_0(%arg0: i32, %arg1: i32, %arg2: i32) -> (i32, i32) {
    %c0_i32 = arith.constant 0 : i32
    return %arg0, %arg2 : i32, i32
  }
  func.func @transform_1(%arg0: i32, %arg1: i32, %arg2: i32) -> (i32, i32) {
    %c0_i32 = arith.constant 0 : i32
    return %arg2, %arg1 : i32, i32
  }
  func.func @transform_2(%arg0: i32, %arg1: i32, %arg2: i32) -> (i32, i32) {
    %c0_i32 = arith.constant 0 : i32
    %c0_i32_0 = arith.constant 0 : i32
    return %c0_i32, %arg1 : i32, i32
  }
  func.func @transform_3(%arg0: i32, %arg1: i32, %arg2: i32) -> (i32, i32) {
    %c0_i32 = arith.constant 0 : i32
    %c0_i32_0 = arith.constant 0 : i32
    return %c0_i32, %arg1 : i32, i32
  }
  func.func @transform_4(%arg0: i32, %arg1: i32, %arg2: i32) -> (i32, i32) {
    %c0_i32 = arith.constant 0 : i32
    return %arg0, %arg1 : i32, i32
  }
}

</mosaic_0001>

<bundles_post_ra>
// kernel: _lambda_.14
= control target key start
LH: loop header
LB: loop body
LE: loop exit
PB: predicated region body
PF: predicated region fallthrough
CT: control target
= control target key end

     0   :  { %s412_s1 = inlined_call_operand.vmem [shape: bf16[128,128], index: 1, kind: input, shape index: {}]   ;;  %s413_s2 = inlined_call_operand.vmem [shape: f32[1,128], index: 2, kind: input, shape index: {}]   ;;  %s414_s3 = inlined_call_operand.vmem [shape: f32[1,128], index: 3, kind: input, shape index: {}]   ;;  %s415_s0 = inlined_call_operand.vmem [shape: bf16[80,128], index: 0, kind: input, shape index: {}]   ;;  %s416_s4 = inlined_call_operand.vmem [shape: bf16[80,128], index: 4, kind: output, shape index: {}]  }
   0x1   :  { %v271_v0 = vld [vmem:[%s412_s1 + $0x38] sm:$0xff]  ;;  %v270_v1 = vld [vmem:[%s412_s1 + $0x30] sm:$0xff]  ;;  %v269_v2 = vld [vmem:[%s412_s1 + $0x28] sm:$0xff] }
   0x2   :  { %303 = vmatpush.bf16.msra.mxu3 %v271_v0  ;;  %302 = vmatpush.bf16.msra.mxu2 %v271_v0  ;;  %v268_v3 = vld [vmem:[%s412_s1 + $0x20] sm:$0xff]  ;;  %v267_v4 = vld [vmem:[%s412_s1 + $0x18] sm:$0xff]  ;;  %v266_v5 = vld [vmem:[%s412_s1 + $0x10] sm:$0xff] }
   0x3   :  { %121 = vmatpush.bf16.msra.mxu0 %v271_v0  ;;  %301 = vmatpush.bf16.msra.mxu1 %v271_v0  ;;  %v265_v6 = vld [vmem:[%s412_s1 + $0x8] sm:$0xff]  ;;  %v264_v7 = vld [vmem:[%s412_s1] sm:$0xff]  ;;  %v262_v8 = vld [vmem:[%s415_s0 + $0x18] sm:$0xff] }
   0x4   :  { %v261_v9 = vld [vmem:[%s415_s0 + $0x10] sm:$0xff]  ;;  %v259_v10 = vld [vmem:[%s415_s0] sm:$0xff]  ;;  %v260_v11 = vld [vmem:[%s415_s0 + $0x8] sm:$0xff] }
   0x5   :  { %v263_v12 = vld [vmem:[%s415_s0 + $0x20] sm:$0xff] }
   0x6   :  { %306 = vmatpush.bf16.msra.mxu3 %v270_v1  ;;  %305 = vmatpush.bf16.msra.mxu2 %v270_v1  ;;  %v325_v15 = vld [vmem:[%s413_s2] ss:$0 sm:$0xff] }
   0x7   :  { %122 = vmatpush.bf16.msra.mxu0 %v270_v1  ;;  %304 = vmatpush.bf16.msra.mxu1 %v270_v1  ;;  %v326_v20 = vld [vmem:[%s414_s3] ss:$0 sm:$0xff] }
   0xa   :  { %309 = vmatpush.bf16.msra.mxu3 %v269_v2  ;;  %308 = vmatpush.bf16.msra.mxu2 %v269_v2 }
   0xb   :  { %123 = vmatpush.bf16.msra.mxu0 %v269_v2  ;;  %307 = vmatpush.bf16.msra.mxu1 %v269_v2 }
   0xe   :  { %312 = vmatpush.bf16.msra.mxu3 %v268_v3  ;;  %311 = vmatpush.bf16.msra.mxu2 %v268_v3 }
   0xf   :  { %124 = vmatpush.bf16.msra.mxu0 %v268_v3  ;;  %310 = vmatpush.bf16.msra.mxu1 %v268_v3 }
  0x12   :  { %315 = vmatpush.bf16.msra.mxu3 %v267_v4  ;;  %314 = vmatpush.bf16.msra.mxu2 %v267_v4 }
  0x13   :  { %125 = vmatpush.bf16.msra.mxu0 %v267_v4  ;;  %313 = vmatpush.bf16.msra.mxu1 %v267_v4 }
  0x16   :  { %318 = vmatpush.bf16.msra.mxu3 %v266_v5  ;;  %317 = vmatpush.bf16.msra.mxu2 %v266_v5 }
  0x17   :  { %126 = vmatpush.bf16.msra.mxu0 %v266_v5  ;;  %316 = vmatpush.bf16.msra.mxu1 %v266_v5 }
  0x1a   :  { %321 = vmatpush.bf16.msra.mxu3 %v265_v6  ;;  %320 = vmatpush.bf16.msra.mxu2 %v265_v6 }
  0x1b   :  { %127 = vmatpush.bf16.msra.mxu0 %v265_v6  ;;  %319 = vmatpush.bf16.msra.mxu1 %v265_v6 }
  0x1e   :  { %324 = vmatpush.bf16.msra.mxu3 %v264_v7  ;;  %323 = vmatpush.bf16.msra.mxu2 %v264_v7 }
  0x1f   :  { %128 = vmatpush.bf16.msra.mxu0 %v264_v7  ;;  %322 = vmatpush.bf16.msra.mxu1 %v264_v7 }
  0x21   :  { %144 = vmatmul.bf16.vlgmr.msra.gmra.mxu3 %v262_v8  ;;  %139 = vmatmul.bf16.vlgmr.msra.gmra.mxu2 %v261_v9 }
  0x22   :  { %129 = vmatmul.bf16.vlgmr.msra.gmra.mxu0 %v259_v10  ;;  %134 = vmatmul.bf16.vlgmr.msra.gmra.mxu1 %v260_v11 }
  0x31   :  { %149 = vmatmul.bf16.gmra.mxu3 %v263_v12 }
  0x9f   :  { %v130_v13 = vpop.f32.mrf.mxu0  ;;  %v135_v14 = vpop.f32.mrf.mxu1 }
  0xa0   :  { %v159_v17 = vmul.f32 %v325_v15, %v130_v13  ;;  %v161_v18 = vmul.f32 %v325_v15, %v135_v14 }
  0xa2   :  { %v173_v23 = vadd.f32 %v326_v20, %v159_v17  ;;  %v175_v24 = vadd.f32 %v326_v20, %v161_v18 }
  0xa4   :  { %v145_v16 = vpop.f32.mrf.mxu3  ;;  %v140_v19 = vpop.f32.mrf.mxu2 }
  0xa5   :  { %v163_v27 = vmul.f32 %v325_v15, %v140_v19  ;;  %v165_v30 = vmul.f32 %v325_v15, %v145_v16 }
  0xa7   :  { %v132_v21 = vpop.f32.mrf.mxu0  ;;  %v137_v22 = vpop.f32.mrf.mxu1  ;;  %v177_v35 = vadd.f32 %v326_v20, %v163_v27  ;;  %v179_v38 = vadd.f32 %v326_v20, %v165_v30 }
  0xa8   :  { %v160_v25 = vmul.f32 %v325_v15, %v132_v21  ;;  %v162_v26 = vmul.f32 %v325_v15, %v137_v22 }
  0xaa   :  { %v174_v28 = vadd.f32 %v326_v20, %v160_v25  ;;  %v176_v29 = vadd.f32 %v326_v20, %v162_v26 }
  0xac   :  { %v147_v31 = vpop.f32.mrf.mxu3  ;;  %v275_v32 = vpack.c.bf16 %v174_v28, %v173_v23  ;;  %v280_v33 = vpack.c.bf16 %v176_v29, %v175_v24  ;;  %v142_v34 = vpop.f32.mrf.mxu2 }
  0xad   :  { %v166_v36 = vmul.f32 %v325_v15, %v147_v31  ;;  %v164_v37 = vmul.f32 %v325_v15, %v142_v34 }
  0xae   :  { %276 = vst [vmem:[%s416_s4] sm:$0xff] %v275_v32  }
  0xaf   :  { %v180_v39 = vadd.f32 %v326_v20, %v166_v36  ;;  %297 = vst [vmem:[%s416_s4 + $0x8] sm:$0xff] %v280_v33   ;;  %v178_v40 = vadd.f32 %v326_v20, %v164_v37 }
  0xb1   :  { %v290_v41 = vpack.c.bf16 %v180_v39, %v179_v38  ;;  %v285_v42 = vpack.c.bf16 %v178_v40, %v177_v35 }
  0xb3   :  { %299 = vst [vmem:[%s416_s4 + $0x18] sm:$0xff] %v290_v41  }
  0xb4   :  { %298 = vst [vmem:[%s416_s4 + $0x10] sm:$0xff] %v285_v42   ;;  %v150_v43 = vpop.f32.mrf.mxu3 }
  0xb5   :  { %v167_v44 = vmul.f32 %v325_v15, %v150_v43 }
  0xb7   :  { %v181_v47 = vadd.f32 %v326_v20, %v167_v44 }
  0xbc   :  { %v152_v45 = vpop.f32.mrf.mxu3 }
  0xbd   :  { %v168_v46 = vmul.f32 %v325_v15, %v152_v45 }
  0xbf   :  { %v182_v48 = vadd.f32 %v326_v20, %v168_v46 }
  0xc1   :  { %v295_v49 = vpack.c.bf16 %v182_v48, %v181_v47 }
  0xc3   :  { %300 = vst [vmem:[%s416_s4 + $0x20] sm:$0xff] %v295_v49  }

// kernel: _lambda_.15
= control target key start
LH: loop header
LB: loop body
LE: loop exit
PB: predicated region body
PF: predicated region fallthrough
CT: control target
= control target key end

     0   :  { %s804_s1 = inlined_call_operand.vmem [shape: bf16[256,128], index: 1, kind: input, shape index: {}]   ;;  %s805_s2 = inlined_call_operand.vmem [shape: bf16[1,256], index: 2, kind: input, shape index: {}]   ;;  %s806_s3 = inlined_call_operand.vmem [shape: bf16[1,256], index: 3, kind: input, shape index: {}]   ;;  %s807_s0 = inlined_call_operand.vmem [shape: bf16[80,256], index: 0, kind: input, shape index: {}]   ;;  %s808_s4 = inlined_call_operand.vmem [shape: f32[1,128], index: 4, kind: input, shape index: {}]   ;;  %s809_s5 = inlined_call_operand.vmem [shape: f32[1,128], index: 5, kind: input, shape index: {}]   ;;  %s810_s6 = inlined_call_operand.vmem [shape: bf16[80,128], index: 6, kind: output, shape index: {}]  }
   0x1   :  { %v528_v0 = vld [vmem:[%s804_s1 + $0x38] sm:$0xff]  ;;  %v527_v2 = vld [vmem:[%s804_s1 + $0x30] sm:$0xff]  ;;  %v526_v4 = vld [vmem:[%s804_s1 + $0x28] sm:$0xff] }
   0x2   :  { %v536_v1 = vld [vmem:[%s804_s1 + $0x78] sm:$0xff]  ;;  %337 = vmatpush.bf16.msra.mxu0 %v528_v0  ;;  %566 = vmatpush.bf16.msra.mxu2 %v528_v0  ;;  %v535_v3 = vld [vmem:[%s804_s1 + $0x70] sm:$0xff]  ;;  %v33_v5 = vld [vmem:[%s805_s2] sm:$0x3] }
   0x3   :  { %371 = vmatpush.bf16.msra.mxu1 %v536_v1  ;;  %574 = vmatpush.bf16.msra.mxu3 %v536_v1  ;;  %v534_v6 = vld [vmem:[%s804_s1 + $0x68] sm:$0xff]  ;;  %35 = vst [vmem:[#allocation1] ss:$9 sm:$0xff] %v33_v5  ;;  %v525_v7 = vld [vmem:[%s804_s1 + $0x20] sm:$0xff]  ;;  %v524_v10 = vld [vmem:[%s804_s1 + $0x18] sm:$0xff] }
   0x4   :  { %v533_v8 = vld [vmem:[%s804_s1 + $0x60] sm:$0xff]  ;;  %v24_v12 = vld [vmem:[%s807_s0 + $0x8] sm:$0xff]  ;;  %v532_v16 = vld [vmem:[%s804_s1 + $0x58] sm:$0xff] }
   0x5   :  { %v96_v9 = vld [vmem:[%s806_s3] sm:$0x3]  ;;  %v28_v19 = vld [vmem:[%s807_s0 + $0x28] sm:$0xff]  ;;  %v670_v20 = vld [vmem:[%s807_s0 + $0x30] sm:$0xff]  ;;  %v46_v23 = vunpack.c.l.bf16 %v24_v12  ;;  %v47_v27 = vunpack.c.h.bf16 %v24_v12 }
   0x6   :  { %338 = vmatpush.bf16.msra.mxu0 %v527_v2  ;;  %567 = vmatpush.bf16.msra.mxu2 %v527_v2  ;;  %v23_v11 = vld [vmem:[%s807_s0] sm:$0xff]  ;;  %v675_v24 = vld [vmem:[%s807_s0 + $0x38] sm:$0xff]  ;;  %v680_v29 = vld [vmem:[%s807_s0 + $0x10] sm:$0xff]  ;;  %v54_v33 = vunpack.c.l.bf16 %v28_v19  ;;  %v55_v34 = vunpack.c.h.bf16 %v28_v19  ;;  %v56_v35 = vunpack.c.l.bf16 %v670_v20  ;;  %v57_v39 = vunpack.c.h.bf16 %v670_v20 }
   0x7   :  { %372 = vmatpush.bf16.msra.mxu1 %v535_v3  ;;  %575 = vmatpush.bf16.msra.mxu3 %v535_v3  ;;  %v27_v15 = vld [vmem:[%s807_s0 + $0x20] sm:$0xff]  ;;  %v44_v21 = vunpack.c.l.bf16 %v23_v11  ;;  %v45_v22 = vunpack.c.h.bf16 %v23_v11  ;;  %v685_v30 = vld [vmem:[%s807_s0 + $0x18] sm:$0xff]  ;;  %v523_v31 = vld [vmem:[%s804_s1 + $0x10] sm:$0xff]  ;;  %v58_v40 = vunpack.c.l.bf16 %v675_v24  ;;  %v59_v41 = vunpack.c.h.bf16 %v675_v24 }
   0x8   :  { %v52_v28 = vunpack.c.l.bf16 %v27_v15  ;;  %v53_v32 = vunpack.c.h.bf16 %v27_v15  ;;  %v531_v36 = vld [vmem:[%s804_s1 + $0x50] sm:$0xff]  ;;  %v48_v42 = vunpack.c.l.bf16 %v680_v29  ;;  %v49_v43 = vunpack.c.h.bf16 %v680_v29  ;;  %v707_v45 = vld [vmem:[%s807_s0 + $0x40] sm:$0xff]  ;;  %v522_v50 = vld [vmem:[%s804_s1 + $0x8] sm:$0xff] }
   0x9   :  { %v50_v44 = vunpack.c.l.bf16 %v685_v30  ;;  %v51_v56 = vunpack.c.h.bf16 %v685_v30  ;;  %v530_v57 = vld [vmem:[%s804_s1 + $0x48] sm:$0xff]  ;;  %v60_v61 = vunpack.c.l.bf16 %v707_v45  ;;  %v529_v11 = vld [vmem:[%s804_s1 + $0x40] sm:$0xff] }
   0xa   :  { %339 = vmatpush.bf16.msra.mxu0 %v526_v4  ;;  %568 = vmatpush.bf16.msra.mxu2 %v526_v4  ;;  %v36_v13 = vld [vmem:[#allocation1] sm:$0xff]  ;;  %v37_v14 = vld [vmem:[#allocation1 + $0x9] sm:$0xff] }
   0xb   :  { %373 = vmatpush.bf16.msra.mxu1 %v534_v6  ;;  %576 = vmatpush.bf16.msra.mxu3 %v534_v6  ;;  %v38_v17 = vpack.i.b16 %v36_v13, %v36_v13  ;;  %v41_v18 = vpack.i.b16 %v37_v14, %v37_v14  ;;  %98 = vst [vmem:[#allocation1] ss:$9 sm:$0xff] %v96_v9  ;;  %v521_v6 = vld [vmem:[%s804_s1] sm:$0xff] }
   0xd   :  { %v40_v25 = vperm.slane %v38_v17, 0  ;;  %v43_v26 = vperm.slane %v41_v18, 0 }
   0xe   :  { %340 = vmatpush.bf16.msra.mxu0 %v525_v7  ;;  %569 = vmatpush.bf16.msra.mxu2 %v525_v7 }
   0xf   :  { %374 = vmatpush.bf16.msra.mxu1 %v533_v8  ;;  %577 = vmatpush.bf16.msra.mxu3 %v533_v8  ;;  %v694_v37 = vunpack.c.l.bf16 %v40_v25  ;;  %v696_v38 = vunpack.c.l.bf16 %v43_v26 }
  0x11   :  { %v66_v46 = vmul.f32 %v694_v37, %v44_v21  ;;  %v67_v47 = vmul.f32 %v696_v38, %v45_v22  ;;  %v68_v48 = vmul.f32 %v694_v37, %v46_v23  ;;  %v69_v49 = vmul.f32 %v696_v38, %v47_v27 }
  0x12   :  { %341 = vmatpush.bf16.msra.mxu0 %v524_v10  ;;  %570 = vmatpush.bf16.msra.mxu2 %v524_v10  ;;  %v99_v51 = vld [vmem:[#allocation1] sm:$0xff]  ;;  %v74_v52 = vmul.f32 %v694_v37, %v52_v28  ;;  %v75_v53 = vmul.f32 %v696_v38, %v53_v32  ;;  %v76_v54 = vmul.f32 %v694_v37, %v54_v33  ;;  %v100_v55 = vld [vmem:[#allocation1 + $0x9] sm:$0xff]  ;;  %v61_v27 = vunpack.c.h.bf16 %v707_v45 }
  0x13   :  { %375 = vmatpush.bf16.msra.mxu1 %v532_v16  ;;  %578 = vmatpush.bf16.msra.mxu3 %v532_v16  ;;  %v86_v58 = vpack.c.bf16 %v67_v47, %v66_v46  ;;  %v87_v59 = vpack.c.bf16 %v69_v49, %v68_v48  ;;  %v101_v60 = vpack.i.b16 %v99_v51, %v99_v51 }
  0x14   :  { %v77_v62 = vmul.f32 %v696_v38, %v55_v34  ;;  %v725_v63 = vpack.c.bf16 %v75_v53, %v74_v52  ;;  %v104_v0 = vpack.i.b16 %v100_v55, %v100_v55  ;;  %v78_v1 = vmul.f32 %v694_v37, %v56_v35 }
  0x15   :  { %v103_v2 = vperm.slane %v101_v60, 0  ;;  %v107_v3 = vunpack.c.l.bf16 %v86_v58  ;;  %v109_v4 = vunpack.c.l.bf16 %v87_v59  ;;  %v108_v5 = vunpack.c.h.bf16 %v86_v58 }
  0x16   :  { %342 = vmatpush.bf16.msra.mxu0 %v523_v31  ;;  %571 = vmatpush.bf16.msra.mxu2 %v523_v31  ;;  %v731_v7 = vpack.c.bf16 %v77_v62, %v76_v54  ;;  %v115_v8 = vunpack.c.l.bf16 %v725_v63  ;;  %v106_v9 = vperm.slane %v104_v0, 0  ;;  %v110_v10 = vunpack.c.h.bf16 %v87_v59 }
  0x17   :  { %376 = vmatpush.bf16.msra.mxu1 %v531_v36  ;;  %579 = vmatpush.bf16.msra.mxu3 %v531_v36  ;;  %v737_v12 = vunpack.c.l.bf16 %v103_v2  ;;  %v79_v13 = vmul.f32 %v696_v38, %v57_v39  ;;  %v80_v14 = vmul.f32 %v694_v37, %v58_v40  ;;  %v81_v15 = vmul.f32 %v696_v38, %v59_v41  ;;  %v32_v39 = vld [vmem:[%s807_s0 + $0x48] sm:$0xff] }
  0x18   :  { %v117_v16 = vunpack.c.l.bf16 %v731_v7  ;;  %v743_v17 = vunpack.c.l.bf16 %v106_v9  ;;  %v70_v18 = vmul.f32 %v694_v37, %v48_v42  ;;  %v71_v19 = vmul.f32 %v696_v38, %v49_v43 }
  0x19   :  { %v129_v20 = vadd.f32 %v737_v12, %v107_v3  ;;  %v131_v21 = vadd.f32 %v737_v12, %v109_v4  ;;  %v137_v22 = vadd.f32 %v737_v12, %v115_v8  ;;  %v92_v23 = vpack.c.bf16 %v79_v13, %v78_v1 }
  0x1a   :  { %343 = vmatpush.bf16.msra.mxu0 %v522_v50  ;;  %572 = vmatpush.bf16.msra.mxu2 %v522_v50  ;;  %v139_v24 = vadd.f32 %v737_v12, %v117_v16  ;;  %v130_v25 = vadd.f32 %v743_v17, %v108_v5  ;;  %v132_v26 = vadd.f32 %v743_v17, %v110_v10  ;;  %v62_v53 = vunpack.c.l.bf16 %v32_v39 }
  0x1b   :  { %377 = vmatpush.bf16.msra.mxu1 %v530_v57  ;;  %580 = vmatpush.bf16.msra.mxu3 %v530_v57  ;;  %v179_v28 = vmax.f32 %v129_v20, 0.0  ;;  %v181_v29 = vmax.f32 %v131_v21, 0.0  ;;  %v187_v31 = vmax.f32 %v137_v22, 0.0  ;;  %v93_v32 = vpack.c.bf16 %v81_v15, %v80_v14 }
  0x1c   :  { %v189_v33 = vmax.f32 %v139_v24, 0.0  ;;  %v180_v34 = vmax.f32 %v130_v25, 0.0  ;;  %v182_v35 = vmax.f32 %v132_v26, 0.0  ;;  %v120_v36 = vunpack.c.h.bf16 %v92_v23 }
  0x1d   :  { %v199_v40 = vpack.c.bf16 %v181_v29, %v179_v28  ;;  %v122_v41 = vunpack.c.h.bf16 %v93_v32  ;;  %v72_v42 = vmul.f32 %v694_v37, %v50_v44  ;;  %v73_v43 = vmul.f32 %v696_v38, %v51_v56 }
  0x1e   :  { %344 = vmatpush.bf16.msra.mxu0 %v521_v6  ;;  %573 = vmatpush.bf16.msra.mxu2 %v521_v6  ;;  %v203_v46 = vpack.c.bf16 %v189_v33, %v187_v31  ;;  %v200_v47 = vpack.c.bf16 %v182_v35, %v180_v34  ;;  %v142_v48 = vadd.f32 %v743_v17, %v120_v36  ;;  %v119_v52 = vunpack.c.l.bf16 %v92_v23 }
  0x1f   :  { %378 = vmatpush.bf16.msra.mxu1 %v529_v11  ;;  %581 = vmatpush.bf16.msra.mxu3 %v529_v11  ;;  %v88_v49 = vpack.c.bf16 %v71_v19, %v70_v18  ;;  %v144_v50 = vadd.f32 %v743_v17, %v122_v41  ;;  %v89_v51 = vpack.c.bf16 %v73_v43, %v72_v42  ;;  %v121_v30 = vunpack.c.l.bf16 %v93_v32 }
  0x20   :  { %v192_v54 = vmax.f32 %v142_v48, 0.0  ;;  %v63_v56 = vunpack.c.h.bf16 %v32_v39  ;;  %v82_v59 = vmul.f32 %v694_v37, %v60_v61  ;;  %v83_v62 = vmul.f32 %v696_v38, %v61_v27 }
  0x21   :  { %345 = vmatmul.bf16.vlgmr.msra.gmra.mxu0 %v199_v40  ;;  %355 = vmatmul.bf16.vlgmr.msra.gmra.mxu2 %v203_v46  ;;  %v111_v55 = vunpack.c.l.bf16 %v88_v49  ;;  %v112_v57 = vunpack.c.h.bf16 %v88_v49  ;;  %v194_v44 = vmax.f32 %v144_v50, 0.0  ;;  %v113_v58 = vunpack.c.l.bf16 %v89_v51  ;;  %v583_v49 = vld [vmem:[%s809_s5] ss:$0 sm:$0xff] }
  0x22   :  { %379 = vmatmul.bf16.vlgmr.msra.gmra.mxu1 %v200_v47  ;;  %v114_v60 = vunpack.c.h.bf16 %v89_v51  ;;  %v141_v3 = vadd.f32 %v737_v12, %v119_v52  ;;  %v143_v4 = vadd.f32 %v737_v12, %v121_v30  ;;  %v84_v45 = vmul.f32 %v694_v37, %v62_v53 }
  0x23   :  { %v206_v0 = vpack.c.bf16 %v194_v44, %v192_v54  ;;  %v133_v1 = vadd.f32 %v737_v12, %v111_v55  ;;  %v135_v2 = vadd.f32 %v737_v12, %v113_v58  ;;  %v134_v5 = vadd.f32 %v743_v17, %v112_v57 }
  0x24   :  { %v136_v6 = vadd.f32 %v743_v17, %v114_v60  ;;  %v85_v61 = vmul.f32 %v696_v38, %v63_v56  ;;  %v94_v8 = vpack.c.bf16 %v83_v62, %v82_v59  ;;  %v191_v14 = vmax.f32 %v141_v3, 0.0 }
  0x25   :  { %394 = vmatmul.bf16.vlgmr.msra.gmra.mxu3 %v206_v0  ;;  %v183_v9 = vmax.f32 %v133_v1, 0.0  ;;  %v185_v10 = vmax.f32 %v135_v2, 0.0  ;;  %v193_v15 = vmax.f32 %v143_v4, 0.0  ;;  %v184_v16 = vmax.f32 %v134_v5, 0.0 }
  0x26   :  { %v95_v11 = vpack.c.bf16 %v85_v61, %v84_v45  ;;  %v124_v13 = vunpack.c.h.bf16 %v94_v8  ;;  %v186_v18 = vmax.f32 %v136_v6, 0.0  ;;  %v123_v38 = vunpack.c.l.bf16 %v94_v8 }
  0x27   :  { %v201_v21 = vpack.c.bf16 %v185_v10, %v183_v9  ;;  %v205_v23 = vpack.c.bf16 %v193_v15, %v191_v14  ;;  %v116_v27 = vunpack.c.h.bf16 %v725_v63  ;;  %v118_v28 = vunpack.c.h.bf16 %v731_v7 }
  0x28   :  { %v126_v19 = vunpack.c.h.bf16 %v95_v11  ;;  %v146_v20 = vadd.f32 %v743_v17, %v124_v13  ;;  %v202_v37 = vpack.c.bf16 %v186_v18, %v184_v16  ;;  %v125_v26 = vunpack.c.l.bf16 %v95_v11 }
  0x29   :  { %v145_v31 = vadd.f32 %v737_v12, %v123_v38  ;;  %v138_v33 = vadd.f32 %v743_v17, %v116_v27  ;;  %v140_v34 = vadd.f32 %v743_v17, %v118_v28 }
  0x2a   :  { %v148_v22 = vadd.f32 %v743_v17, %v126_v19  ;;  %v196_v24 = vmax.f32 %v146_v20, 0.0  ;;  %v147_v32 = vadd.f32 %v737_v12, %v125_v26  ;;  %v582_v12 = vld [vmem:[%s808_s4] ss:$0 sm:$0xff] }
  0x2b   :  { %v195_v35 = vmax.f32 %v145_v31, 0.0  ;;  %v188_v39 = vmax.f32 %v138_v33, 0.0  ;;  %v190_v40 = vmax.f32 %v140_v34, 0.0 }
  0x2c   :  { %v198_v25 = vmax.f32 %v148_v22, 0.0  ;;  %v197_v36 = vmax.f32 %v147_v32, 0.0 }
  0x2d   :  { %v204_v42 = vpack.c.bf16 %v190_v40, %v188_v39 }
  0x2e   :  { %v208_v29 = vpack.c.bf16 %v198_v25, %v196_v24  ;;  %v207_v41 = vpack.c.bf16 %v197_v36, %v195_v35 }
  0x31   :  { %350 = vmatmul.bf16.gmra.mxu0 %v201_v21  ;;  %360 = vmatmul.bf16.gmra.mxu2 %v205_v23 }
  0x32   :  { %384 = vmatmul.bf16.gmra.mxu1 %v202_v37 }
  0x35   :  { %399 = vmatmul.bf16.gmra.mxu3 %v208_v29 }
  0x41   :  { %365 = vmatmul.bf16.gmra.mxu2 %v207_v41 }
  0x42   :  { %389 = vmatmul.bf16.gmra.mxu1 %v204_v42 }
  0x9e   :  { %v346_v63 = vpop.f32.mrf.mxu0 }
  0x9f   :  { %v380_v7 = vpop.f32.mrf.mxu1 }
  0xa0   :  { %v381_v43 = vadd.f32 %v380_v7, %v346_v63 }
  0xa2   :  { %v409_v17 = vmul.f32 %v582_v12, %v381_v43 }
  0xa4   :  { %v356_v46 = vpop.f32.mrf.mxu2  ;;  %v423_v52 = vadd.f32 %v583_v49, %v409_v17 }
  0xa6   :  { %v348_v47 = vpop.f32.mrf.mxu0 }
  0xa7   :  { %v382_v48 = vpop.f32.mrf.mxu1 }
  0xa8   :  { %v383_v50 = vadd.f32 %v382_v48, %v348_v47  ;;  %v395_v57 = vpop.f32.mrf.mxu3 }
  0xaa   :  { %v410_v51 = vmul.f32 %v582_v12, %v383_v50 }
  0xac   :  { %v424_v53 = vadd.f32 %v583_v49, %v410_v51  ;;  %v358_v54 = vpop.f32.mrf.mxu2 }
  0xae   :  { %v540_v55 = vpack.c.bf16 %v424_v53, %v423_v52  ;;  %v351_v30 = vpop.f32.mrf.mxu0 }
  0xaf   :  { %v385_v44 = vpop.f32.mrf.mxu1 }
  0xb0   :  { %541 = vst [vmem:[%s810_s6] sm:$0xff] %v540_v55   ;;  %v386_v58 = vadd.f32 %v385_v44, %v351_v30  ;;  %v397_v1 = vpop.f32.mrf.mxu3 }
  0xb2   :  { %v411_v62 = vmul.f32 %v582_v12, %v386_v58 }
  0xb4   :  { %v361_v56 = vpop.f32.mrf.mxu2  ;;  %v425_v4 = vadd.f32 %v583_v49, %v411_v62 }
  0xb5   :  { %v396_v2 = vadd.f32 %v395_v57, %v361_v56 }
  0xb6   :  { %v353_v59 = vpop.f32.mrf.mxu0 }
  0xb7   :  { %v387_v60 = vpop.f32.mrf.mxu1  ;;  %v415_v45 = vmul.f32 %v582_v12, %v396_v2 }
  0xb8   :  { %v388_v0 = vadd.f32 %v387_v60, %v353_v59  ;;  %v400_v14 = vpop.f32.mrf.mxu3 }
  0xb9   :  { %v429_v11 = vadd.f32 %v583_v49, %v415_v45 }
  0xba   :  { %v412_v3 = vmul.f32 %v582_v12, %v388_v0 }
  0xbc   :  { %v426_v5 = vadd.f32 %v583_v49, %v412_v3  ;;  %v363_v6 = vpop.f32.mrf.mxu2 }
  0xbd   :  { %v398_v8 = vadd.f32 %v397_v1, %v363_v6 }
  0xbe   :  { %v545_v61 = vpack.c.bf16 %v426_v5, %v425_v4 }
  0xbf   :  { %v390_v9 = vpop.f32.mrf.mxu1  ;;  %v416_v10 = vmul.f32 %v582_v12, %v398_v8 }
  0xc0   :  { %562 = vst [vmem:[%s810_s6 + $0x8] sm:$0xff] %v545_v61   ;;  %v391_v16 = vadd.f32 %v390_v9, %v356_v46  ;;  %v402_v25 = vpop.f32.mrf.mxu3 }
  0xc1   :  { %v430_v13 = vadd.f32 %v583_v49, %v416_v10 }
  0xc2   :  { %v413_v20 = vmul.f32 %v582_v12, %v391_v16 }
  0xc3   :  { %v555_v15 = vpack.c.bf16 %v430_v13, %v429_v11 }
  0xc4   :  { %v366_v18 = vpop.f32.mrf.mxu2  ;;  %v427_v37 = vadd.f32 %v583_v49, %v413_v20 }
  0xc5   :  { %564 = vst [vmem:[%s810_s6 + $0x18] sm:$0xff] %v555_v15   ;;  %v401_v22 = vadd.f32 %v400_v14, %v366_v18 }
  0xc7   :  { %v392_v19 = vpop.f32.mrf.mxu1  ;;  %v417_v26 = vmul.f32 %v582_v12, %v401_v22 }
  0xc8   :  { %v393_v21 = vadd.f32 %v392_v19, %v358_v54 }
  0xc9   :  { %v431_v31 = vadd.f32 %v583_v49, %v417_v26 }
  0xca   :  { %v414_v23 = vmul.f32 %v582_v12, %v393_v21 }
  0xcc   :  { %v428_v24 = vadd.f32 %v583_v49, %v414_v23  ;;  %v368_v38 = vpop.f32.mrf.mxu2 }
  0xcd   :  { %v403_v28 = vadd.f32 %v402_v25, %v368_v38 }
  0xce   :  { %v550_v27 = vpack.c.bf16 %v428_v24, %v427_v37 }
  0xcf   :  { %v418_v29 = vmul.f32 %v582_v12, %v403_v28 }
  0xd0   :  { %563 = vst [vmem:[%s810_s6 + $0x10] sm:$0xff] %v550_v27  }
  0xd1   :  { %v432_v32 = vadd.f32 %v583_v49, %v418_v29 }
  0xd3   :  { %v560_v33 = vpack.c.bf16 %v432_v32, %v431_v31 }
  0xd5   :  { %565 = vst [vmem:[%s810_s6 + $0x20] sm:$0xff] %v560_v33  }

// kernel: _lambda_.16
= control target key start
LH: loop header
LB: loop body
LE: loop exit
PB: predicated region body
PF: predicated region fallthrough
CT: control target
= control target key end

     0   :  { %s1168_s1 = inlined_call_operand.vmem [shape: bf16[512,128], index: 1, kind: input, shape index: {}]   ;;  %s1169_s0 = inlined_call_operand.vmem [shape: bf16[80,512], index: 0, kind: input, shape index: {}]   ;;  %s1170_s2 = inlined_call_operand.vmem [shape: f32[1,128], index: 2, kind: input, shape index: {}]   ;;  %s1171_s3 = inlined_call_operand.vmem [shape: f32[1,128], index: 3, kind: input, shape index: {}]   ;;  %s1172_s4 = inlined_call_operand.vmem [shape: bf16[80,128], index: 4, kind: output, shape index: {}]  }
   0x1   :  { %v826_v0 = vld [vmem:[%s1168_s1 + $0x38] sm:$0xff]  ;;  %v825_v4 = vld [vmem:[%s1168_s1 + $0x30] sm:$0xff]  ;;  %v824_v8 = vld [vmem:[%s1168_s1 + $0x28] sm:$0xff] }
   0x2   :  { %v834_v1 = vld [vmem:[%s1168_s1 + $0x78] sm:$0xff]  ;;  %393 = vmatpush.bf16.msra.mxu0 %v826_v0  ;;  %v833_v5 = vld [vmem:[%s1168_s1 + $0x70] sm:$0xff]  ;;  %v832_v9 = vld [vmem:[%s1168_s1 + $0x68] sm:$0xff] }
   0x3   :  { %v842_v2 = vld [vmem:[%s1168_s1 + $0xb8] sm:$0xff]  ;;  %427 = vmatpush.bf16.msra.mxu1 %v834_v1  ;;  %v841_v6 = vld [vmem:[%s1168_s1 + $0xb0] sm:$0xff]  ;;  %v840_v10 = vld [vmem:[%s1168_s1 + $0xa8] sm:$0xff] }
   0x4   :  { %v850_v3 = vld [vmem:[%s1168_s1 + $0xf8] sm:$0xff]  ;;  %461 = vmatpush.bf16.msra.mxu2 %v842_v2  ;;  %v849_v7 = vld [vmem:[%s1168_s1 + $0xf0] sm:$0xff]  ;;  %v848_v11 = vld [vmem:[%s1168_s1 + $0xe8] sm:$0xff] }
   0x5   :  { %495 = vmatpush.bf16.msra.mxu3 %v850_v3  ;;  %v823_v12 = vld [vmem:[%s1168_s1 + $0x20] sm:$0xff]  ;;  %v822_v16 = vld [vmem:[%s1168_s1 + $0x18] sm:$0xff]  ;;  %v821_v20 = vld [vmem:[%s1168_s1 + $0x10] sm:$0xff] }
   0x6   :  { %394 = vmatpush.bf16.msra.mxu0 %v825_v4  ;;  %v831_v13 = vld [vmem:[%s1168_s1 + $0x60] sm:$0xff]  ;;  %v830_v17 = vld [vmem:[%s1168_s1 + $0x58] sm:$0xff]  ;;  %v829_v21 = vld [vmem:[%s1168_s1 + $0x50] sm:$0xff] }
   0x7   :  { %428 = vmatpush.bf16.msra.mxu1 %v833_v5  ;;  %v839_v14 = vld [vmem:[%s1168_s1 + $0xa0] sm:$0xff]  ;;  %v838_v18 = vld [vmem:[%s1168_s1 + $0x98] sm:$0xff]  ;;  %v837_v22 = vld [vmem:[%s1168_s1 + $0x90] sm:$0xff] }
   0x8   :  { %462 = vmatpush.bf16.msra.mxu2 %v841_v6  ;;  %v847_v15 = vld [vmem:[%s1168_s1 + $0xe0] sm:$0xff]  ;;  %v846_v19 = vld [vmem:[%s1168_s1 + $0xd8] sm:$0xff]  ;;  %v845_v23 = vld [vmem:[%s1168_s1 + $0xd0] sm:$0xff] }
   0x9   :  { %496 = vmatpush.bf16.msra.mxu3 %v849_v7  ;;  %v820_v24 = vld [vmem:[%s1168_s1 + $0x8] sm:$0xff]  ;;  %v819_v28 = vld [vmem:[%s1168_s1] sm:$0xff]  ;;  %v801_v33 = vld [vmem:[%s1169_s0 + $0xc] sm:$0xf0] }
   0xa   :  { %395 = vmatpush.bf16.msra.mxu0 %v824_v8  ;;  %v828_v25 = vld [vmem:[%s1168_s1 + $0x48] sm:$0xff]  ;;  %v827_v29 = vld [vmem:[%s1168_s1 + $0x40] sm:$0xff]  ;;  %v595_v35 = vld [vmem:[%s1169_s0 + $0x10] sm:$0xf0] }
   0xb   :  { %429 = vmatpush.bf16.msra.mxu1 %v832_v9  ;;  %v836_v26 = vld [vmem:[%s1168_s1 + $0x88] sm:$0xff]  ;;  %v835_v30 = vld [vmem:[%s1168_s1 + $0x80] sm:$0xff]  ;;  %v802_v37 = vld [vmem:[%s1169_s0 + $0x14] sm:$0xf0] }
   0xc   :  { %463 = vmatpush.bf16.msra.mxu2 %v840_v10  ;;  %v844_v27 = vld [vmem:[%s1168_s1 + $0xc8] sm:$0xff]  ;;  %v843_v31 = vld [vmem:[%s1168_s1 + $0xc0] sm:$0xff]  ;;  %v603_v39 = vld [vmem:[%s1169_s0 + $0x18] sm:$0xf0] }
   0xd   :  { %497 = vmatpush.bf16.msra.mxu3 %v848_v11  ;;  %v593_v32 = vld [vmem:[%s1169_s0] sm:$0xf]  ;;  %v799_v34 = vld [vmem:[%s1169_s0 + $0x4] sm:$0xf]  ;;  %v601_v36 = vld [vmem:[%s1169_s0 + $0x8] sm:$0xf] }
   0xe   :  { %396 = vmatpush.bf16.msra.mxu0 %v823_v12  ;;  %v800_v38 = vld [vmem:[%s1169_s0 + $0xc] sm:$0xf]  ;;  %v594_v40 = vor.u32 %v801_v33, %v593_v32  ;;  %v598_v41 = vor.u32 %v799_v34, %v595_v35  ;;  %v602_v42 = vor.u32 %v802_v37, %v601_v36  ;;  %v609_v44 = vld [vmem:[%s1169_s0 + $0x20] sm:$0xf]  ;;  %v805_v45 = vld [vmem:[%s1169_s0 + $0x2c] sm:$0xf0] }
   0xf   :  { %430 = vmatpush.bf16.msra.mxu1 %v831_v13  ;;  %v606_v43 = vor.u32 %v800_v38, %v603_v39  ;;  %v803_v46 = vld [vmem:[%s1169_s0 + $0x24] sm:$0xf]  ;;  %v611_v47 = vld [vmem:[%s1169_s0 + $0x30] sm:$0xf0]  ;;  %v617_v48 = vld [vmem:[%s1169_s0 + $0x28] sm:$0xf]  ;;  %v610_v52 = vor.u32 %v805_v45, %v609_v44 }
  0x10   :  { %464 = vmatpush.bf16.msra.mxu2 %v839_v14  ;;  %v806_v49 = vld [vmem:[%s1169_s0 + $0x34] sm:$0xf0]  ;;  %v804_v50 = vld [vmem:[%s1169_s0 + $0x2c] sm:$0xf]  ;;  %v619_v51 = vld [vmem:[%s1169_s0 + $0x38] sm:$0xf0]  ;;  %v614_v53 = vor.u32 %v803_v46, %v611_v47 }
  0x11   :  { %498 = vmatpush.bf16.msra.mxu3 %v847_v15  ;;  %v618_v54 = vor.u32 %v806_v49, %v617_v48  ;;  %v622_v55 = vor.u32 %v804_v50, %v619_v51  ;;  %v625_v56 = vld [vmem:[%s1169_s0 + $0x40] sm:$0xf]  ;;  %v809_v57 = vld [vmem:[%s1169_s0 + $0x4c] sm:$0xf0]  ;;  %v807_v58 = vld [vmem:[%s1169_s0 + $0x44] sm:$0xf] }
  0x12   :  { %397 = vmatpush.bf16.msra.mxu0 %v822_v16  ;;  %v627_v59 = vld [vmem:[%s1169_s0 + $0x50] sm:$0xf0]  ;;  %v633_v60 = vld [vmem:[%s1169_s0 + $0x48] sm:$0xf]  ;;  %v810_v61 = vld [vmem:[%s1169_s0 + $0x54] sm:$0xf0]  ;;  %v626_v0 = vor.u32 %v809_v57, %v625_v56 }
  0x13   :  { %431 = vmatpush.bf16.msra.mxu1 %v830_v17  ;;  %v808_v62 = vld [vmem:[%s1169_s0 + $0x4c] sm:$0xf]  ;;  %v635_v63 = vld [vmem:[%s1169_s0 + $0x58] sm:$0xf0]  ;;  %v630_v1 = vor.u32 %v807_v58, %v627_v59  ;;  %v634_v2 = vor.u32 %v810_v61, %v633_v60  ;;  %v641_v4 = vld [vmem:[%s1169_s0 + $0x60] sm:$0xf] }
  0x14   :  { %465 = vmatpush.bf16.msra.mxu2 %v838_v18  ;;  %v638_v3 = vor.u32 %v808_v62, %v635_v63  ;;  %v813_v5 = vld [vmem:[%s1169_s0 + $0x6c] sm:$0xf0]  ;;  %v811_v6 = vld [vmem:[%s1169_s0 + $0x64] sm:$0xf]  ;;  %v643_v7 = vld [vmem:[%s1169_s0 + $0x70] sm:$0xf0] }
  0x15   :  { %499 = vmatpush.bf16.msra.mxu3 %v846_v19  ;;  %v649_v8 = vld [vmem:[%s1169_s0 + $0x68] sm:$0xf]  ;;  %v814_v9 = vld [vmem:[%s1169_s0 + $0x74] sm:$0xf0]  ;;  %v812_v10 = vld [vmem:[%s1169_s0 + $0x6c] sm:$0xf]  ;;  %v642_v12 = vor.u32 %v813_v5, %v641_v4  ;;  %v646_v13 = vor.u32 %v811_v6, %v643_v7 }
  0x16   :  { %398 = vmatpush.bf16.msra.mxu0 %v821_v20  ;;  %v651_v11 = vld [vmem:[%s1169_s0 + $0x78] sm:$0xf0]  ;;  %v650_v14 = vor.u32 %v814_v9, %v649_v8  ;;  %v657_v16 = vld [vmem:[%s1169_s0 + $0x80] sm:$0xf]  ;;  %v817_v17 = vld [vmem:[%s1169_s0 + $0x8c] sm:$0xf0] }
  0x17   :  { %432 = vmatpush.bf16.msra.mxu1 %v829_v21  ;;  %v654_v15 = vor.u32 %v812_v10, %v651_v11  ;;  %v815_v18 = vld [vmem:[%s1169_s0 + $0x84] sm:$0xf]  ;;  %v659_v19 = vld [vmem:[%s1169_s0 + $0x90] sm:$0xf0]  ;;  %v665_v20 = vld [vmem:[%s1169_s0 + $0x88] sm:$0xf] }
  0x18   :  { %466 = vmatpush.bf16.msra.mxu2 %v837_v22  ;;  %v818_v21 = vld [vmem:[%s1169_s0 + $0x94] sm:$0xf0]  ;;  %v816_v22 = vld [vmem:[%s1169_s0 + $0x8c] sm:$0xf]  ;;  %v1126_v37 = vld [vmem:[%s1170_s2] ss:$0 sm:$0xff] }
  0x19   :  { %500 = vmatpush.bf16.msra.mxu3 %v845_v23  ;;  %v667_v23 = vld [vmem:[%s1169_s0 + $0x98] sm:$0xf0] }
  0x1a   :  { %399 = vmatpush.bf16.msra.mxu0 %v820_v24  ;;  %v658_v24 = vor.u32 %v817_v17, %v657_v16 }
  0x1b   :  { %433 = vmatpush.bf16.msra.mxu1 %v828_v25  ;;  %v662_v25 = vor.u32 %v815_v18, %v659_v19 }
  0x1c   :  { %467 = vmatpush.bf16.msra.mxu2 %v836_v26  ;;  %v666_v26 = vor.u32 %v818_v21, %v665_v20 }
  0x1d   :  { %501 = vmatpush.bf16.msra.mxu3 %v844_v27  ;;  %v670_v27 = vor.u32 %v816_v22, %v667_v23 }
  0x1e   :  { %400 = vmatpush.bf16.msra.mxu0 %v819_v28 }
  0x1f   :  { %434 = vmatpush.bf16.msra.mxu1 %v827_v29 }
  0x20   :  { %468 = vmatpush.bf16.msra.mxu2 %v835_v30 }
  0x21   :  { %502 = vmatpush.bf16.msra.mxu3 %v843_v31  ;;  %401 = vmatmul.bf16.vlgmr.msra.gmra.mxu0 %v594_v40 }
  0x22   :  { %435 = vmatmul.bf16.vlgmr.msra.gmra.mxu1 %v598_v41 }
  0x23   :  { %469 = vmatmul.bf16.vlgmr.msra.gmra.mxu2 %v602_v42  ;;  %v1132_v42 = vld [vmem:[%s1171_s3] ss:$0 sm:$0xff] }
  0x24   :  { %503 = vmatmul.bf16.vlgmr.msra.gmra.mxu3 %v606_v43 }
  0x31   :  { %406 = vmatmul.bf16.gmra.mxu0 %v610_v52 }
  0x32   :  { %440 = vmatmul.bf16.gmra.mxu1 %v614_v53 }
  0x33   :  { %474 = vmatmul.bf16.gmra.mxu2 %v618_v54 }
  0x34   :  { %508 = vmatmul.bf16.gmra.mxu3 %v622_v55 }
  0x41   :  { %411 = vmatmul.bf16.gmra.mxu0 %v626_v0 }
  0x42   :  { %445 = vmatmul.bf16.gmra.mxu1 %v630_v1 }
  0x43   :  { %479 = vmatmul.bf16.gmra.mxu2 %v634_v2 }
  0x44   :  { %513 = vmatmul.bf16.gmra.mxu3 %v638_v3 }
  0x51   :  { %416 = vmatmul.bf16.gmra.mxu0 %v642_v12 }
  0x52   :  { %450 = vmatmul.bf16.gmra.mxu1 %v646_v13 }
  0x53   :  { %484 = vmatmul.bf16.gmra.mxu2 %v650_v14 }
  0x54   :  { %518 = vmatmul.bf16.gmra.mxu3 %v654_v15 }
  0x61   :  { %421 = vmatmul.bf16.gmra.mxu0 %v658_v24 }
  0x62   :  { %455 = vmatmul.bf16.gmra.mxu1 %v662_v25 }
  0x63   :  { %489 = vmatmul.bf16.gmra.mxu2 %v666_v26 }
  0x64   :  { %523 = vmatmul.bf16.gmra.mxu3 %v670_v27 }
  0x9e   :  { %v402_v28 = vpop.f32.mrf.mxu0 }
  0x9f   :  { %v436_v29 = vpop.f32.mrf.mxu1 }
  0xa0   :  { %v437_v30 = vadd.f32 %v436_v29, %v402_v28 }
  0xa6   :  { %v470_v31 = vpop.f32.mrf.mxu2  ;;  %v404_v34 = vpop.f32.mrf.mxu0 }
  0xa7   :  { %v504_v32 = vpop.f32.mrf.mxu3  ;;  %v471_v33 = vadd.f32 %v470_v31, %v437_v30  ;;  %v438_v35 = vpop.f32.mrf.mxu1 }
  0xa8   :  { %v439_v38 = vadd.f32 %v438_v35, %v404_v34 }
  0xa9   :  { %v505_v36 = vadd.f32 %v504_v32, %v471_v33 }
  0xab   :  { %v533_v41 = vmul.f32 %v1126_v37, %v505_v36 }
  0xad   :  { %v547_v47 = vadd.f32 %v1132_v42, %v533_v41 }
  0xae   :  { %v472_v39 = vpop.f32.mrf.mxu2  ;;  %v407_v44 = vpop.f32.mrf.mxu0 }
  0xaf   :  { %v506_v40 = vpop.f32.mrf.mxu3  ;;  %v473_v43 = vadd.f32 %v472_v39, %v439_v38  ;;  %v441_v45 = vpop.f32.mrf.mxu1  ;;  %v557_v53 = vmax.f32 %v547_v47, 0.0 }
  0xb0   :  { %v442_v49 = vadd.f32 %v441_v45, %v407_v44 }
  0xb1   :  { %v507_v46 = vadd.f32 %v506_v40, %v473_v43 }
  0xb3   :  { %v534_v48 = vmul.f32 %v1126_v37, %v507_v46 }
  0xb5   :  { %v548_v50 = vadd.f32 %v1132_v42, %v534_v48 }
  0xb6   :  { %v475_v51 = vpop.f32.mrf.mxu2  ;;  %v409_v56 = vpop.f32.mrf.mxu0 }
  0xb7   :  { %v509_v52 = vpop.f32.mrf.mxu3  ;;  %v558_v54 = vmax.f32 %v548_v50, 0.0  ;;  %v476_v55 = vadd.f32 %v475_v51, %v442_v49  ;;  %v443_v57 = vpop.f32.mrf.mxu1 }
  0xb8   :  { %v444_v60 = vadd.f32 %v443_v57, %v409_v56 }
  0xb9   :  { %v854_v58 = vpack.c.bf16 %v558_v54, %v557_v53  ;;  %v510_v59 = vadd.f32 %v509_v52, %v476_v55 }
  0xbb   :  { %855 = vst [vmem:[%s1172_s4] sm:$0xff] %v854_v58   ;;  %v535_v63 = vmul.f32 %v1126_v37, %v510_v59 }
  0xbd   :  { %v549_v4 = vadd.f32 %v1132_v42, %v535_v63 }
  0xbe   :  { %v477_v61 = vpop.f32.mrf.mxu2  ;;  %v412_v1 = vpop.f32.mrf.mxu0 }
  0xbf   :  { %v511_v62 = vpop.f32.mrf.mxu3  ;;  %v478_v0 = vadd.f32 %v477_v61, %v444_v60  ;;  %v446_v2 = vpop.f32.mrf.mxu1  ;;  %v559_v10 = vmax.f32 %v549_v4, 0.0 }
  0xc0   :  { %v447_v6 = vadd.f32 %v446_v2, %v412_v1 }
  0xc1   :  { %v512_v3 = vadd.f32 %v511_v62, %v478_v0 }
  0xc3   :  { %v536_v5 = vmul.f32 %v1126_v37, %v512_v3 }
  0xc5   :  { %v550_v7 = vadd.f32 %v1132_v42, %v536_v5 }
  0xc6   :  { %v480_v8 = vpop.f32.mrf.mxu2  ;;  %v414_v13 = vpop.f32.mrf.mxu0 }
  0xc7   :  { %v514_v9 = vpop.f32.mrf.mxu3  ;;  %v560_v11 = vmax.f32 %v550_v7, 0.0  ;;  %v481_v12 = vadd.f32 %v480_v8, %v447_v6  ;;  %v448_v14 = vpop.f32.mrf.mxu1 }
  0xc8   :  { %v449_v17 = vadd.f32 %v448_v14, %v414_v13 }
  0xc9   :  { %v859_v15 = vpack.c.bf16 %v560_v11, %v559_v10  ;;  %v515_v16 = vadd.f32 %v514_v9, %v481_v12 }
  0xcb   :  { %876 = vst [vmem:[%s1172_s4 + $0x8] sm:$0xff] %v859_v15   ;;  %v537_v20 = vmul.f32 %v1126_v37, %v515_v16 }
  0xcd   :  { %v551_v25 = vadd.f32 %v1132_v42, %v537_v20 }
  0xce   :  { %v482_v18 = vpop.f32.mrf.mxu2  ;;  %v417_v22 = vpop.f32.mrf.mxu0 }
  0xcf   :  { %v516_v19 = vpop.f32.mrf.mxu3  ;;  %v483_v21 = vadd.f32 %v482_v18, %v449_v17  ;;  %v451_v23 = vpop.f32.mrf.mxu1  ;;  %v561_v31 = vmax.f32 %v551_v25, 0.0 }
  0xd0   :  { %v452_v27 = vadd.f32 %v451_v23, %v417_v22 }
  0xd1   :  { %v517_v24 = vadd.f32 %v516_v19, %v483_v21 }
  0xd3   :  { %v538_v26 = vmul.f32 %v1126_v37, %v517_v24 }
  0xd5   :  { %v552_v28 = vadd.f32 %v1132_v42, %v538_v26 }
  0xd6   :  { %v485_v29 = vpop.f32.mrf.mxu2  ;;  %v419_v34 = vpop.f32.mrf.mxu0 }
  0xd7   :  { %v519_v30 = vpop.f32.mrf.mxu3  ;;  %v562_v32 = vmax.f32 %v552_v28, 0.0  ;;  %v486_v33 = vadd.f32 %v485_v29, %v452_v27  ;;  %v453_v35 = vpop.f32.mrf.mxu1 }
  0xd8   :  { %v454_v39 = vadd.f32 %v453_v35, %v419_v34 }
  0xd9   :  { %v864_v36 = vpack.c.bf16 %v562_v32, %v561_v31  ;;  %v520_v38 = vadd.f32 %v519_v30, %v486_v33 }
  0xdb   :  { %877 = vst [vmem:[%s1172_s4 + $0x10] sm:$0xff] %v864_v36   ;;  %v539_v43 = vmul.f32 %v1126_v37, %v520_v38 }
  0xdd   :  { %v553_v48 = vadd.f32 %v1132_v42, %v539_v43 }
  0xde   :  { %v487_v40 = vpop.f32.mrf.mxu2  ;;  %v422_v45 = vpop.f32.mrf.mxu0 }
  0xdf   :  { %v521_v41 = vpop.f32.mrf.mxu3  ;;  %v488_v44 = vadd.f32 %v487_v40, %v454_v39  ;;  %v456_v46 = vpop.f32.mrf.mxu1  ;;  %v563_v54 = vmax.f32 %v553_v48, 0.0 }
  0xe0   :  { %v457_v50 = vadd.f32 %v456_v46, %v422_v45 }
  0xe1   :  { %v522_v47 = vadd.f32 %v521_v41, %v488_v44 }
  0xe3   :  { %v540_v49 = vmul.f32 %v1126_v37, %v522_v47 }
  0xe5   :  { %v554_v51 = vadd.f32 %v1132_v42, %v540_v49 }
  0xe6   :  { %v490_v52 = vpop.f32.mrf.mxu2  ;;  %v424_v59 = vpop.f32.mrf.mxu0 }
  0xe7   :  { %v524_v53 = vpop.f32.mrf.mxu3  ;;  %v564_v55 = vmax.f32 %v554_v51, 0.0  ;;  %v491_v56 = vadd.f32 %v490_v52, %v457_v50  ;;  %v458_v60 = vpop.f32.mrf.mxu1 }
  0xe8   :  { %v459_v63 = vadd.f32 %v458_v60, %v424_v59 }
  0xe9   :  { %v869_v57 = vpack.c.bf16 %v564_v55, %v563_v54  ;;  %v525_v58 = vadd.f32 %v524_v53, %v491_v56 }
  0xeb   :  { %878 = vst [vmem:[%s1172_s4 + $0x18] sm:$0xff] %v869_v57   ;;  %v541_v61 = vmul.f32 %v1126_v37, %v525_v58 }
  0xed   :  { %v555_v62 = vadd.f32 %v1132_v42, %v541_v61 }
  0xee   :  { %v492_v0 = vpop.f32.mrf.mxu2 }
  0xef   :  { %v493_v1 = vadd.f32 %v492_v0, %v459_v63  ;;  %v526_v2 = vpop.f32.mrf.mxu3  ;;  %v565_v6 = vmax.f32 %v555_v62, 0.0 }
  0xf1   :  { %v527_v3 = vadd.f32 %v526_v2, %v493_v1 }
  0xf3   :  { %v542_v4 = vmul.f32 %v1126_v37, %v527_v3 }
  0xf5   :  { %v556_v5 = vadd.f32 %v1132_v42, %v542_v4 }
  0xf7   :  { %v566_v7 = vmax.f32 %v556_v5, 0.0 }
  0xf9   :  { %v874_v8 = vpack.c.bf16 %v566_v7, %v565_v6 }
  0xfb   :  { %879 = vst [vmem:[%s1172_s4 + $0x20] sm:$0xff] %v874_v8  }

// kernel: _lambda_.17
= control target key start
LH: loop header
LB: loop body
LE: loop exit
PB: predicated region body
PF: predicated region fallthrough
CT: control target
= control target key end

     0   :  { %s512_s1 = inlined_call_operand.vmem [shape: bf16[128,128], index: 1, kind: input, shape index: {}]   ;;  %s513_s0 = inlined_call_operand.vmem [shape: bf16[80,128], index: 0, kind: input, shape index: {}]   ;;  %s514_s2 = inlined_call_operand.vmem [shape: bf16[1,128], index: 2, kind: input, shape index: {}]   ;;  %s515_s3 = inlined_call_operand.vmem [shape: bf16[1,128], index: 3, kind: input, shape index: {}]   ;;  %s516_s4 = inlined_call_operand.vmem [shape: f32[1,128], index: 4, kind: input, shape index: {}]   ;;  %s517_s5 = inlined_call_operand.vmem [shape: f32[1,128], index: 5, kind: input, shape index: {}]   ;;  %s518_s6 = inlined_call_operand.vmem [shape: bf16[80,128], index: 6, kind: output, shape index: {}]  }
   0x1   :  { %v319_v0 = vld [vmem:[%s512_s1 + $0x38] sm:$0xff]  ;;  %v318_v1 = vld [vmem:[%s512_s1 + $0x30] sm:$0xff]  ;;  %v33_v3 = vld [vmem:[%s514_s2] sm:$0x1] }
   0x2   :  { %375 = vmatpush.bf16.msra.mxu3 %v319_v0  ;;  %374 = vmatpush.bf16.msra.mxu2 %v319_v0  ;;  %v367_v2 = vld [vmem:[%s513_s0 + $0x18] sm:$0xff]   ;;  %v366_v4 = vld [vmem:[%s513_s0 + $0x10] sm:$0xff]   ;;  %v35_v5 = vpack.i.b16 %v33_v3, %v33_v3  ;;  %v69_v6 = vld [vmem:[%s515_s3] sm:$0x1] }
   0x3   :  { %194 = vmatpush.bf16.msra.mxu0 %v319_v0  ;;  %373 = vmatpush.bf16.msra.mxu1 %v319_v0  ;;  %v321_v7 = vld [vmem:[%s513_s0] sm:$0xff]   ;;  %v365_v8 = vld [vmem:[%s513_s0 + $0x8] sm:$0xff]   ;;  %v334_v10 = vunpack.c.l.bf16 %v367_v2  ;;  %v335_v11 = vunpack.c.h.bf16 %v367_v2  ;;  %v330_v13 = vunpack.c.l.bf16 %v366_v4  ;;  %v331_v14 = vunpack.c.h.bf16 %v366_v4  ;;  %v315_v36 = vld [vmem:[%s512_s1 + $0x18] sm:$0xff] }
   0x4   :  { %v317_v9 = vld [vmem:[%s512_s1 + $0x28] sm:$0xff]  ;;  %v37_v12 = vperm.slane %v35_v5, 0  ;;  %v322_v15 = vunpack.c.l.bf16 %v321_v7  ;;  %v323_v16 = vunpack.c.h.bf16 %v321_v7  ;;  %v71_v18 = vpack.i.b16 %v69_v6, %v69_v6  ;;  %v316_v21 = vld [vmem:[%s512_s1 + $0x20] sm:$0xff]  ;;  %v314_v47 = vld [vmem:[%s512_s1 + $0x10] sm:$0xff] }
   0x5   :  { %v326_v19 = vunpack.c.l.bf16 %v365_v8  ;;  %v327_v20 = vunpack.c.h.bf16 %v365_v8  ;;  %v368_v46 = vld [vmem:[%s513_s0 + $0x20] sm:$0xff]   ;;  %v313_v58 = vld [vmem:[%s512_s1 + $0x8] sm:$0xff] }
   0x6   :  { %378 = vmatpush.bf16.msra.mxu3 %v318_v1  ;;  %377 = vmatpush.bf16.msra.mxu2 %v318_v1  ;;  %v461_v17 = vunpack.c.l.bf16 %v37_v12  ;;  %v73_v30 = vperm.slane %v71_v18, 0  ;;  %v338_v53 = vunpack.c.l.bf16 %v368_v46  ;;  %v339_v57 = vunpack.c.h.bf16 %v368_v46  ;;  %v312_v4 = vld [vmem:[%s512_s1] sm:$0xff] }
   0x7   :  { %195 = vmatpush.bf16.msra.mxu0 %v318_v1  ;;  %376 = vmatpush.bf16.msra.mxu1 %v318_v1 }
   0x8   :  { %v55_v22 = vmul.f32 %v334_v10, %v461_v17  ;;  %v56_v23 = vmul.f32 %v335_v11, %v461_v17  ;;  %v53_v24 = vmul.f32 %v330_v13, %v461_v17  ;;  %v54_v25 = vmul.f32 %v331_v14, %v461_v17 }
   0x9   :  { %v49_v26 = vmul.f32 %v322_v15, %v461_v17  ;;  %v50_v27 = vmul.f32 %v323_v16, %v461_v17  ;;  %v51_v31 = vmul.f32 %v326_v19, %v461_v17  ;;  %v52_v35 = vmul.f32 %v327_v20, %v461_v17 }
   0xa   :  { %381 = vmatpush.bf16.msra.mxu3 %v317_v9  ;;  %380 = vmatpush.bf16.msra.mxu2 %v317_v9  ;;  %v65_v28 = vpack.c.bf16 %v55_v22, %v55_v22  ;;  %v66_v29 = vpack.c.bf16 %v56_v23, %v56_v23  ;;  %v63_v32 = vpack.c.bf16 %v53_v24, %v53_v24  ;;  %v84_v42 = vunpack.c.l.bf16 %v73_v30  ;;  %v397_v24 = vld [vmem:[%s516_s4] ss:$0 sm:$0xff] }
   0xb   :  { %196 = vmatpush.bf16.msra.mxu0 %v317_v9  ;;  %379 = vmatpush.bf16.msra.mxu1 %v317_v9  ;;  %v64_v33 = vpack.c.bf16 %v54_v25, %v54_v25  ;;  %v59_v34 = vpack.c.bf16 %v49_v26, %v49_v26  ;;  %v60_v37 = vpack.c.bf16 %v50_v27, %v50_v27 }
   0xc   :  { %v61_v38 = vpack.c.bf16 %v51_v31, %v51_v31  ;;  %v62_v39 = vpack.c.bf16 %v52_v35, %v52_v35  ;;  %v80_v40 = vunpack.c.l.bf16 %v65_v28  ;;  %v81_v41 = vunpack.c.l.bf16 %v66_v29  ;;  %v398_v29 = vld [vmem:[%s517_s5] ss:$0 sm:$0xff] }
   0xd   :  { %v78_v43 = vunpack.c.l.bf16 %v63_v32  ;;  %v79_v44 = vunpack.c.l.bf16 %v64_v33  ;;  %v74_v45 = vunpack.c.l.bf16 %v59_v34  ;;  %v75_v48 = vunpack.c.l.bf16 %v60_v37 }
   0xe   :  { %384 = vmatpush.bf16.msra.mxu3 %v316_v21  ;;  %383 = vmatpush.bf16.msra.mxu2 %v316_v21  ;;  %v76_v49 = vunpack.c.l.bf16 %v61_v38  ;;  %v77_v50 = vunpack.c.l.bf16 %v62_v39  ;;  %v91_v51 = vadd.f32 %v84_v42, %v80_v40  ;;  %v92_v52 = vadd.f32 %v84_v42, %v81_v41 }
   0xf   :  { %197 = vmatpush.bf16.msra.mxu0 %v316_v21  ;;  %382 = vmatpush.bf16.msra.mxu1 %v316_v21  ;;  %v89_v54 = vadd.f32 %v84_v42, %v78_v43  ;;  %v90_v55 = vadd.f32 %v84_v42, %v79_v44  ;;  %v85_v56 = vadd.f32 %v84_v42, %v74_v45 }
  0x10   :  { %v86_v59 = vadd.f32 %v84_v42, %v75_v48  ;;  %v87_v60 = vadd.f32 %v84_v42, %v76_v49  ;;  %v88_v61 = vadd.f32 %v84_v42, %v77_v50  ;;  %v121_v62 = vmax.f32 %v91_v51, 0.0 }
  0x11   :  { %v122_v63 = vmax.f32 %v92_v52, 0.0  ;;  %v119_v0 = vmax.f32 %v89_v54, 0.0  ;;  %v120_v1 = vmax.f32 %v90_v55, 0.0  ;;  %v57_v2 = vmul.f32 %v338_v53, %v461_v17 }
  0x12   :  { %387 = vmatpush.bf16.msra.mxu3 %v315_v36  ;;  %386 = vmatpush.bf16.msra.mxu2 %v315_v36  ;;  %v58_v3 = vmul.f32 %v339_v57, %v461_v17  ;;  %v115_v5 = vmax.f32 %v85_v56, 0.0  ;;  %v116_v6 = vmax.f32 %v86_v59, 0.0  ;;  %v117_v7 = vmax.f32 %v87_v60, 0.0 }
  0x13   :  { %198 = vmatpush.bf16.msra.mxu0 %v315_v36  ;;  %385 = vmatpush.bf16.msra.mxu1 %v315_v36  ;;  %v118_v8 = vmax.f32 %v88_v61, 0.0  ;;  %v128_v9 = vpack.c.bf16 %v122_v63, %v121_v62  ;;  %v127_v10 = vpack.c.bf16 %v120_v1, %v119_v0  ;;  %v67_v11 = vpack.c.bf16 %v57_v2, %v57_v2 }
  0x14   :  { %v68_v12 = vpack.c.bf16 %v58_v3, %v58_v3  ;;  %v125_v13 = vpack.c.bf16 %v116_v6, %v115_v5 }
  0x15   :  { %v126_v14 = vpack.c.bf16 %v118_v8, %v117_v7  ;;  %v82_v15 = vunpack.c.l.bf16 %v67_v11 }
  0x16   :  { %390 = vmatpush.bf16.msra.mxu3 %v314_v47  ;;  %389 = vmatpush.bf16.msra.mxu2 %v314_v47  ;;  %v83_v16 = vunpack.c.l.bf16 %v68_v12 }
  0x17   :  { %199 = vmatpush.bf16.msra.mxu0 %v314_v47  ;;  %388 = vmatpush.bf16.msra.mxu1 %v314_v47  ;;  %v93_v17 = vadd.f32 %v84_v42, %v82_v15 }
  0x18   :  { %v94_v18 = vadd.f32 %v84_v42, %v83_v16 }
  0x19   :  { %v123_v19 = vmax.f32 %v93_v17, 0.0 }
  0x1a   :  { %393 = vmatpush.bf16.msra.mxu3 %v313_v58  ;;  %392 = vmatpush.bf16.msra.mxu2 %v313_v58  ;;  %v124_v20 = vmax.f32 %v94_v18, 0.0 }
  0x1b   :  { %200 = vmatpush.bf16.msra.mxu0 %v313_v58  ;;  %391 = vmatpush.bf16.msra.mxu1 %v313_v58 }
  0x1c   :  { %v129_v21 = vpack.c.bf16 %v124_v20, %v123_v19 }
  0x1e   :  { %396 = vmatpush.bf16.msra.mxu3 %v312_v4  ;;  %395 = vmatpush.bf16.msra.mxu2 %v312_v4 }
  0x1f   :  { %201 = vmatpush.bf16.msra.mxu0 %v312_v4  ;;  %394 = vmatpush.bf16.msra.mxu1 %v312_v4 }
  0x21   :  { %217 = vmatmul.bf16.vlgmr.msra.gmra.mxu3 %v128_v9  ;;  %212 = vmatmul.bf16.vlgmr.msra.gmra.mxu2 %v127_v10 }
  0x22   :  { %202 = vmatmul.bf16.vlgmr.msra.gmra.mxu0 %v125_v13  ;;  %207 = vmatmul.bf16.vlgmr.msra.gmra.mxu1 %v126_v14 }
  0x31   :  { %222 = vmatmul.bf16.gmra.mxu3 %v129_v21 }
  0x9f   :  { %v203_v22 = vpop.f32.mrf.mxu0  ;;  %v208_v23 = vpop.f32.mrf.mxu1 }
  0xa0   :  { %v232_v26 = vmul.f32 %v397_v24, %v203_v22  ;;  %v234_v27 = vmul.f32 %v397_v24, %v208_v23 }
  0xa2   :  { %v246_v32 = vadd.f32 %v398_v29, %v232_v26  ;;  %v248_v33 = vadd.f32 %v398_v29, %v234_v27 }
  0xa4   :  { %v218_v25 = vpop.f32.mrf.mxu3  ;;  %v213_v28 = vpop.f32.mrf.mxu2 }
  0xa5   :  { %v236_v36 = vmul.f32 %v397_v24, %v213_v28  ;;  %v238_v39 = vmul.f32 %v397_v24, %v218_v25 }
  0xa7   :  { %v205_v30 = vpop.f32.mrf.mxu0  ;;  %v210_v31 = vpop.f32.mrf.mxu1  ;;  %v250_v44 = vadd.f32 %v398_v29, %v236_v36  ;;  %v252_v47 = vadd.f32 %v398_v29, %v238_v39 }
  0xa8   :  { %v233_v34 = vmul.f32 %v397_v24, %v205_v30  ;;  %v235_v35 = vmul.f32 %v397_v24, %v210_v31 }
  0xaa   :  { %v247_v37 = vadd.f32 %v398_v29, %v233_v34  ;;  %v249_v38 = vadd.f32 %v398_v29, %v235_v35 }
  0xac   :  { %v220_v40 = vpop.f32.mrf.mxu3  ;;  %v343_v41 = vpack.c.bf16 %v247_v37, %v246_v32  ;;  %v348_v42 = vpack.c.bf16 %v249_v38, %v248_v33  ;;  %v215_v43 = vpop.f32.mrf.mxu2 }
  0xad   :  { %v239_v45 = vmul.f32 %v397_v24, %v220_v40  ;;  %v237_v46 = vmul.f32 %v397_v24, %v215_v43 }
  0xae   :  { %344 = vst [vmem:[%s518_s6] sm:$0xff] %v343_v41  }
  0xaf   :  { %v253_v48 = vadd.f32 %v398_v29, %v239_v45  ;;  %369 = vst [vmem:[%s518_s6 + $0x8] sm:$0xff] %v348_v42   ;;  %v251_v49 = vadd.f32 %v398_v29, %v237_v46 }
  0xb1   :  { %v358_v50 = vpack.c.bf16 %v253_v48, %v252_v47  ;;  %v353_v51 = vpack.c.bf16 %v251_v49, %v250_v44 }
  0xb3   :  { %371 = vst [vmem:[%s518_s6 + $0x18] sm:$0xff] %v358_v50  }
  0xb4   :  { %370 = vst [vmem:[%s518_s6 + $0x10] sm:$0xff] %v353_v51   ;;  %v223_v52 = vpop.f32.mrf.mxu3 }
  0xb5   :  { %v240_v53 = vmul.f32 %v397_v24, %v223_v52 }
  0xb7   :  { %v254_v56 = vadd.f32 %v398_v29, %v240_v53 }
  0xbc   :  { %v225_v54 = vpop.f32.mrf.mxu3 }
  0xbd   :  { %v241_v55 = vmul.f32 %v397_v24, %v225_v54 }
  0xbf   :  { %v255_v57 = vadd.f32 %v398_v29, %v241_v55 }
  0xc1   :  { %v363_v58 = vpack.c.bf16 %v255_v57, %v254_v56 }
  0xc3   :  { %372 = vst [vmem:[%s518_s6 + $0x20] sm:$0xff] %v363_v58  }

// kernel: _lambda_.18
= control target key start
LH: loop header
LB: loop body
LE: loop exit
PB: predicated region body
PF: predicated region fallthrough
CT: control target
= control target key end

     0   :  { %s337_s1 = inlined_call_operand.vmem [shape: bf16[128,128], index: 1, kind: input, shape index: {}]   ;;  %s338_s0 = inlined_call_operand.vmem [shape: bf16[32,128], index: 0, kind: input, shape index: {}]   ;;  %s339_s2 = inlined_call_operand.vmem [shape: bf16[1,128], index: 2, kind: input, shape index: {}]   ;;  %s340_s3 = inlined_call_operand.vmem [shape: bf16[1,128], index: 3, kind: input, shape index: {}]   ;;  %s341_s4 = inlined_call_operand.vmem [shape: f32[1,128], index: 4, kind: input, shape index: {}]   ;;  %s342_s5 = inlined_call_operand.vmem [shape: f32[1,128], index: 5, kind: input, shape index: {}]   ;;  %s343_s6 = inlined_call_operand.vmem [shape: bf16[32,128], index: 6, kind: output, shape index: {}]  }
   0x1   :  { %v223_v0 = vld [vmem:[%s337_s1 + $0x38] sm:$0xff]  ;;  %v222_v1 = vld [vmem:[%s337_s1 + $0x30] sm:$0xff]  ;;  %v225_v2 = vld [vmem:[%s338_s0] sm:$0xff]  }
   0x2   :  { %137 = vmatpush.bf16.msra.mxu0 %v223_v0  ;;  %244 = vmatpush.bf16.msra.mxu1 %v223_v0  ;;  %v27_v3 = vld [vmem:[%s339_s2] sm:$0x1]  ;;  %v242_v4 = vld [vmem:[%s338_s0 + $0x8] sm:$0xff]   ;;  %v226_v8 = vunpack.c.l.bf16 %v225_v2  ;;  %v227_v9 = vunpack.c.h.bf16 %v225_v2  ;;  %v219_v25 = vld [vmem:[%s337_s1 + $0x18] sm:$0xff] }
   0x3   :  { %v29_v5 = vpack.i.b16 %v27_v3, %v27_v3  ;;  %v45_v6 = vld [vmem:[%s340_s3] sm:$0x1]  ;;  %v221_v7 = vld [vmem:[%s337_s1 + $0x28] sm:$0xff]  ;;  %v230_v11 = vunpack.c.l.bf16 %v242_v4  ;;  %v231_v12 = vunpack.c.h.bf16 %v242_v4  ;;  %v218_v31 = vld [vmem:[%s337_s1 + $0x10] sm:$0xff] }
   0x4   :  { %v47_v14 = vpack.i.b16 %v45_v6, %v45_v6  ;;  %v220_v15 = vld [vmem:[%s337_s1 + $0x20] sm:$0xff]  ;;  %v217_v36 = vld [vmem:[%s337_s1 + $0x8] sm:$0xff] }
   0x5   :  { %v31_v10 = vperm.slane %v29_v5, 0  ;;  %v216_v41 = vld [vmem:[%s337_s1] sm:$0xff] }
   0x6   :  { %138 = vmatpush.bf16.msra.mxu0 %v222_v1  ;;  %245 = vmatpush.bf16.msra.mxu1 %v222_v1  ;;  %v49_v20 = vperm.slane %v47_v14, 0  ;;  %v252_v46 = vld [vmem:[%s341_s4] ss:$0 sm:$0xff] }
   0x7   :  { %v36_v13 = vunpack.c.l.bf16 %v31_v10  ;;  %v253_v48 = vld [vmem:[%s342_s5] ss:$0 sm:$0xff] }
   0x8   :  { %v54_v26 = vunpack.c.l.bf16 %v49_v20 }
   0x9   :  { %v37_v16 = vmul.f32 %v226_v8, %v36_v13  ;;  %v38_v17 = vmul.f32 %v227_v9, %v36_v13  ;;  %v39_v18 = vmul.f32 %v230_v11, %v36_v13  ;;  %v40_v19 = vmul.f32 %v231_v12, %v36_v13 }
   0xa   :  { %139 = vmatpush.bf16.msra.mxu0 %v221_v7  ;;  %246 = vmatpush.bf16.msra.mxu1 %v221_v7 }
   0xb   :  { %v41_v21 = vpack.c.bf16 %v37_v16, %v37_v16  ;;  %v42_v22 = vpack.c.bf16 %v38_v17, %v38_v17  ;;  %v43_v23 = vpack.c.bf16 %v39_v18, %v39_v18  ;;  %v44_v24 = vpack.c.bf16 %v40_v19, %v40_v19 }
   0xd   :  { %v50_v27 = vunpack.c.l.bf16 %v41_v21  ;;  %v51_v28 = vunpack.c.l.bf16 %v42_v22  ;;  %v52_v29 = vunpack.c.l.bf16 %v43_v23  ;;  %v53_v30 = vunpack.c.l.bf16 %v44_v24 }
   0xe   :  { %140 = vmatpush.bf16.msra.mxu0 %v220_v15  ;;  %247 = vmatpush.bf16.msra.mxu1 %v220_v15 }
   0xf   :  { %v55_v32 = vadd.f32 %v54_v26, %v50_v27  ;;  %v56_v33 = vadd.f32 %v54_v26, %v51_v28  ;;  %v57_v34 = vadd.f32 %v54_v26, %v52_v29  ;;  %v58_v35 = vadd.f32 %v54_v26, %v53_v30 }
  0x11   :  { %v67_v37 = vmax.f32 %v55_v32, 0.0  ;;  %v68_v38 = vmax.f32 %v56_v33, 0.0  ;;  %v69_v39 = vmax.f32 %v57_v34, 0.0  ;;  %v70_v40 = vmax.f32 %v58_v35, 0.0 }
  0x12   :  { %141 = vmatpush.bf16.msra.mxu0 %v219_v25  ;;  %248 = vmatpush.bf16.msra.mxu1 %v219_v25 }
  0x13   :  { %v71_v42 = vpack.c.bf16 %v68_v38, %v67_v37  ;;  %v72_v43 = vpack.c.bf16 %v70_v40, %v69_v39 }
  0x16   :  { %142 = vmatpush.bf16.msra.mxu0 %v218_v31  ;;  %249 = vmatpush.bf16.msra.mxu1 %v218_v31 }
  0x1a   :  { %143 = vmatpush.bf16.msra.mxu0 %v217_v36  ;;  %250 = vmatpush.bf16.msra.mxu1 %v217_v36 }
  0x1e   :  { %144 = vmatpush.bf16.msra.mxu0 %v216_v41  ;;  %251 = vmatpush.bf16.msra.mxu1 %v216_v41 }
  0x21   :  { %145 = vmatmul.bf16.vlgmr.msra.gmra.mxu0 %v71_v42  ;;  %150 = vmatmul.bf16.vlgmr.msra.gmra.mxu1 %v72_v43 }
  0x9e   :  { %v146_v44 = vpop.f32.mrf.mxu0  ;;  %v151_v45 = vpop.f32.mrf.mxu1 }
  0x9f   :  { %v160_v47 = vmul.f32 %v252_v46, %v146_v44  ;;  %v162_v49 = vmul.f32 %v252_v46, %v151_v45 }
  0xa1   :  { %v168_v54 = vadd.f32 %v253_v48, %v160_v47  ;;  %v170_v55 = vadd.f32 %v253_v48, %v162_v49 }
  0xa6   :  { %v148_v50 = vpop.f32.mrf.mxu0  ;;  %v153_v51 = vpop.f32.mrf.mxu1 }
  0xa7   :  { %v161_v52 = vmul.f32 %v252_v46, %v148_v50  ;;  %v163_v53 = vmul.f32 %v252_v46, %v153_v51 }
  0xa9   :  { %v169_v56 = vadd.f32 %v253_v48, %v161_v52  ;;  %v171_v57 = vadd.f32 %v253_v48, %v163_v53 }
  0xab   :  { %v235_v58 = vpack.c.bf16 %v169_v56, %v168_v54  ;;  %v240_v59 = vpack.c.bf16 %v171_v57, %v170_v55 }
  0xad   :  { %236 = vst [vmem:[%s343_s6] sm:$0xff] %v235_v58  }
  0xae   :  { %243 = vst [vmem:[%s343_s6 + $0x8] sm:$0xff] %v240_v59  }

// kernel: _lambda_.20
= control target key start
LH: loop header
LB: loop body
LE: loop exit
PB: predicated region body
PF: predicated region fallthrough
CT: control target
= control target key end

     0   :  { %s823_s1 = inlined_call_operand.vmem [shape: bf16[512,128], index: 1, kind: input, shape index: {}]   ;;  %s824_s0 = inlined_call_operand.vmem [shape: bf16[32,512], index: 0, kind: input, shape index: {}]   ;;  %s825_s2 = inlined_call_operand.vmem [shape: f32[1,128], index: 2, kind: input, shape index: {}]   ;;  %s826_s3 = inlined_call_operand.vmem [shape: f32[1,128], index: 3, kind: input, shape index: {}]   ;;  %s827_s4 = inlined_call_operand.vmem [shape: bf16[32,128], index: 4, kind: output, shape index: {}]  }
   0x1   :  { %v604_v0 = vld [vmem:[%s823_s1 + $0x38] sm:$0xff]  ;;  %v603_v4 = vld [vmem:[%s823_s1 + $0x30] sm:$0xff]  ;;  %v602_v8 = vld [vmem:[%s823_s1 + $0x28] sm:$0xff] }
   0x2   :  { %v612_v1 = vld [vmem:[%s823_s1 + $0x78] sm:$0xff]  ;;  %321 = vmatpush.bf16.msra.mxu0 %v604_v0  ;;  %v611_v5 = vld [vmem:[%s823_s1 + $0x70] sm:$0xff]  ;;  %v610_v9 = vld [vmem:[%s823_s1 + $0x68] sm:$0xff] }
   0x3   :  { %v620_v2 = vld [vmem:[%s823_s1 + $0xb8] sm:$0xff]  ;;  %340 = vmatpush.bf16.msra.mxu1 %v612_v1  ;;  %v619_v6 = vld [vmem:[%s823_s1 + $0xb0] sm:$0xff]  ;;  %v618_v10 = vld [vmem:[%s823_s1 + $0xa8] sm:$0xff] }
   0x4   :  { %v628_v3 = vld [vmem:[%s823_s1 + $0xf8] sm:$0xff]  ;;  %359 = vmatpush.bf16.msra.mxu2 %v620_v2  ;;  %v627_v7 = vld [vmem:[%s823_s1 + $0xf0] sm:$0xff]  ;;  %v626_v11 = vld [vmem:[%s823_s1 + $0xe8] sm:$0xff] }
   0x5   :  { %378 = vmatpush.bf16.msra.mxu3 %v628_v3  ;;  %v601_v12 = vld [vmem:[%s823_s1 + $0x20] sm:$0xff]  ;;  %v600_v16 = vld [vmem:[%s823_s1 + $0x18] sm:$0xff]  ;;  %v599_v20 = vld [vmem:[%s823_s1 + $0x10] sm:$0xff] }
   0x6   :  { %322 = vmatpush.bf16.msra.mxu0 %v603_v4  ;;  %v609_v13 = vld [vmem:[%s823_s1 + $0x60] sm:$0xff]  ;;  %v608_v17 = vld [vmem:[%s823_s1 + $0x58] sm:$0xff]  ;;  %v607_v21 = vld [vmem:[%s823_s1 + $0x50] sm:$0xff] }
   0x7   :  { %341 = vmatpush.bf16.msra.mxu1 %v611_v5  ;;  %v617_v14 = vld [vmem:[%s823_s1 + $0xa0] sm:$0xff]  ;;  %v616_v18 = vld [vmem:[%s823_s1 + $0x98] sm:$0xff]  ;;  %v615_v22 = vld [vmem:[%s823_s1 + $0x90] sm:$0xff] }
   0x8   :  { %360 = vmatpush.bf16.msra.mxu2 %v619_v6  ;;  %v625_v15 = vld [vmem:[%s823_s1 + $0xe0] sm:$0xff]  ;;  %v624_v19 = vld [vmem:[%s823_s1 + $0xd8] sm:$0xff]  ;;  %v623_v23 = vld [vmem:[%s823_s1 + $0xd0] sm:$0xff] }
   0x9   :  { %379 = vmatpush.bf16.msra.mxu3 %v627_v7  ;;  %v598_v24 = vld [vmem:[%s823_s1 + $0x8] sm:$0xff]  ;;  %v597_v28 = vld [vmem:[%s823_s1] sm:$0xff]  ;;  %v591_v33 = vld [vmem:[%s824_s0 + $0xc] sm:$0xf0] }
   0xa   :  { %323 = vmatpush.bf16.msra.mxu0 %v602_v8  ;;  %v606_v25 = vld [vmem:[%s823_s1 + $0x48] sm:$0xff]  ;;  %v605_v29 = vld [vmem:[%s823_s1 + $0x40] sm:$0xff]  ;;  %v433_v35 = vld [vmem:[%s824_s0 + $0x10] sm:$0xf0] }
   0xb   :  { %342 = vmatpush.bf16.msra.mxu1 %v610_v9  ;;  %v614_v26 = vld [vmem:[%s823_s1 + $0x88] sm:$0xff]  ;;  %v613_v30 = vld [vmem:[%s823_s1 + $0x80] sm:$0xff]  ;;  %v592_v37 = vld [vmem:[%s824_s0 + $0x14] sm:$0xf0] }
   0xc   :  { %361 = vmatpush.bf16.msra.mxu2 %v618_v10  ;;  %v622_v27 = vld [vmem:[%s823_s1 + $0xc8] sm:$0xff]  ;;  %v621_v31 = vld [vmem:[%s823_s1 + $0xc0] sm:$0xff]  ;;  %v441_v39 = vld [vmem:[%s824_s0 + $0x18] sm:$0xf0] }
   0xd   :  { %380 = vmatpush.bf16.msra.mxu3 %v626_v11  ;;  %v431_v32 = vld [vmem:[%s824_s0] sm:$0xf]  ;;  %v589_v34 = vld [vmem:[%s824_s0 + $0x4] sm:$0xf]  ;;  %v439_v36 = vld [vmem:[%s824_s0 + $0x8] sm:$0xf] }
   0xe   :  { %324 = vmatpush.bf16.msra.mxu0 %v601_v12  ;;  %v590_v38 = vld [vmem:[%s824_s0 + $0xc] sm:$0xf]  ;;  %v432_v40 = vor.u32 %v591_v33, %v431_v32  ;;  %v436_v41 = vor.u32 %v589_v34, %v433_v35  ;;  %v440_v42 = vor.u32 %v592_v37, %v439_v36  ;;  %v447_v44 = vld [vmem:[%s824_s0 + $0x20] sm:$0xf]  ;;  %v595_v45 = vld [vmem:[%s824_s0 + $0x2c] sm:$0xf0] }
   0xf   :  { %343 = vmatpush.bf16.msra.mxu1 %v609_v13  ;;  %v444_v43 = vor.u32 %v590_v38, %v441_v39  ;;  %v593_v46 = vld [vmem:[%s824_s0 + $0x24] sm:$0xf]  ;;  %v449_v47 = vld [vmem:[%s824_s0 + $0x30] sm:$0xf0]  ;;  %v455_v48 = vld [vmem:[%s824_s0 + $0x28] sm:$0xf]  ;;  %v448_v52 = vor.u32 %v595_v45, %v447_v44 }
  0x10   :  { %362 = vmatpush.bf16.msra.mxu2 %v617_v14  ;;  %v596_v49 = vld [vmem:[%s824_s0 + $0x34] sm:$0xf0]  ;;  %v594_v50 = vld [vmem:[%s824_s0 + $0x2c] sm:$0xf]  ;;  %v457_v51 = vld [vmem:[%s824_s0 + $0x38] sm:$0xf0]  ;;  %v452_v53 = vor.u32 %v593_v46, %v449_v47 }
  0x11   :  { %381 = vmatpush.bf16.msra.mxu3 %v625_v15  ;;  %v456_v54 = vor.u32 %v596_v49, %v455_v48  ;;  %v460_v55 = vor.u32 %v594_v50, %v457_v51  ;;  %v640_v1 = vld [vmem:[%s825_s2] ss:$0 sm:$0xff] }
  0x12   :  { %325 = vmatpush.bf16.msra.mxu0 %v600_v16  ;;  %v641_v6 = vld [vmem:[%s826_s3] ss:$0 sm:$0xff] }
  0x13   :  { %344 = vmatpush.bf16.msra.mxu1 %v608_v17 }
  0x14   :  { %363 = vmatpush.bf16.msra.mxu2 %v616_v18 }
  0x15   :  { %382 = vmatpush.bf16.msra.mxu3 %v624_v19 }
  0x16   :  { %326 = vmatpush.bf16.msra.mxu0 %v599_v20 }
  0x17   :  { %345 = vmatpush.bf16.msra.mxu1 %v607_v21 }
  0x18   :  { %364 = vmatpush.bf16.msra.mxu2 %v615_v22 }
  0x19   :  { %383 = vmatpush.bf16.msra.mxu3 %v623_v23 }
  0x1a   :  { %327 = vmatpush.bf16.msra.mxu0 %v598_v24 }
  0x1b   :  { %346 = vmatpush.bf16.msra.mxu1 %v606_v25 }
  0x1c   :  { %365 = vmatpush.bf16.msra.mxu2 %v614_v26 }
  0x1d   :  { %384 = vmatpush.bf16.msra.mxu3 %v622_v27 }
  0x1e   :  { %328 = vmatpush.bf16.msra.mxu0 %v597_v28 }
  0x1f   :  { %347 = vmatpush.bf16.msra.mxu1 %v605_v29 }
  0x20   :  { %366 = vmatpush.bf16.msra.mxu2 %v613_v30 }
  0x21   :  { %385 = vmatpush.bf16.msra.mxu3 %v621_v31  ;;  %329 = vmatmul.bf16.vlgmr.msra.gmra.mxu0 %v432_v40 }
  0x22   :  { %348 = vmatmul.bf16.vlgmr.msra.gmra.mxu1 %v436_v41 }
  0x23   :  { %367 = vmatmul.bf16.vlgmr.msra.gmra.mxu2 %v440_v42 }
  0x24   :  { %386 = vmatmul.bf16.vlgmr.msra.gmra.mxu3 %v444_v43 }
  0x31   :  { %334 = vmatmul.bf16.gmra.mxu0 %v448_v52 }
  0x32   :  { %353 = vmatmul.bf16.gmra.mxu1 %v452_v53 }
  0x33   :  { %372 = vmatmul.bf16.gmra.mxu2 %v456_v54 }
  0x34   :  { %391 = vmatmul.bf16.gmra.mxu3 %v460_v55 }
  0x9e   :  { %v330_v56 = vpop.f32.mrf.mxu0 }
  0x9f   :  { %v349_v57 = vpop.f32.mrf.mxu1 }
  0xa0   :  { %v350_v58 = vadd.f32 %v349_v57, %v330_v56 }
  0xa6   :  { %v368_v59 = vpop.f32.mrf.mxu2  ;;  %v332_v62 = vpop.f32.mrf.mxu0 }
  0xa7   :  { %v387_v60 = vpop.f32.mrf.mxu3  ;;  %v369_v61 = vadd.f32 %v368_v59, %v350_v58  ;;  %v351_v63 = vpop.f32.mrf.mxu1 }
  0xa8   :  { %v352_v2 = vadd.f32 %v351_v63, %v332_v62 }
  0xa9   :  { %v388_v0 = vadd.f32 %v387_v60, %v369_v61 }
  0xab   :  { %v401_v5 = vmul.f32 %v640_v1, %v388_v0 }
  0xad   :  { %v409_v11 = vadd.f32 %v641_v6, %v401_v5 }
  0xae   :  { %v370_v3 = vpop.f32.mrf.mxu2  ;;  %v335_v8 = vpop.f32.mrf.mxu0 }
  0xaf   :  { %v389_v4 = vpop.f32.mrf.mxu3  ;;  %v371_v7 = vadd.f32 %v370_v3, %v352_v2  ;;  %v354_v9 = vpop.f32.mrf.mxu1  ;;  %v413_v17 = vmax.f32 %v409_v11, 0.0 }
  0xb0   :  { %v355_v13 = vadd.f32 %v354_v9, %v335_v8 }
  0xb1   :  { %v390_v10 = vadd.f32 %v389_v4, %v371_v7 }
  0xb3   :  { %v402_v12 = vmul.f32 %v640_v1, %v390_v10 }
  0xb5   :  { %v410_v14 = vadd.f32 %v641_v6, %v402_v12 }
  0xb6   :  { %v373_v15 = vpop.f32.mrf.mxu2  ;;  %v337_v21 = vpop.f32.mrf.mxu0 }
  0xb7   :  { %v392_v16 = vpop.f32.mrf.mxu3  ;;  %v414_v18 = vmax.f32 %v410_v14, 0.0  ;;  %v374_v19 = vadd.f32 %v373_v15, %v355_v13  ;;  %v356_v22 = vpop.f32.mrf.mxu1 }
  0xb8   :  { %v357_v24 = vadd.f32 %v356_v22, %v337_v21 }
  0xb9   :  { %v632_v20 = vpack.c.bf16 %v414_v18, %v413_v17  ;;  %v393_v23 = vadd.f32 %v392_v16, %v374_v19 }
  0xbb   :  { %633 = vst [vmem:[%s827_s4] sm:$0xff] %v632_v20   ;;  %v403_v26 = vmul.f32 %v640_v1, %v393_v23 }
  0xbd   :  { %v411_v30 = vadd.f32 %v641_v6, %v403_v26 }
  0xbe   :  { %v375_v25 = vpop.f32.mrf.mxu2 }
  0xbf   :  { %v376_v27 = vadd.f32 %v375_v25, %v357_v24  ;;  %v394_v28 = vpop.f32.mrf.mxu3  ;;  %v415_v33 = vmax.f32 %v411_v30, 0.0 }
  0xc1   :  { %v395_v29 = vadd.f32 %v394_v28, %v376_v27 }
  0xc3   :  { %v404_v31 = vmul.f32 %v640_v1, %v395_v29 }
  0xc5   :  { %v412_v32 = vadd.f32 %v641_v6, %v404_v31 }
  0xc7   :  { %v416_v34 = vmax.f32 %v412_v32, 0.0 }
  0xc9   :  { %v637_v35 = vpack.c.bf16 %v416_v34, %v415_v33 }
  0xcb   :  { %639 = vst [vmem:[%s827_s4 + $0x8] sm:$0xff] %v637_v35  }

// kernel: _lambda_.26
= control target key start
LH: loop header
LB: loop body
LE: loop exit
PB: predicated region body
PF: predicated region fallthrough
CT: control target
= control target key end

     0   :  { %s1376_s21 = smov 0   ;;  %s1378_s22 = smov 0   ;;  %s1631_s0 = inlined_call_operand.vmem [shape: bf16[384,256], index: 0, kind: input, shape index: {}]   ;;  %s1632_s1 = inlined_call_operand.vmem [shape: bf16[256,128], index: 1, kind: input, shape index: {}]   ;;  %s1633_s2 = inlined_call_operand.vmem [shape: bf16[1,256], index: 2, kind: input, shape index: {}]   ;;  %s1634_s3 = inlined_call_operand.vmem [shape: bf16[1,256], index: 3, kind: input, shape index: {}]   ;;  %s1635_s4 = inlined_call_operand.vmem [shape: f32[1,128], index: 4, kind: input, shape index: {}]   ;;  %s1636_s5 = inlined_call_operand.vmem [shape: f32[1,128], index: 5, kind: input, shape index: {}]   ;;  %s1637_s6 = inlined_call_operand.vmem [shape: bf16[384,128], index: 6, kind: output, shape index: {}]  }
   0x1   :  { %s1380_s23 = smov 0  }
   0x2 LB: > { %s35_s24 = sadd.s32 1, %s1335_s22  ;;  %p1139_p0 = scmp.ge.s32.totalorder %s1339_s23, 1  ;;  %s1339_s23 = sphi %s1380_s23, %s16_s23   ;;  %s1335_s22 = sphi %s1378_s22, %s1639_s22   ;;  %s1331_s21 = sphi %s1376_s21, %s1638_s21  }
   0x3   : > { %p37_p1 = scmp.ge.s32.totalorder %s35_s24, 3  ;;  %p294_p2 = scmp.lt.s32.totalorder %s1339_s23, 4 }
   0x5   : > { %s1641_s24 = smov (%p37_p1, %s35_s24), 0  ;;  %p295_p3 = pnand %p1139_p0, %p294_p2 }
   0x6   : > { %s1140_s29 = sshll.u32 (!%p295_p3), %s1331_s21, 4 }
   0x7   : > { %298 = sbr.rel (%p295_p3) target bundleno = 242 (0xf2), region = 44  ;;  %p356_p4 = scmp.lt.s32.totalorder (!%p295_p3), %s1140_s29, 47 }
   0xc   : > { %v1219_v0 = vld [vmem:[%s1632_s1 + $0x38] sm:$0xff]  ;;  %v1218_v2 = vld [vmem:[%s1632_s1 + $0x30] sm:$0xff]  ;;  %s1643_s29 = smov (!%p356_p4, %s1140_s29), 47  ;;  %v1217_v4 = vld [vmem:[%s1632_s1 + $0x28] sm:$0xff] }
   0xd   : > { %v1227_v1 = vld [vmem:[%s1632_s1 + $0x78] sm:$0xff]  ;;  %810 = vmatpush.bf16.msra.mxu0 %v1219_v0  ;;  %1275 = vmatpush.bf16.msra.mxu2 %v1219_v0  ;;  %v1226_v3 = vld [vmem:[%s1632_s1 + $0x70] sm:$0xff]  ;;  %s1211_s12 = sshll.u32 %s1643_s29, 3  ;;  %v416_v5 = vld [vmem:[%s1633_s2] sm:$0x3]  ;;  %s1144_s30 = sshll.u32 %s1643_s29, 2 }
   0xe   : > { %859 = vmatpush.bf16.msra.mxu1 %v1227_v1  ;;  %1283 = vmatpush.bf16.msra.mxu3 %v1227_v1  ;;  %418 = vst [vmem:[#allocation1] ss:$9 sm:$0xff] %v416_v5  ;;  %v1225_v6 = vld [vmem:[%s1632_s1 + $0x68] sm:$0xff]  ;;  %s1421_s19 = scalar_lea.vmem %s1631_s0, %s1211_s12  ;;  %v1216_v7 = vld [vmem:[%s1632_s1 + $0x20] sm:$0xff]  ;;  %v1215_v14 = vld [vmem:[%s1632_s1 + $0x18] sm:$0xff]  ;;  %s1584_s9 = scalar_lea.vmem %s1637_s6, %s1144_s30 }
   0xf   : > { %v1224_v8 = vld [vmem:[%s1632_s1 + $0x60] sm:$0xff]  ;;  %v401_v11 = vld [vmem:[%s1421_s19 + $0x8] sm:$0xff]  ;;  %v1223_v19 = vld [vmem:[%s1632_s1 + $0x58] sm:$0xff] }
  0x10   : > { %v509_v9 = vld [vmem:[%s1634_s3] sm:$0x3]  ;;  %v409_v18 = vld [vmem:[%s1421_s19 + $0x48] sm:$0xff]  ;;  %v1443_v22 = vld [vmem:[%s1421_s19 + $0x10] sm:$0xff]  ;;  %v429_v25 = vunpack.c.l.bf16 %v401_v11  ;;  %v430_v26 = vunpack.c.h.bf16 %v401_v11 }
  0x11   : > { %811 = vmatpush.bf16.msra.mxu0 %v1218_v2  ;;  %1276 = vmatpush.bf16.msra.mxu2 %v1218_v2  ;;  %v400_v10 = vld [vmem:[%s1421_s19] sm:$0xff]  ;;  %v1446_v27 = vld [vmem:[%s1421_s19 + $0x18] sm:$0xff]  ;;  %v1449_v28 = vld [vmem:[%s1421_s19 + $0x50] sm:$0xff]  ;;  %v445_v31 = vunpack.c.l.bf16 %v409_v18  ;;  %v446_v32 = vunpack.c.h.bf16 %v409_v18  ;;  %v431_v36 = vunpack.c.l.bf16 %v1443_v22  ;;  %v432_v37 = vunpack.c.h.bf16 %v1443_v22 }
  0x12   : > { %860 = vmatpush.bf16.msra.mxu1 %v1226_v3  ;;  %1284 = vmatpush.bf16.msra.mxu3 %v1226_v3  ;;  %v408_v17 = vld [vmem:[%s1421_s19 + $0x40] sm:$0xff]  ;;  %v427_v20 = vunpack.c.l.bf16 %v400_v10  ;;  %v428_v21 = vunpack.c.h.bf16 %v400_v10  ;;  %v1214_v33 = vld [vmem:[%s1632_s1 + $0x10] sm:$0xff]  ;;  %v433_v39 = vunpack.c.l.bf16 %v1446_v27  ;;  %v434_v40 = vunpack.c.h.bf16 %v1446_v27  ;;  %v1466_v41 = vld [vmem:[%s1421_s19 + $0x58] sm:$0xff] }
  0x13   : > { %v443_v29 = vunpack.c.l.bf16 %v408_v17  ;;  %v444_v30 = vunpack.c.h.bf16 %v408_v17  ;;  %v1222_v38 = vld [vmem:[%s1632_s1 + $0x50] sm:$0xff]  ;;  %v447_v42 = vunpack.c.l.bf16 %v1449_v28  ;;  %v448_v43 = vunpack.c.h.bf16 %v1449_v28  ;;  %v1213_v54 = vld [vmem:[%s1632_s1 + $0x8] sm:$0xff] }
  0x14   : > { %v449_v58 = vunpack.c.l.bf16 %v1466_v41  ;;  %v1221_v59 = vld [vmem:[%s1632_s1 + $0x48] sm:$0xff]  ;;  %v450_v63 = vunpack.c.h.bf16 %v1466_v41 }
  0x15   : > { %812 = vmatpush.bf16.msra.mxu0 %v1217_v4  ;;  %1277 = vmatpush.bf16.msra.mxu2 %v1217_v4  ;;  %v419_v12 = vld [vmem:[#allocation1] sm:$0xff]  ;;  %v420_v13 = vld [vmem:[#allocation1 + $0x9] sm:$0xff] }
  0x16   : > { %861 = vmatpush.bf16.msra.mxu1 %v1225_v6  ;;  %1285 = vmatpush.bf16.msra.mxu3 %v1225_v6  ;;  %v421_v15 = vpack.i.b16 %v419_v12, %v419_v12  ;;  %v424_v16 = vpack.i.b16 %v420_v13, %v420_v13  ;;  %511 = vst [vmem:[#allocation1] ss:$9 sm:$0xff] %v509_v9  ;;  %v1220_v13 = vld [vmem:[%s1632_s1 + $0x40] sm:$0xff] }
  0x18   : > { %v423_v23 = vperm.slane %v421_v15, 0  ;;  %v426_v24 = vperm.slane %v424_v16, 0 }
  0x19   : > { %813 = vmatpush.bf16.msra.mxu0 %v1216_v7  ;;  %1278 = vmatpush.bf16.msra.mxu2 %v1216_v7 }
  0x1a   : > { %862 = vmatpush.bf16.msra.mxu1 %v1224_v8  ;;  %1286 = vmatpush.bf16.msra.mxu3 %v1224_v8  ;;  %v1454_v34 = vunpack.c.l.bf16 %v423_v23  ;;  %v1456_v35 = vunpack.c.l.bf16 %v426_v24  ;;  %v1212_v8 = vld [vmem:[%s1632_s1] sm:$0xff] }
  0x1c   : > { %v461_v44 = vmul.f32 %v1454_v34, %v427_v20  ;;  %v462_v45 = vmul.f32 %v1456_v35, %v428_v21  ;;  %v463_v46 = vmul.f32 %v1454_v34, %v429_v25  ;;  %v464_v47 = vmul.f32 %v1456_v35, %v430_v26 }
  0x1d   : > { %814 = vmatpush.bf16.msra.mxu0 %v1215_v14  ;;  %1279 = vmatpush.bf16.msra.mxu2 %v1215_v14  ;;  %v512_v48 = vld [vmem:[#allocation1] sm:$0xff]  ;;  %v477_v49 = vmul.f32 %v1454_v34, %v443_v29  ;;  %v478_v50 = vmul.f32 %v1456_v35, %v444_v30  ;;  %v479_v51 = vmul.f32 %v1454_v34, %v445_v31  ;;  %v513_v53 = vld [vmem:[#allocation1 + $0x9] sm:$0xff] }
  0x1e   : > { %863 = vmatpush.bf16.msra.mxu1 %v1223_v19  ;;  %1287 = vmatpush.bf16.msra.mxu3 %v1223_v19  ;;  %v480_v52 = vmul.f32 %v1456_v35, %v446_v32  ;;  %v493_v55 = vpack.c.bf16 %v462_v45, %v461_v44  ;;  %v494_v56 = vpack.c.bf16 %v464_v47, %v463_v46  ;;  %v404_v44 = vld [vmem:[%s1421_s19 + $0x20] sm:$0xff] }
  0x1f   : > { %v514_v57 = vpack.i.b16 %v512_v48, %v512_v48  ;;  %v501_v60 = vpack.c.bf16 %v478_v50, %v477_v49  ;;  %v517_v62 = vpack.i.b16 %v513_v53, %v513_v53  ;;  %v465_v12 = vmul.f32 %v1454_v34, %v431_v36 }
  0x20   : > { %v502_v61 = vpack.c.bf16 %v480_v52, %v479_v51  ;;  %v520_v1 = vunpack.c.l.bf16 %v493_v55  ;;  %v522_v2 = vunpack.c.l.bf16 %v494_v56  ;;  %v521_v3 = vunpack.c.h.bf16 %v493_v55 }
  0x21   : > { %815 = vmatpush.bf16.msra.mxu0 %v1214_v33  ;;  %1280 = vmatpush.bf16.msra.mxu2 %v1214_v33  ;;  %v516_v0 = vperm.slane %v514_v57, 0  ;;  %v536_v4 = vunpack.c.l.bf16 %v501_v60  ;;  %v519_v6 = vperm.slane %v517_v62, 0  ;;  %v523_v7 = vunpack.c.h.bf16 %v494_v56 }
  0x22   : > { %864 = vmatpush.bf16.msra.mxu1 %v1222_v38  ;;  %1288 = vmatpush.bf16.msra.mxu3 %v1222_v38  ;;  %v538_v5 = vunpack.c.l.bf16 %v502_v61  ;;  %v537_v10 = vunpack.c.h.bf16 %v501_v60  ;;  %v539_v11 = vunpack.c.h.bf16 %v502_v61  ;;  %v466_v15 = vmul.f32 %v1456_v35, %v432_v37 }
  0x23   : > { %v1489_v9 = vunpack.c.l.bf16 %v516_v0  ;;  %v1495_v14 = vunpack.c.l.bf16 %v519_v6  ;;  %v467_v16 = vmul.f32 %v1454_v34, %v433_v39  ;;  %v468_v17 = vmul.f32 %v1456_v35, %v434_v40 }
  0x24   : > { %v495_v39 = vpack.c.bf16 %v466_v15, %v465_v12  ;;  %v481_v47 = vmul.f32 %v1454_v34, %v447_v42  ;;  %v482_v48 = vmul.f32 %v1456_v35, %v448_v43  ;;  %v483_v51 = vmul.f32 %v1454_v34, %v449_v58  ;;  %v405_v42 = vld [vmem:[%s1421_s19 + $0x28] sm:$0xff] }
  0x25   : > { %816 = vmatpush.bf16.msra.mxu0 %v1213_v54  ;;  %1281 = vmatpush.bf16.msra.mxu2 %v1213_v54  ;;  %v554_v18 = vadd.f32 %v1489_v9, %v520_v1  ;;  %v556_v19 = vadd.f32 %v1489_v9, %v522_v2  ;;  %v570_v20 = vadd.f32 %v1489_v9, %v536_v4  ;;  %v435_v56 = vunpack.c.l.bf16 %v404_v44  ;;  %v413_v12 = vld [vmem:[%s1421_s19 + $0x68] sm:$0xff] }
  0x26   : > { %865 = vmatpush.bf16.msra.mxu1 %v1221_v59  ;;  %1289 = vmatpush.bf16.msra.mxu3 %v1221_v59  ;;  %v572_v21 = vadd.f32 %v1489_v9, %v538_v5  ;;  %v555_v22 = vadd.f32 %v1495_v14, %v521_v3  ;;  %v557_v23 = vadd.f32 %v1495_v14, %v523_v7  ;;  %v524_v49 = vunpack.c.l.bf16 %v495_v39 }
  0x27   : > { %v571_v24 = vadd.f32 %v1495_v14, %v537_v10  ;;  %v573_v25 = vadd.f32 %v1495_v14, %v539_v11  ;;  %v634_v26 = vmax.f32 %v554_v18, 0.0  ;;  %v636_v27 = vmax.f32 %v556_v19, 0.0  ;;  %v412_v11 = vld [vmem:[%s1421_s19 + $0x60] sm:$0xff] }
  0x28   : > { %v650_v29 = vmax.f32 %v570_v20, 0.0  ;;  %v652_v30 = vmax.f32 %v572_v21, 0.0  ;;  %v635_v31 = vmax.f32 %v555_v22, 0.0  ;;  %v637_v32 = vmax.f32 %v557_v23, 0.0 }
  0x29   : > { %817 = vmatpush.bf16.msra.mxu0 %v1212_v8  ;;  %1282 = vmatpush.bf16.msra.mxu2 %v1212_v8  ;;  %v651_v33 = vmax.f32 %v571_v24, 0.0  ;;  %v653_v36 = vmax.f32 %v573_v25, 0.0  ;;  %v666_v37 = vpack.c.bf16 %v636_v27, %v634_v26  ;;  %v496_v40 = vpack.c.bf16 %v468_v17, %v467_v16 }
  0x2a   : > { %866 = vmatpush.bf16.msra.mxu1 %v1220_v13  ;;  %1290 = vmatpush.bf16.msra.mxu3 %v1220_v13  ;;  %v674_v38 = vpack.c.bf16 %v652_v30, %v650_v29  ;;  %v667_v45 = vpack.c.bf16 %v637_v32, %v635_v31  ;;  %v484_v52 = vmul.f32 %v1456_v35, %v450_v63  ;;  %v525_v54 = vunpack.c.h.bf16 %v495_v39 }
  0x2b   : > { %v675_v46 = vpack.c.bf16 %v653_v36, %v651_v33  ;;  %v526_v50 = vunpack.c.l.bf16 %v496_v40  ;;  %v503_v53 = vpack.c.bf16 %v482_v48, %v481_v47  ;;  %v527_v55 = vunpack.c.h.bf16 %v496_v40  ;;  %v406_v47 = vld [vmem:[%s1421_s19 + $0x30] sm:$0xff] }
  0x2c   : > { %818 = vmatmul.bf16.vlgmr.msra.gmra.mxu0 %v666_v37  ;;  %838 = vmatmul.bf16.vlgmr.msra.gmra.mxu2 %v674_v38  ;;  %v558_v28 = vadd.f32 %v1489_v9, %v524_v49  ;;  %v504_v57 = vpack.c.bf16 %v484_v52, %v483_v51  ;;  %v436_v59 = vunpack.c.h.bf16 %v404_v44  ;;  %v559_v41 = vadd.f32 %v1495_v14, %v525_v54  ;;  %v407_v52 = vld [vmem:[%s1421_s19 + $0x38] sm:$0xff] }
  0x2d   : > { %867 = vmatmul.bf16.vlgmr.msra.gmra.mxu1 %v667_v45  ;;  %887 = vmatmul.bf16.vlgmr.msra.gmra.mxu3 %v675_v46  ;;  %v560_v43 = vadd.f32 %v1489_v9, %v526_v50  ;;  %v540_v60 = vunpack.c.l.bf16 %v503_v53  ;;  %v561_v58 = vadd.f32 %v1495_v14, %v527_v55  ;;  %v541_v61 = vunpack.c.h.bf16 %v503_v53  ;;  %v414_v55 = vld [vmem:[%s1421_s19 + $0x70] sm:$0xff] }
  0x2e   : > { %v542_v62 = vunpack.c.l.bf16 %v504_v57  ;;  %v543_v63 = vunpack.c.h.bf16 %v504_v57  ;;  %v437_v0 = vunpack.c.l.bf16 %v405_v42  ;;  %v438_v1 = vunpack.c.h.bf16 %v405_v42 }
  0x2f   : > { %v638_v2 = vmax.f32 %v558_v28, 0.0  ;;  %v640_v3 = vmax.f32 %v560_v43, 0.0  ;;  %v574_v4 = vadd.f32 %v1489_v9, %v540_v60  ;;  %v575_v5 = vadd.f32 %v1495_v14, %v541_v61  ;;  %v415_v43 = vld [vmem:[%s1421_s19 + $0x78] sm:$0xff] }
  0x30   : > { %v576_v6 = vadd.f32 %v1489_v9, %v542_v62  ;;  %v639_v7 = vmax.f32 %v559_v41, 0.0  ;;  %v577_v8 = vadd.f32 %v1495_v14, %v543_v63  ;;  %v469_v10 = vmul.f32 %v1454_v34, %v435_v56 }
  0x31   : > { %v654_v13 = vmax.f32 %v574_v4, 0.0  ;;  %v641_v15 = vmax.f32 %v561_v58, 0.0  ;;  %v655_v16 = vmax.f32 %v575_v5, 0.0  ;;  %v470_v17 = vmul.f32 %v1456_v35, %v436_v59 }
  0x32   : > { %v656_v18 = vmax.f32 %v576_v6, 0.0  ;;  %v657_v19 = vmax.f32 %v577_v8, 0.0  ;;  %v471_v20 = vmul.f32 %v1454_v34, %v437_v0  ;;  %v472_v21 = vmul.f32 %v1456_v35, %v438_v1 }
  0x33   : > { %v497_v22 = vpack.c.bf16 %v470_v17, %v469_v10  ;;  %v451_v23 = vunpack.c.l.bf16 %v412_v11  ;;  %v452_v24 = vunpack.c.h.bf16 %v412_v11  ;;  %v453_v25 = vunpack.c.l.bf16 %v413_v12 }
  0x34   : > { %v498_v26 = vpack.c.bf16 %v472_v21, %v471_v20  ;;  %v454_v27 = vunpack.c.h.bf16 %v413_v12  ;;  %v668_v32 = vpack.c.bf16 %v640_v3, %v638_v2  ;;  %v676_v33 = vpack.c.bf16 %v656_v18, %v654_v13 }
  0x35   : > { %v485_v29 = vmul.f32 %v1454_v34, %v451_v23  ;;  %v486_v30 = vmul.f32 %v1456_v35, %v452_v24  ;;  %v487_v31 = vmul.f32 %v1454_v34, %v453_v25  ;;  %v528_v36 = vunpack.c.l.bf16 %v497_v22 }
  0x36   : > { %v488_v37 = vmul.f32 %v1456_v35, %v454_v27  ;;  %v669_v38 = vpack.c.bf16 %v641_v15, %v639_v7  ;;  %v677_v39 = vpack.c.bf16 %v657_v19, %v655_v16  ;;  %v530_v44 = vunpack.c.l.bf16 %v498_v26 }
  0x37   : > { %v505_v40 = vpack.c.bf16 %v486_v30, %v485_v29  ;;  %v562_v48 = vadd.f32 %v1489_v9, %v528_v36  ;;  %v529_v50 = vunpack.c.h.bf16 %v497_v22  ;;  %v531_v51 = vunpack.c.h.bf16 %v498_v26 }
  0x38   : > { %v506_v45 = vpack.c.bf16 %v488_v37, %v487_v31  ;;  %v564_v42 = vadd.f32 %v1489_v9, %v530_v44  ;;  %v439_v28 = vunpack.c.l.bf16 %v406_v47  ;;  %v440_v59 = vunpack.c.h.bf16 %v406_v47 }
  0x39   : > { %v544_v46 = vunpack.c.l.bf16 %v505_v40  ;;  %v545_v53 = vunpack.c.h.bf16 %v505_v40  ;;  %v441_v60 = vunpack.c.l.bf16 %v407_v52  ;;  %v442_v41 = vunpack.c.h.bf16 %v407_v52 }
  0x3a   : > { %v546_v49 = vunpack.c.l.bf16 %v506_v45  ;;  %v547_v54 = vunpack.c.h.bf16 %v506_v45  ;;  %v642_v58 = vmax.f32 %v562_v48, 0.0  ;;  %v563_v61 = vadd.f32 %v1495_v14, %v529_v50 }
  0x3b   : > { %v578_v56 = vadd.f32 %v1489_v9, %v544_v46  ;;  %v565_v62 = vadd.f32 %v1495_v14, %v531_v51  ;;  %v455_v63 = vunpack.c.l.bf16 %v414_v55  ;;  %v579_v0 = vadd.f32 %v1495_v14, %v545_v53 }
  0x3c   : > { %823 = vmatmul.bf16.gmra.mxu0 %v668_v32  ;;  %843 = vmatmul.bf16.gmra.mxu2 %v676_v33  ;;  %v580_v57 = vadd.f32 %v1489_v9, %v546_v49  ;;  %v581_v1 = vadd.f32 %v1495_v14, %v547_v54  ;;  %v456_v2 = vunpack.c.h.bf16 %v414_v55  ;;  %v457_v3 = vunpack.c.l.bf16 %v415_v43 }
  0x3d   : > { %872 = vmatmul.bf16.gmra.mxu1 %v669_v38  ;;  %892 = vmatmul.bf16.gmra.mxu3 %v677_v39  ;;  %v644_v4 = vmax.f32 %v564_v42, 0.0  ;;  %v658_v5 = vmax.f32 %v578_v56, 0.0  ;;  %v473_v6 = vmul.f32 %v1454_v34, %v439_v28  ;;  %v458_v7 = vunpack.c.h.bf16 %v415_v43 }
  0x3e   : > { %v660_v8 = vmax.f32 %v580_v57, 0.0  ;;  %v474_v10 = vmul.f32 %v1456_v35, %v440_v59  ;;  %v475_v11 = vmul.f32 %v1454_v34, %v441_v60  ;;  %v476_v12 = vmul.f32 %v1456_v35, %v442_v41  ;;  %v1569_v41 = vld [vmem:[%s1635_s4] ss:$0 sm:$0xff] }
  0x3f   : > { %v489_v13 = vmul.f32 %v1454_v34, %v455_v63  ;;  %v490_v15 = vmul.f32 %v1456_v35, %v456_v2  ;;  %v491_v16 = vmul.f32 %v1454_v34, %v457_v3  ;;  %v492_v17 = vmul.f32 %v1456_v35, %v458_v7 }
  0x40   : > { %v643_v18 = vmax.f32 %v563_v61, 0.0  ;;  %v645_v19 = vmax.f32 %v565_v62, 0.0  ;;  %v659_v20 = vmax.f32 %v579_v0, 0.0  ;;  %v661_v21 = vmax.f32 %v581_v1, 0.0  ;;  %v1575_v1 = vld [vmem:[%s1636_s5] ss:$0 sm:$0xff] }
  0x41   : > { %v670_v22 = vpack.c.bf16 %v644_v4, %v642_v58  ;;  %v499_v23 = vpack.c.bf16 %v474_v10, %v473_v6  ;;  %v678_v24 = vpack.c.bf16 %v660_v8, %v658_v5  ;;  %v500_v25 = vpack.c.bf16 %v476_v12, %v475_v11 }
  0x42   : > { %v507_v26 = vpack.c.bf16 %v490_v15, %v489_v13  ;;  %v508_v27 = vpack.c.bf16 %v492_v17, %v491_v16  ;;  %v671_v29 = vpack.c.bf16 %v645_v19, %v643_v18  ;;  %v679_v30 = vpack.c.bf16 %v661_v21, %v659_v20 }
  0x43   : > { %v532_v31 = vunpack.c.l.bf16 %v499_v23  ;;  %v534_v32 = vunpack.c.l.bf16 %v500_v25  ;;  %v533_v35 = vunpack.c.h.bf16 %v499_v23  ;;  %v535_v36 = vunpack.c.h.bf16 %v500_v25 }
  0x44   : > { %v548_v33 = vunpack.c.l.bf16 %v507_v26  ;;  %v550_v34 = vunpack.c.l.bf16 %v508_v27  ;;  %v549_v37 = vunpack.c.h.bf16 %v507_v26  ;;  %v551_v38 = vunpack.c.h.bf16 %v508_v27 }
  0x45   : > { %v566_v39 = vadd.f32 %v1489_v9, %v532_v31  ;;  %v568_v40 = vadd.f32 %v1489_v9, %v534_v32  ;;  %v567_v46 = vadd.f32 %v1495_v14, %v533_v35  ;;  %v569_v47 = vadd.f32 %v1495_v14, %v535_v36 }
  0x46   : > { %v582_v44 = vadd.f32 %v1489_v9, %v548_v33  ;;  %v584_v45 = vadd.f32 %v1489_v9, %v550_v34  ;;  %v583_v48 = vadd.f32 %v1495_v14, %v549_v37  ;;  %v585_v49 = vadd.f32 %v1495_v14, %v551_v38 }
  0x47   : > { %v646_v50 = vmax.f32 %v566_v39, 0.0  ;;  %v648_v51 = vmax.f32 %v568_v40, 0.0  ;;  %v647_v54 = vmax.f32 %v567_v46, 0.0  ;;  %v649_v55 = vmax.f32 %v569_v47, 0.0 }
  0x48   : > { %v662_v52 = vmax.f32 %v582_v44, 0.0  ;;  %v664_v53 = vmax.f32 %v584_v45, 0.0  ;;  %v663_v42 = vmax.f32 %v583_v48, 0.0  ;;  %v665_v56 = vmax.f32 %v585_v49, 0.0 }
  0x49   : > { %v672_v28 = vpack.c.bf16 %v648_v51, %v646_v50  ;;  %v673_v57 = vpack.c.bf16 %v649_v55, %v647_v54 }
  0x4a   : > { %v680_v43 = vpack.c.bf16 %v664_v53, %v662_v52  ;;  %v681_v9 = vpack.c.bf16 %v665_v56, %v663_v42 }
  0x4c   : > { %828 = vmatmul.bf16.gmra.mxu0 %v670_v22  ;;  %848 = vmatmul.bf16.gmra.mxu2 %v678_v24 }
  0x4d   : > { %877 = vmatmul.bf16.gmra.mxu1 %v671_v29  ;;  %897 = vmatmul.bf16.gmra.mxu3 %v679_v30 }
  0x5c   : > { %833 = vmatmul.bf16.gmra.mxu0 %v672_v28  ;;  %853 = vmatmul.bf16.gmra.mxu2 %v680_v43 }
  0x5d   : > { %882 = vmatmul.bf16.gmra.mxu1 %v673_v57  ;;  %902 = vmatmul.bf16.gmra.mxu3 %v681_v9 }
  0xa9   : > { %v819_v59 = vpop.f32.mrf.mxu0 }
  0xaa   : > { %v868_v60 = vpop.f32.mrf.mxu1 }
  0xab   : > { %v869_v14 = vadd.f32 %v868_v60, %v819_v59 }
  0xad   : > { %v912_v0 = vmul.f32 %v1569_v41, %v869_v14 }
  0xaf   : > { %v839_v58 = vpop.f32.mrf.mxu2  ;;  %v932_v5 = vadd.f32 %v1575_v1, %v912_v0 }
  0xb0   : > { %v888_v61 = vpop.f32.mrf.mxu3 }
  0xb1   : > { %v821_v62 = vpop.f32.mrf.mxu0  ;;  %v889_v3 = vadd.f32 %v888_v61, %v839_v58 }
  0xb2   : > { %v870_v63 = vpop.f32.mrf.mxu1 }
  0xb3   : > { %v871_v2 = vadd.f32 %v870_v63, %v821_v62  ;;  %v920_v10 = vmul.f32 %v1569_v41, %v889_v3 }
  0xb5   : > { %v913_v4 = vmul.f32 %v1569_v41, %v871_v2  ;;  %v940_v17 = vadd.f32 %v1575_v1, %v920_v10 }
  0xb7   : > { %v933_v6 = vadd.f32 %v1575_v1, %v913_v4  ;;  %v841_v7 = vpop.f32.mrf.mxu2 }
  0xb8   : > { %v890_v8 = vpop.f32.mrf.mxu3 }
  0xb9   : > { %v1231_v11 = vpack.c.bf16 %v933_v6, %v932_v5  ;;  %v891_v12 = vadd.f32 %v890_v8, %v841_v7  ;;  %v824_v13 = vpop.f32.mrf.mxu0 }
  0xba   : > { %v873_v15 = vpop.f32.mrf.mxu1 }
  0xbb   : > { %1232 = vst [vmem:[%s1584_s9] sm:$0xff] %v1231_v11   ;;  %v921_v16 = vmul.f32 %v1569_v41, %v891_v12  ;;  %v874_v20 = vadd.f32 %v873_v15, %v824_v13 }
  0xbd   : > { %v941_v18 = vadd.f32 %v1575_v1, %v921_v16  ;;  %v914_v25 = vmul.f32 %v1569_v41, %v874_v20 }
  0xbf   : > { %v1251_v19 = vpack.c.bf16 %v941_v18, %v940_v17  ;;  %v844_v21 = vpop.f32.mrf.mxu2  ;;  %v934_v30 = vadd.f32 %v1575_v1, %v914_v25 }
  0xc0   : > { %v893_v22 = vpop.f32.mrf.mxu3 }
  0xc1   : > { %1271 = vst [vmem:[%s1584_s9 + $0x20] sm:$0xff] %v1251_v19   ;;  %v826_v23 = vpop.f32.mrf.mxu0  ;;  %v894_v27 = vadd.f32 %v893_v22, %v844_v21 }
  0xc2   : > { %v875_v24 = vpop.f32.mrf.mxu1 }
  0xc3   : > { %v876_v26 = vadd.f32 %v875_v24, %v826_v23  ;;  %v922_v34 = vmul.f32 %v1569_v41, %v894_v27 }
  0xc5   : > { %v915_v29 = vmul.f32 %v1569_v41, %v876_v26  ;;  %v942_v40 = vadd.f32 %v1575_v1, %v922_v34 }
  0xc7   : > { %v935_v31 = vadd.f32 %v1575_v1, %v915_v29  ;;  %v846_v32 = vpop.f32.mrf.mxu2 }
  0xc8   : > { %v895_v33 = vpop.f32.mrf.mxu3 }
  0xc9   : > { %v1236_v35 = vpack.c.bf16 %v935_v31, %v934_v30  ;;  %v896_v36 = vadd.f32 %v895_v33, %v846_v32  ;;  %v829_v37 = vpop.f32.mrf.mxu0 }
  0xca   : > { %v878_v38 = vpop.f32.mrf.mxu1 }
  0xcb   : > { %1268 = vst [vmem:[%s1584_s9 + $0x8] sm:$0xff] %v1236_v35   ;;  %v923_v39 = vmul.f32 %v1569_v41, %v896_v36  ;;  %v879_v46 = vadd.f32 %v878_v38, %v829_v37 }
  0xcd   : > { %v943_v44 = vadd.f32 %v1575_v1, %v923_v39  ;;  %v916_v51 = vmul.f32 %v1569_v41, %v879_v46 }
  0xcf   : > { %v1256_v45 = vpack.c.bf16 %v943_v44, %v942_v40  ;;  %v849_v47 = vpop.f32.mrf.mxu2  ;;  %v936_v55 = vadd.f32 %v1575_v1, %v916_v51 }
  0xd0   : > { %v898_v48 = vpop.f32.mrf.mxu3 }
  0xd1   : > { %1272 = vst [vmem:[%s1584_s9 + $0x28] sm:$0xff] %v1256_v45   ;;  %v831_v49 = vpop.f32.mrf.mxu0  ;;  %v899_v53 = vadd.f32 %v898_v48, %v849_v47 }
  0xd2   : > { %v880_v50 = vpop.f32.mrf.mxu1 }
  0xd3   : > { %v881_v52 = vadd.f32 %v880_v50, %v831_v49  ;;  %v924_v43 = vmul.f32 %v1569_v41, %v899_v53 }
  0xd5   : > { %v917_v54 = vmul.f32 %v1569_v41, %v881_v52  ;;  %v944_v58 = vadd.f32 %v1575_v1, %v924_v43 }
  0xd7   : > { %v937_v42 = vadd.f32 %v1575_v1, %v917_v54  ;;  %v851_v56 = vpop.f32.mrf.mxu2 }
  0xd8   : > { %v900_v28 = vpop.f32.mrf.mxu3 }
  0xd9   : > { %v1241_v57 = vpack.c.bf16 %v937_v42, %v936_v55  ;;  %v901_v9 = vadd.f32 %v900_v28, %v851_v56  ;;  %v834_v59 = vpop.f32.mrf.mxu0 }
  0xda   : > { %v883_v60 = vpop.f32.mrf.mxu1 }
  0xdb   : > { %1269 = vst [vmem:[%s1584_s9 + $0x10] sm:$0xff] %v1241_v57   ;;  %v925_v14 = vmul.f32 %v1569_v41, %v901_v9  ;;  %v884_v63 = vadd.f32 %v883_v60, %v834_v59 }
  0xdd   : > { %v945_v61 = vadd.f32 %v1575_v1, %v925_v14  ;;  %v918_v5 = vmul.f32 %v1569_v41, %v884_v63 }
  0xdf   : > { %v1261_v62 = vpack.c.bf16 %v945_v61, %v944_v58  ;;  %v854_v0 = vpop.f32.mrf.mxu2  ;;  %v938_v10 = vadd.f32 %v1575_v1, %v918_v5 }
  0xe0   : > { %v903_v2 = vpop.f32.mrf.mxu3 }
  0xe1   : > { %1273 = vst [vmem:[%s1584_s9 + $0x30] sm:$0xff] %v1261_v62   ;;  %v836_v3 = vpop.f32.mrf.mxu0  ;;  %v904_v7 = vadd.f32 %v903_v2, %v854_v0 }
  0xe2   : > { %v885_v4 = vpop.f32.mrf.mxu1 }
  0xe3   : > { %v886_v6 = vadd.f32 %v885_v4, %v836_v3  ;;  %v926_v15 = vmul.f32 %v1569_v41, %v904_v7 }
  0xe5   : > { %v919_v8 = vmul.f32 %v1569_v41, %v886_v6  ;;  %v946_v19 = vadd.f32 %v1575_v1, %v926_v15 }
  0xe7   : > { %v939_v11 = vadd.f32 %v1575_v1, %v919_v8  ;;  %v856_v12 = vpop.f32.mrf.mxu2 }
  0xe8   : > { %v905_v13 = vpop.f32.mrf.mxu3 }
  0xe9   : > { %v1246_v16 = vpack.c.bf16 %v939_v11, %v938_v10  ;;  %v906_v17 = vadd.f32 %v905_v13, %v856_v12 }
  0xeb   : > { %1270 = vst [vmem:[%s1584_s9 + $0x18] sm:$0xff] %v1246_v16   ;;  %v927_v18 = vmul.f32 %v1569_v41, %v906_v17 }
  0xed   : > { %v947_v20 = vadd.f32 %v1575_v1, %v927_v18 }
  0xef   : > { %v1266_v21 = vpack.c.bf16 %v947_v20, %v946_v19 }
  0xf1   : > { %1274 = vst [vmem:[%s1584_s9 + $0x38] sm:$0xff] %v1266_v21  }
  0xf2 PF: > { %s16_s23 = sadd.s32 1, %s1339_s23   ;;  %s1638_s21 = smov %s1335_s22 }
  0xf3   : > { %p13_p5 = scmp.ge.s32.totalorder %s16_s23, 5   ;;  %s1639_s22 = smov %s1641_s24 }
  0xf5   :  { %15 = sbr.rel (!%p13_p5) target bundleno = 2 (0x2), region = 89 }

// kernel: _lambda_.27
= control target key start
LH: loop header
LB: loop body
LE: loop exit
PB: predicated region body
PF: predicated region fallthrough
CT: control target
= control target key end

     0   :  { %s849_s15 = smov 0   ;;  %s851_s16 = smov 0   ;;  %s973_s0 = inlined_call_operand.vmem [shape: bf16[384,128], index: 0, kind: input, shape index: {}]   ;;  %s974_s1 = inlined_call_operand.vmem [shape: bf16[128,128], index: 1, kind: input, shape index: {}]   ;;  %s975_s2 = inlined_call_operand.vmem [shape: f32[1,128], index: 2, kind: input, shape index: {}]   ;;  %s976_s3 = inlined_call_operand.vmem [shape: f32[1,128], index: 3, kind: input, shape index: {}]   ;;  %s977_s4 = inlined_call_operand.vmem [shape: f32[384,128], index: 4, kind: output, shape index: {}]  }
   0x1   :  { %s853_s17 = smov 0  }
   0x2 LB: > { %s33_s18 = sadd.s32 1, %s818_s16  ;;  %p663_p0 = scmp.ge.s32.totalorder %s822_s17, 1  ;;  %s822_s17 = sphi %s853_s17, %s14_s17   ;;  %s818_s16 = sphi %s851_s16, %s979_s16   ;;  %s814_s15 = sphi %s849_s15, %s978_s15  }
   0x3   : > { %p35_p1 = scmp.ge.s32.totalorder %s33_s18, 3  ;;  %p221_p2 = scmp.lt.s32.totalorder %s822_s17, 4 }
   0x5   : > { %s981_s18 = smov (%p35_p1, %s33_s18), 0  ;;  %p222_p3 = pnand %p663_p0, %p221_p2 }
   0x6   : > { %s664_s27 = sshll.u32 (!%p222_p3), %s814_s15, 4 }
   0x7   : > { %225 = sbr.rel (%p222_p3) target bundleno = 207 (0xcf), region = 36  ;;  %p268_p4 = scmp.lt.s32.totalorder (!%p222_p3), %s664_s27, 47 }
   0xc   : > { %v749_v0 = vld [vmem:[%s974_s1 + $0x38] sm:$0xff]  ;;  %v748_v1 = vld [vmem:[%s974_s1 + $0x30] sm:$0xff]  ;;  %v747_v2 = vld [vmem:[%s974_s1 + $0x28] sm:$0xff]  ;;  %s983_s27 = smov (!%p268_p4, %s664_s27), 47 }
   0xd   : > { %428 = vmatpush.bf16.msra.mxu0 %v749_v0  ;;  %750 = vmatpush.bf16.msra.mxu1 %v749_v0  ;;  %v746_v3 = vld [vmem:[%s974_s1 + $0x20] sm:$0xff]  ;;  %v745_v4 = vld [vmem:[%s974_s1 + $0x18] sm:$0xff]  ;;  %v744_v5 = vld [vmem:[%s974_s1 + $0x10] sm:$0xff]  ;;  %s665_s8 = sshll.u32 %s983_s27, 2  ;;  %s667_s19 = sshll.u32 %s983_s27, 3 }
   0xe   : > { %751 = vmatpush.bf16.msra.mxu2 %v749_v0  ;;  %752 = vmatpush.bf16.msra.mxu3 %v749_v0  ;;  %v743_v6 = vld [vmem:[%s974_s1 + $0x8] sm:$0xff]  ;;  %v742_v7 = vld [vmem:[%s974_s1] sm:$0xff]  ;;  %s274_s13 = scalar_lea.vmem %s973_s0, %s665_s8  ;;  %s916_s24 = scalar_lea.vmem %s977_s4, %s667_s19 }
   0xf   : > { %v734_v8 = vld [vmem:[%s274_s13] sm:$0xff]  ;;  %v736_v9 = vld [vmem:[%s274_s13 + $0x10] sm:$0xff]  ;;  %v735_v12 = vld [vmem:[%s274_s13 + $0x8] sm:$0xff] }
  0x10   : > { %v738_v10 = vld [vmem:[%s274_s13 + $0x20] sm:$0xff]  ;;  %v740_v11 = vld [vmem:[%s274_s13 + $0x30] sm:$0xff]  ;;  %v737_v13 = vld [vmem:[%s274_s13 + $0x18] sm:$0xff] }
  0x11   : > { %429 = vmatpush.bf16.msra.mxu0 %v748_v1  ;;  %753 = vmatpush.bf16.msra.mxu1 %v748_v1  ;;  %v739_v14 = vld [vmem:[%s274_s13 + $0x28] sm:$0xff]  ;;  %v741_v15 = vld [vmem:[%s274_s13 + $0x38] sm:$0xff]  ;;  %v903_v16 = vld [vmem:[%s975_s2] ss:$0 sm:$0xff] }
  0x12   : > { %754 = vmatpush.bf16.msra.mxu2 %v748_v1  ;;  %755 = vmatpush.bf16.msra.mxu3 %v748_v1  ;;  %v909_v17 = vld [vmem:[%s976_s3] ss:$0 sm:$0xff] }
  0x15   : > { %430 = vmatpush.bf16.msra.mxu0 %v747_v2  ;;  %756 = vmatpush.bf16.msra.mxu1 %v747_v2 }
  0x16   : > { %757 = vmatpush.bf16.msra.mxu2 %v747_v2  ;;  %758 = vmatpush.bf16.msra.mxu3 %v747_v2 }
  0x19   : > { %431 = vmatpush.bf16.msra.mxu0 %v746_v3  ;;  %759 = vmatpush.bf16.msra.mxu1 %v746_v3 }
  0x1a   : > { %760 = vmatpush.bf16.msra.mxu2 %v746_v3  ;;  %761 = vmatpush.bf16.msra.mxu3 %v746_v3 }
  0x1d   : > { %432 = vmatpush.bf16.msra.mxu0 %v745_v4  ;;  %762 = vmatpush.bf16.msra.mxu1 %v745_v4 }
  0x1e   : > { %763 = vmatpush.bf16.msra.mxu2 %v745_v4  ;;  %764 = vmatpush.bf16.msra.mxu3 %v745_v4 }
  0x21   : > { %433 = vmatpush.bf16.msra.mxu0 %v744_v5  ;;  %765 = vmatpush.bf16.msra.mxu1 %v744_v5 }
  0x22   : > { %766 = vmatpush.bf16.msra.mxu2 %v744_v5  ;;  %767 = vmatpush.bf16.msra.mxu3 %v744_v5 }
  0x25   : > { %434 = vmatpush.bf16.msra.mxu0 %v743_v6  ;;  %768 = vmatpush.bf16.msra.mxu1 %v743_v6 }
  0x26   : > { %769 = vmatpush.bf16.msra.mxu2 %v743_v6  ;;  %770 = vmatpush.bf16.msra.mxu3 %v743_v6 }
  0x29   : > { %435 = vmatpush.bf16.msra.mxu0 %v742_v7  ;;  %771 = vmatpush.bf16.msra.mxu1 %v742_v7 }
  0x2a   : > { %772 = vmatpush.bf16.msra.mxu2 %v742_v7  ;;  %773 = vmatpush.bf16.msra.mxu3 %v742_v7 }
  0x2c   : > { %436 = vmatmul.bf16.vlgmr.msra.gmra.mxu0 %v734_v8  ;;  %446 = vmatmul.bf16.vlgmr.msra.gmra.mxu1 %v736_v9 }
  0x2d   : > { %456 = vmatmul.bf16.vlgmr.msra.gmra.mxu2 %v738_v10  ;;  %466 = vmatmul.bf16.vlgmr.msra.gmra.mxu3 %v740_v11 }
  0x3c   : > { %441 = vmatmul.bf16.gmra.mxu0 %v735_v12  ;;  %451 = vmatmul.bf16.gmra.mxu1 %v737_v13 }
  0x3d   : > { %461 = vmatmul.bf16.gmra.mxu2 %v739_v14  ;;  %471 = vmatmul.bf16.gmra.mxu3 %v741_v15 }
  0xa9   : > { %v437_v18 = vpop.f32.mrf.mxu0  ;;  %v447_v19 = vpop.f32.mrf.mxu1 }
  0xaa   : > { %v481_v20 = vmul.f32 %v903_v16, %v437_v18  ;;  %v485_v21 = vmul.f32 %v903_v16, %v447_v19 }
  0xac   : > { %v501_v22 = vadd.f32 %v909_v17, %v481_v20  ;;  %v505_v23 = vadd.f32 %v909_v17, %v485_v21 }
  0xae   : > { %517 = vst [vmem:[%s916_s24] sm:$0xff] %v501_v22 }
  0xaf   : > { %521 = vst [vmem:[%s916_s24 + $0x20] sm:$0xff] %v505_v23 }
  0xb0   : > { %v457_v24 = vpop.f32.mrf.mxu2  ;;  %v467_v25 = vpop.f32.mrf.mxu3 }
  0xb1   : > { %v489_v26 = vmul.f32 %v903_v16, %v457_v24  ;;  %v493_v27 = vmul.f32 %v903_v16, %v467_v25  ;;  %v439_v28 = vpop.f32.mrf.mxu0  ;;  %v449_v29 = vpop.f32.mrf.mxu1 }
  0xb2   : > { %v482_v30 = vmul.f32 %v903_v16, %v439_v28  ;;  %v486_v31 = vmul.f32 %v903_v16, %v449_v29 }
  0xb3   : > { %v509_v32 = vadd.f32 %v909_v17, %v489_v26  ;;  %v513_v33 = vadd.f32 %v909_v17, %v493_v27 }
  0xb4   : > { %v502_v34 = vadd.f32 %v909_v17, %v482_v30  ;;  %v506_v35 = vadd.f32 %v909_v17, %v486_v31 }
  0xb5   : > { %525 = vst [vmem:[%s916_s24 + $0x40] sm:$0xff] %v509_v32 }
  0xb6   : > { %529 = vst [vmem:[%s916_s24 + $0x60] sm:$0xff] %v513_v33 }
  0xb7   : > { %518 = vst [vmem:[%s916_s24 + $0x8] sm:$0xff] %v502_v34 }
  0xb8   : > { %522 = vst [vmem:[%s916_s24 + $0x28] sm:$0xff] %v506_v35  ;;  %v459_v36 = vpop.f32.mrf.mxu2  ;;  %v469_v37 = vpop.f32.mrf.mxu3 }
  0xb9   : > { %v490_v38 = vmul.f32 %v903_v16, %v459_v36  ;;  %v494_v39 = vmul.f32 %v903_v16, %v469_v37  ;;  %v442_v40 = vpop.f32.mrf.mxu0  ;;  %v452_v41 = vpop.f32.mrf.mxu1 }
  0xba   : > { %v483_v42 = vmul.f32 %v903_v16, %v442_v40  ;;  %v487_v43 = vmul.f32 %v903_v16, %v452_v41 }
  0xbb   : > { %v510_v44 = vadd.f32 %v909_v17, %v490_v38  ;;  %v514_v45 = vadd.f32 %v909_v17, %v494_v39 }
  0xbc   : > { %v503_v46 = vadd.f32 %v909_v17, %v483_v42  ;;  %v507_v47 = vadd.f32 %v909_v17, %v487_v43 }
  0xbd   : > { %526 = vst [vmem:[%s916_s24 + $0x48] sm:$0xff] %v510_v44 }
  0xbe   : > { %530 = vst [vmem:[%s916_s24 + $0x68] sm:$0xff] %v514_v45 }
  0xbf   : > { %519 = vst [vmem:[%s916_s24 + $0x10] sm:$0xff] %v503_v46 }
  0xc0   : > { %523 = vst [vmem:[%s916_s24 + $0x30] sm:$0xff] %v507_v47  ;;  %v462_v48 = vpop.f32.mrf.mxu2  ;;  %v472_v49 = vpop.f32.mrf.mxu3 }
  0xc1   : > { %v491_v50 = vmul.f32 %v903_v16, %v462_v48  ;;  %v495_v51 = vmul.f32 %v903_v16, %v472_v49  ;;  %v444_v52 = vpop.f32.mrf.mxu0  ;;  %v454_v53 = vpop.f32.mrf.mxu1 }
  0xc2   : > { %v484_v54 = vmul.f32 %v903_v16, %v444_v52  ;;  %v488_v55 = vmul.f32 %v903_v16, %v454_v53 }
  0xc3   : > { %v511_v56 = vadd.f32 %v909_v17, %v491_v50  ;;  %v515_v57 = vadd.f32 %v909_v17, %v495_v51 }
  0xc4   : > { %v504_v58 = vadd.f32 %v909_v17, %v484_v54  ;;  %v508_v59 = vadd.f32 %v909_v17, %v488_v55 }
  0xc5   : > { %527 = vst [vmem:[%s916_s24 + $0x50] sm:$0xff] %v511_v56 }
  0xc6   : > { %531 = vst [vmem:[%s916_s24 + $0x70] sm:$0xff] %v515_v57 }
  0xc7   : > { %520 = vst [vmem:[%s916_s24 + $0x18] sm:$0xff] %v504_v58 }
  0xc8   : > { %524 = vst [vmem:[%s916_s24 + $0x38] sm:$0xff] %v508_v59  ;;  %v464_v60 = vpop.f32.mrf.mxu2  ;;  %v474_v61 = vpop.f32.mrf.mxu3 }
  0xc9   : > { %v492_v62 = vmul.f32 %v903_v16, %v464_v60  ;;  %v496_v63 = vmul.f32 %v903_v16, %v474_v61 }
  0xcb   : > { %v512_v0 = vadd.f32 %v909_v17, %v492_v62  ;;  %v516_v1 = vadd.f32 %v909_v17, %v496_v63 }
  0xcd   : > { %528 = vst [vmem:[%s916_s24 + $0x58] sm:$0xff] %v512_v0 }
  0xce   : > { %532 = vst [vmem:[%s916_s24 + $0x78] sm:$0xff] %v516_v1 }
  0xcf PF: > { %s14_s17 = sadd.s32 1, %s822_s17   ;;  %s978_s15 = smov %s818_s16 }
  0xd0   : > { %p11_p5 = scmp.ge.s32.totalorder %s14_s17, 5   ;;  %s979_s16 = smov %s981_s18 }
  0xd2   :  { %13 = sbr.rel (!%p11_p5) target bundleno = 2 (0x2), region = 75 }

</bundles_post_ra>
